<compile_context>
chip_gen: v6e
topology: v6e:2x2x1
jax: 0.10.0
libtpu: 0.0.40
codegen_flags: <defaults>
</compile_context>

<pallas_src>
import jax
import jax.numpy as jnp
import numpy as np
from jax.experimental import pallas as pl
from jax.experimental.pallas import tpu as pltpu

LEAKY_SLOPE = 0.01   # nn.LeakyReLU() default negative_slope
BN_EPS = 1e-5        # nn.BatchNorm2d default eps


# -----------------------------------------------------------------------------
# In-kernel helpers
# -----------------------------------------------------------------------------
def _lane_group_allreduce(v, group, ngroups):
    """All-reduce across `ngroups` adjacent lane groups of width `group`.

    v: (1, ngroups*group).  Returns the per-group total replicated into every
    group (so no jnp.tile is needed to apply it).  Uses log2(ngroups) circular
    pltpu.roll + add steps (XLU slot, direction-agnostic) when ngroups is a
    power of two; falls back to a reshape reduction otherwise.
    """
    if ngroups == 1:
        return v
    total = group * ngroups
    if ngroups & (ngroups - 1) == 0:
        shift = group
        while shift < total:
            v = v + pltpu.roll(v, shift=shift, axis=1)
            shift *= 2
        return v
    vs = jnp.sum(v.reshape(ngroups, group), axis=0, keepdims=True)
    return jnp.tile(vs, (1, ngroups))


def _row_shift_matrices(R, H):
    """0/1 matrices (R,R) that shift rows by -1 / +1 within each H-row image,
    zeroing the border row (i.e. the height-direction conv padding).  Applied
    on the MXU, so the shift costs no VPU/XLU relayout work."""
    ri = jax.lax.broadcasted_iota(jnp.int32, (R, R), 0)
    ci = jax.lax.broadcasted_iota(jnp.int32, (R, R), 1)
    h = ri % H
    s_up = jnp.where((ci == ri - 1) & (h != 0), 1.0, 0.0).astype(jnp.float32)
    s_dn = jnp.where((ci == ri + 1) & (h != H - 1), 1.0, 0.0).astype(jnp.float32)
    return s_up, s_dn


def _conv_block(x, H, W, Cin, Cout, b_ref, gamma_ref, beta_ref):
    """Conv3x3(s1,p1) + BatchNorm2d(train stats) + LeakyReLU + MaxPool2d(2,2).

      x:         (N, H, W*Cin) value, lane-dense (lane order baked into b_ref)
      b_ref:     (3, W*Cin, W*Cout) banded conv weight (one slab per row tap ky;
                 kx taps + width zero padding folded into the band structure)
      gamma_ref: (1, W*Cout)  BN gamma pre-tiled to lane width
      beta_ref:  (1, W*Cout)
    Returns (N, H//2, (W//2)*Cout) value, lane order (w, c).
    """
    N = x.shape[0]
    assert x.shape[1] == H and x.shape[2] == W * Cin
    L_in = W * Cin
    Lout = W * Cout
    R = N * H
    Ho, Wo = H // 2, W // 2

    # ---- 3x3 conv: 3 banded MXU matmuls + 2 MXU row shifts ----
    x2d = x.reshape(R, L_in)
    s_up, s_dn = _row_shift_matrices(R, H)
    acc = jnp.dot(x2d, b_ref[1], preferred_element_type=jnp.float32)           # ky=1
    x_up = jnp.dot(s_up, x2d, preferred_element_type=jnp.float32)              # rows h-1
    acc += jnp.dot(x_up, b_ref[0], preferred_element_type=jnp.float32)         # ky=0
    x_dn = jnp.dot(s_dn, x2d, preferred_element_type=jnp.float32)              # rows h+1
    acc += jnp.dot(x_dn, b_ref[2], preferred_element_type=jnp.float32)         # ky=2
    # Conv bias intentionally omitted: cancelled exactly by the training-mode
    # BatchNorm batch-mean subtraction below (and it does not affect variance).

    # ---- BatchNorm2d (training batch stats, biased var), two-pass ----
    inv_m = 1.0 / float(N * H * W)
    s1 = jnp.sum(acc, axis=0, keepdims=True)                        # (1, W*Cout)
    mean_l = _lane_group_allreduce(s1, Cout, W) * inv_m             # channel mean, lane-replicated
    xc = acc - mean_l
    s2 = jnp.sum(xc * xc, axis=0, keepdims=True)
    var_l = _lane_group_allreduce(s2, Cout, W) * inv_m              # biased variance
    y = xc * (gamma_ref[...] * jax.lax.rsqrt(var_l + BN_EPS)) + beta_ref[...]

    # ---- LeakyReLU ----
    y = jnp.maximum(y, LEAKY_SLOPE * y)

    # ---- MaxPool2d(2,2): height (sublane row pairs) first, then width ----
    y = y.reshape(N * Ho, 2, Lout)
    y = jnp.maximum(y[:, 0, :], y[:, 1, :])                         # (N*Ho, W*Cout)
    y = y.reshape(N * Ho, Wo, 2 * Cout)
    y = jnp.maximum(y[:, :, :Cout], y[:, :, Cout:])                 # (N*Ho, Wo, Cout)
    return y.reshape(N, Ho, Wo * Cout)


def _make_fused_kernel(conv_dims, n_fc, in_channels):
    """One kernel for the whole network.  Ref order:
       x, [B, gamma_l, beta_l] * n_conv, [fw, fb] * n_fc, out."""
    n_conv = len(conv_dims)

    def kernel(*refs):
        idx = 0
        x_ref = refs[idx]; idx += 1
        conv_p = [refs[idx + 3 * i: idx + 3 * i + 3] for i in range(n_conv)]
        idx += 3 * n_conv
        fc_p = [refs[idx + 2 * i: idx + 2 * i + 2] for i in range(n_fc)]
        idx += 2 * n_fc
        o_ref = refs[idx]

        # NCHW -> (N, H, C*W) lane-dense layout built in-kernel (no wrapper
        # transpose / extra HBM pass); channel-major lane order is baked into
        # layer 1's banded weight.
        xv = x_ref[...]
        N = xv.shape[0]
        x = jnp.concatenate([xv[:, c, :, :] for c in range(in_channels)], axis=-1)

        for li, (H, W, Cin, Cout) in enumerate(conv_dims):
            b_ref, g_ref, be_ref = conv_p[li]
            x = _conv_block(x, H, W, Cin, Cout, b_ref, g_ref, be_ref)

        # Flatten: x is (N, Ho, Wo*C); the first FC weight's rows were permuted
        # on the host to this (h, w, c) order, so no in-kernel transpose is
        # needed (and the reshape is the identity here since Ho = Wo = 1).
        z = x.reshape(N, x.shape[1] * x.shape[2])

        for i in range(n_fc):
            fw_ref, fb_ref = fc_p[i]
            z = jnp.dot(z, fw_ref[...], preferred_element_type=jnp.float32) + fb_ref[...]
            z = jnp.maximum(z, LEAKY_SLOPE * z)

        o_ref[...] = z.astype(o_ref.dtype)

    return kernel


# -----------------------------------------------------------------------------
# Wrapper
# -----------------------------------------------------------------------------
def conv_encoder_forward(x_nchw, packed):
    """Forward pass matching the PyTorch module (training-mode BatchNorm)."""
    conv_dims = packed["dims"]
    in_channels = packed["in_channels"]
    n_fc = len(packed["fc"])

    inputs = [x_nchw.astype(jnp.float32)]
    for (b, g, be) in packed["conv"]:
        inputs += [b, g, be]
    for (w, bias) in packed["fc"]:
        inputs += [w, bias]

    N = x_nchw.shape[0]
    dout = packed["fc"][-1][0].shape[-1]
    out_shape = jax.ShapeDtypeStruct((N, dout), jnp.float32)

    # Explicit VMEM budget: inputs + params + output + headroom for the (tiny)
    # in-kernel temporaries, capped at v7x's 64 MiB physical VMEM per core.
    io_bytes = sum(int(np.prod(a.shape)) * 4 for a in inputs)
    io_bytes += int(np.prod(out_shape.shape)) * 4
    vmem_limit = int(min(max(4 * io_bytes + (4 << 20), 16 << 20), 64 << 20))

    kernel = _make_fused_kernel(conv_dims, n_fc, in_channels)
    return pl.pallas_call(
        kernel,
        out_shape=out_shape,
        in_specs=[pl.BlockSpec(memory_space=pltpu.MemorySpace.VMEM)] * len(inputs),
        out_specs=pl.BlockSpec(memory_space=pltpu.MemorySpace.VMEM),
        compiler_params=pltpu.CompilerParams(vmem_limit_bytes=vmem_limit),
    )(*inputs)


# -----------------------------------------------------------------------------
# Host-side parameter construction / packing
# -----------------------------------------------------------------------------
def init_params(key, in_channels, input_dim, encoder_features, fc_features):
    """Deterministic synthetic parameters in PyTorch layouts:
       conv weight (Cout,Cin,3,3), conv bias (Cout,), BN gamma/beta (Cout,),
       linear weight (out,in), linear bias (out,)."""
    params = {"conv": [], "fc": []}
    cin = in_channels
    h, w = input_dim
    for feat in encoder_features:
        key, k1, k2, k3, k4 = jax.random.split(key, 5)
        wconv = jax.random.normal(k1, (feat, cin, 3, 3), jnp.float32) / np.sqrt(9 * cin)
        bconv = 0.1 * jax.random.normal(k2, (feat,), jnp.float32)
        gamma = 1.0 + 0.1 * jax.random.normal(k3, (feat,), jnp.float32)
        beta = 0.1 * jax.random.normal(k4, (feat,), jnp.float32)
        params["conv"].append((wconv, bconv, gamma, beta))
        cin = feat
        h = ((h - 3 + 2) // 1 + 1 - 2) // 2 + 1      # same recursion as the torch __init__
        w = ((w - 3 + 2) // 1 + 1 - 2) // 2 + 1
    din = h * w * cin
    for feat in fc_features:
        key, k1, k2 = jax.random.split(key, 3)
        wfc = jax.random.normal(k1, (feat, din), jnp.float32) / np.sqrt(din)
        bfc = 0.1 * jax.random.normal(k2, (feat,), jnp.float32)
        params["fc"].append((wfc, bfc))
        din = feat
    return params


def _banded_conv_weight(wt, W, in_order):
    """Banded matmul weight for a 3x3 / stride-1 / pad-1 conv:
       B[ky, lane_in(w', ci), w*Cout + co] = wt[co, ci, ky, w'-w+1]  (|w'-w|<=1, else 0)
    Width-direction zero padding falls out of the band structure for free.
    `in_order`: "wc" -> input lane = w'*Cin + ci; "cw" -> input lane = ci*W + w'
    (layer-1 layout produced by the in-kernel NCHW channel concat)."""
    wt = np.asarray(wt, np.float32)
    Cout, Cin = wt.shape[0], wt.shape[1]
    B = np.zeros((3, W * Cin, W * Cout), np.float32)
    for ky in range(3):
        for w in range(W):
            for kx in range(3):
                wp = w + kx - 1
                if 0 <= wp < W:
                    blk = wt[:, :, ky, kx].T                       # (Cin, Cout)
                    cols = slice(w * Cout, (w + 1) * Cout)
                    if in_order == "wc":
                        B[ky, wp * Cin:(wp + 1) * Cin, cols] = blk
                    else:                                          # "cw"
                        B[ky, wp::W, cols] = blk
    return jnp.asarray(B)


def pack_params(params, in_channels, input_dim):
    """Re-lay-out torch-style params for the kernel (all host-side prep)."""
    packed = {"conv": [], "fc": [], "dims": [], "in_channels": in_channels}
    cin = in_channels
    h, w = input_dim
    for li, (wconv, _bconv, gamma, beta) in enumerate(params["conv"]):
        cout = wconv.shape[0]
        assert h % 2 == 0 and w % 2 == 0, "MaxPool2d(2,2) path assumes even spatial dims"
        in_order = "cw" if li == 0 else "wc"
        B = _banded_conv_weight(wconv, w, in_order)
        gamma_l = jnp.asarray(np.tile(np.asarray(gamma, np.float32), w)[None, :])
        beta_l = jnp.asarray(np.tile(np.asarray(beta, np.float32), w)[None, :])
        packed["conv"].append((B, gamma_l, beta_l))
        packed["dims"].append((h, w, cin, cout))
        cin, h, w = cout, h // 2, w // 2
    # FC0: fold torch's NCHW flatten order (c,h,w) into the weight rows so the
    # kernel flattens in its native (h,w,c) lane order with no transpose.
    ho, wo, c_last = h, w, cin
    for li, (wfc, bfc) in enumerate(params["fc"]):
        wt = np.asarray(wfc, np.float32)                            # (out, in)
        if li == 0:
            out_f = wt.shape[0]
            wk = wt.reshape(out_f, c_last, ho, wo)
            wk = np.transpose(wk, (2, 3, 1, 0)).reshape(ho * wo * c_last, out_f)
        else:
            wk = wt.T
        packed["fc"].append((jnp.asarray(wk),
                             jnp.asarray(np.asarray(bfc, np.float32))[None, :]))
    return packed


# -----------------------------------------------------------------------------
# Pure-JAX reference (for correctness verification)
# -----------------------------------------------------------------------------
def conv_encoder_ref(x, params):
    h = x.astype(jnp.float32)
    for (wconv, bconv, gamma, beta) in params["conv"]:
        h = jax.lax.conv_general_dilated(
            h, wconv, window_strides=(1, 1), padding=((1, 1), (1, 1)),
            dimension_numbers=("NCHW", "OIHW", "NCHW"),
            precision=jax.lax.Precision.HIGHEST)
        h = h + bconv[None, :, None, None]
        mean = jnp.mean(h, axis=(0, 2, 3), keepdims=True)
        var = jnp.mean(jnp.square(h - mean), axis=(0, 2, 3), keepdims=True)
        h = (h - mean) * jax.lax.rsqrt(var + BN_EPS)
        h = h * gamma[None, :, None, None] + beta[None, :, None, None]
        h = jnp.where(h >= 0, h, LEAKY_SLOPE * h)
        n, c, hh, ww = h.shape
        h = h.reshape(n, c, hh // 2, 2, ww // 2, 2).max(axis=(3, 5))
    z = h.reshape(h.shape[0], -1)
    for (wfc, bfc) in params["fc"]:
        z = jnp.dot(z, wfc.T, precision=jax.lax.Precision.HIGHEST) + bfc
        z = jnp.where(z >= 0, z, LEAKY_SLOPE * z)
    return z


# -----------------------------------------------------------------------------
if __name__ == "__main__":
    # Small shapes consistent with the module: batch=2, in_channels=4, 16x16 input.
    N, C, H, W = 2, 4, 16, 16
    encoder_features = [8, 16, 32, 64]      # spatial: 16 -> 8 -> 4 -> 2 -> 1
    fc_features = [32, 16]

    key = jax.random.PRNGKey(0)
    key, kx = jax.random.split(key)
    x = jax.random.normal(kx, (N, C, H, W), jnp.float32)

    params = init_params(key, C, [H, W], encoder_features, fc_features)
    packed = pack_params(params, C, [H, W])

    fwd = jax.jit(lambda xx: conv_encoder_forward(xx, packed))
    out = jax.block_until_ready(fwd(x))

    ref = jax.block_until_ready(conv_encoder_ref(x, params))

    assert out.shape == (N, fc_features[-1]), out.shape
    assert bool(jnp.all(jnp.isfinite(out)))
    max_err = float(jnp.max(jnp.abs(out - ref)))
    assert max_err < 2e-2, f"kernel deviates from JAX reference: max|err|={max_err}"
    print("KERNEL_OK")
</pallas_src>

<mosaic_0001>
module attributes {stable_mosaic.version = 11 : i64} {
  func.func @kernel(%arg0: memref<2x4x16x16xf32, #tpu.memory_space<vmem>>, %arg1: memref<3x64x128xf32, #tpu.memory_space<vmem>>, %arg2: memref<1x128xf32, #tpu.memory_space<vmem>>, %arg3: memref<1x128xf32, #tpu.memory_space<vmem>>, %arg4: memref<3x64x128xf32, #tpu.memory_space<vmem>>, %arg5: memref<1x128xf32, #tpu.memory_space<vmem>>, %arg6: memref<1x128xf32, #tpu.memory_space<vmem>>, %arg7: memref<3x64x128xf32, #tpu.memory_space<vmem>>, %arg8: memref<1x128xf32, #tpu.memory_space<vmem>>, %arg9: memref<1x128xf32, #tpu.memory_space<vmem>>, %arg10: memref<3x64x128xf32, #tpu.memory_space<vmem>>, %arg11: memref<1x128xf32, #tpu.memory_space<vmem>>, %arg12: memref<1x128xf32, #tpu.memory_space<vmem>>, %arg13: memref<64x32xf32, #tpu.memory_space<vmem>>, %arg14: memref<1x32xf32, #tpu.memory_space<vmem>>, %arg15: memref<32x16xf32, #tpu.memory_space<vmem>>, %arg16: memref<1x16xf32, #tpu.memory_space<vmem>>, %arg17: memref<2x16xf32, #tpu.memory_space<vmem>>) attributes {dimension_semantics = [], scalar_prefetch = 0 : i64, scratch_operands = 0 : i64, tpu.core_type = #tpu.core_type<tc>} {
    %c0 = arith.constant 0 : index
    %c0_0 = arith.constant 0 : index
    %c0_1 = arith.constant 0 : index
    %c0_2 = arith.constant 0 : index
    %0 = vector.load %arg0[%c0, %c0_0, %c0_1, %c0_2] : memref<2x4x16x16xf32, #tpu.memory_space<vmem>>, vector<2x4x16x16xf32>
    %1 = vector.extract_strided_slice %0 {offsets = [0, 0, 0, 0], sizes = [2, 1, 16, 16], strides = [1, 1, 1, 1]} : vector<2x4x16x16xf32> to vector<2x1x16x16xf32>
    %2 = vector.shape_cast %1 : vector<2x1x16x16xf32> to vector<2x16x16xf32>
    %3 = vector.extract_strided_slice %0 {offsets = [0, 1, 0, 0], sizes = [2, 1, 16, 16], strides = [1, 1, 1, 1]} : vector<2x4x16x16xf32> to vector<2x1x16x16xf32>
    %4 = vector.shape_cast %3 : vector<2x1x16x16xf32> to vector<2x16x16xf32>
    %5 = vector.extract_strided_slice %0 {offsets = [0, 2, 0, 0], sizes = [2, 1, 16, 16], strides = [1, 1, 1, 1]} : vector<2x4x16x16xf32> to vector<2x1x16x16xf32>
    %6 = vector.shape_cast %5 : vector<2x1x16x16xf32> to vector<2x16x16xf32>
    %7 = vector.extract_strided_slice %0 {offsets = [0, 3, 0, 0], sizes = [2, 1, 16, 16], strides = [1, 1, 1, 1]} : vector<2x4x16x16xf32> to vector<2x1x16x16xf32>
    %8 = vector.shape_cast %7 : vector<2x1x16x16xf32> to vector<2x16x16xf32>
    %9 = tpu.concatenate %2, %4, %6, %8 in 2 : vector<2x16x16xf32>, vector<2x16x16xf32>, vector<2x16x16xf32>, vector<2x16x16xf32> -> vector<2x16x64xf32>
    %10 = vector.shape_cast %9 : vector<2x16x64xf32> to vector<32x64xf32>
    %11 = tpu.iota {dimensions = array<i32: 0>} : vector<32x32xi32>
    %12 = tpu.iota {dimensions = array<i32: 1>} : vector<32x32xi32>
    %c16_i32 = arith.constant 16 : i32
    %c0_i32 = arith.constant 0 : i32
    %13 = arith.cmpi eq, %c16_i32, %c0_i32 : i32
    %c1_i32 = arith.constant 1 : i32
    %14 = arith.select %13, %c1_i32, %c16_i32 : i32
    %15 = vector.broadcast %14 : i32 to vector<32x32xi32>
    %16 = arith.remsi %11, %15 : vector<32x32xi32>
    %c0_i32_3 = arith.constant 0 : i32
    %17 = vector.broadcast %c0_i32_3 : i32 to vector<32x32xi32>
    %18 = arith.cmpi ne, %16, %17 : vector<32x32xi32>
    %c0_i32_4 = arith.constant 0 : i32
    %19 = vector.broadcast %c0_i32_4 : i32 to vector<32x32xi32>
    %20 = arith.cmpi slt, %16, %19 : vector<32x32xi32>
    %c0_i32_5 = arith.constant 0 : i32
    %21 = arith.cmpi slt, %14, %c0_i32_5 : i32
    %22 = vector.broadcast %21 : i1 to vector<32x32xi1>
    %23 = vector.broadcast %22 : vector<32x32xi1> to vector<32x32xi1>
    %24 = arith.xori %20, %23 : vector<32x32xi1>
    %25 = arith.andi %24, %18 : vector<32x32xi1>
    %26 = vector.broadcast %14 : i32 to vector<32x32xi32>
    %27 = arith.addi %16, %26 : vector<32x32xi32>
    %28 = arith.select %25, %27, %16 : vector<32x32xi1>, vector<32x32xi32>
    %c1_i32_6 = arith.constant 1 : i32
    %29 = vector.broadcast %c1_i32_6 : i32 to vector<32x32xi32>
    %30 = arith.subi %11, %29 : vector<32x32xi32>
    %31 = arith.cmpi eq, %12, %30 : vector<32x32xi32>
    %c0_i32_7 = arith.constant 0 : i32
    %32 = vector.broadcast %c0_i32_7 : i32 to vector<32x32xi32>
    %33 = arith.cmpi ne, %28, %32 : vector<32x32xi32>
    %34 = arith.andi %31, %33 : vector<32x32xi1>
    %cst = arith.constant 1.000000e+00 : f32
    %cst_8 = arith.constant 0.000000e+00 : f32
    %35 = vector.broadcast %cst : f32 to vector<32x32xf32>
    %36 = vector.broadcast %cst_8 : f32 to vector<32x32xf32>
    %37 = arith.select %34, %35, %36 : vector<32x32xi1>, vector<32x32xf32>
    %c1_i32_9 = arith.constant 1 : i32
    %38 = vector.broadcast %c1_i32_9 : i32 to vector<32x32xi32>
    %39 = arith.addi %11, %38 : vector<32x32xi32>
    %40 = arith.cmpi eq, %12, %39 : vector<32x32xi32>
    %c15_i32 = arith.constant 15 : i32
    %41 = vector.broadcast %c15_i32 : i32 to vector<32x32xi32>
    %42 = arith.cmpi ne, %28, %41 : vector<32x32xi32>
    %43 = arith.andi %40, %42 : vector<32x32xi1>
    %cst_10 = arith.constant 1.000000e+00 : f32
    %cst_11 = arith.constant 0.000000e+00 : f32
    %44 = vector.broadcast %cst_10 : f32 to vector<32x32xf32>
    %45 = vector.broadcast %cst_11 : f32 to vector<32x32xf32>
    %46 = arith.select %43, %44, %45 : vector<32x32xi1>, vector<32x32xf32>
    %c1 = arith.constant 1 : index
    %c0_12 = arith.constant 0 : index
    %c0_13 = arith.constant 0 : index
    %47 = vector.load %arg1[%c1, %c0_12, %c0_13] : memref<3x64x128xf32, #tpu.memory_space<vmem>>, vector<1x64x128xf32>
    %48 = vector.shape_cast %47 : vector<1x64x128xf32> to vector<64x128xf32>
    %cst_14 = arith.constant dense<0.000000e+00> : vector<32x128xf32>
    %49 = tpu.matmul %10, %48, %cst_14 {dimension_numbers = #tpu.dot_dimension_numbers<[1], [0], [0], [1], [0, 0, 1, 1], [], []>} : vector<32x64xf32>, vector<64x128xf32>, vector<32x128xf32> -> vector<32x128xf32>
    %cst_15 = arith.constant dense<0.000000e+00> : vector<32x64xf32>
    %50 = tpu.matmul %37, %10, %cst_15 {dimension_numbers = #tpu.dot_dimension_numbers<[1], [0], [0], [1], [0, 0, 1, 1], [], []>} : vector<32x32xf32>, vector<32x64xf32>, vector<32x64xf32> -> vector<32x64xf32>
    %c0_16 = arith.constant 0 : index
    %c0_17 = arith.constant 0 : index
    %c0_18 = arith.constant 0 : index
    %51 = vector.load %arg1[%c0_16, %c0_17, %c0_18] : memref<3x64x128xf32, #tpu.memory_space<vmem>>, vector<1x64x128xf32>
    %52 = vector.shape_cast %51 : vector<1x64x128xf32> to vector<64x128xf32>
    %cst_19 = arith.constant dense<0.000000e+00> : vector<32x128xf32>
    %53 = tpu.matmul %50, %52, %cst_19 {dimension_numbers = #tpu.dot_dimension_numbers<[1], [0], [0], [1], [0, 0, 1, 1], [], []>} : vector<32x64xf32>, vector<64x128xf32>, vector<32x128xf32> -> vector<32x128xf32>
    %54 = arith.addf %49, %53 : vector<32x128xf32>
    %cst_20 = arith.constant dense<0.000000e+00> : vector<32x64xf32>
    %55 = tpu.matmul %46, %10, %cst_20 {dimension_numbers = #tpu.dot_dimension_numbers<[1], [0], [0], [1], [0, 0, 1, 1], [], []>} : vector<32x32xf32>, vector<32x64xf32>, vector<32x64xf32> -> vector<32x64xf32>
    %c2 = arith.constant 2 : index
    %c0_21 = arith.constant 0 : index
    %c0_22 = arith.constant 0 : index
    %56 = vector.load %arg1[%c2, %c0_21, %c0_22] : memref<3x64x128xf32, #tpu.memory_space<vmem>>, vector<1x64x128xf32>
    %57 = vector.shape_cast %56 : vector<1x64x128xf32> to vector<64x128xf32>
    %cst_23 = arith.constant dense<0.000000e+00> : vector<32x128xf32>
    %58 = tpu.matmul %55, %57, %cst_23 {dimension_numbers = #tpu.dot_dimension_numbers<[1], [0], [0], [1], [0, 0, 1, 1], [], []>} : vector<32x64xf32>, vector<64x128xf32>, vector<32x128xf32> -> vector<32x128xf32>
    %59 = arith.addf %54, %58 : vector<32x128xf32>
    %cst_24 = arith.constant dense<0.000000e+00> : vector<128xf32>
    %60 = vector.multi_reduction <add>, %59, %cst_24 [0] : vector<32x128xf32> to vector<128xf32>
    %61 = vector.shape_cast %60 : vector<128xf32> to vector<1x128xf32>
    %c8_i32 = arith.constant 8 : i32
    %62 = tpu.dynamic_rotate %61 by %c8_i32 dim 1 : vector<1x128xf32>, i32 -> vector<1x128xf32>
    %63 = arith.addf %61, %62 : vector<1x128xf32>
    %c16_i32_25 = arith.constant 16 : i32
    %64 = tpu.dynamic_rotate %63 by %c16_i32_25 dim 1 : vector<1x128xf32>, i32 -> vector<1x128xf32>
    %65 = arith.addf %63, %64 : vector<1x128xf32>
    %c32_i32 = arith.constant 32 : i32
    %66 = tpu.dynamic_rotate %65 by %c32_i32 dim 1 : vector<1x128xf32>, i32 -> vector<1x128xf32>
    %67 = arith.addf %65, %66 : vector<1x128xf32>
    %c64_i32 = arith.constant 64 : i32
    %68 = tpu.dynamic_rotate %67 by %c64_i32 dim 1 : vector<1x128xf32>, i32 -> vector<1x128xf32>
    %69 = arith.addf %67, %68 : vector<1x128xf32>
    %cst_26 = arith.constant 0.001953125 : f32
    %70 = vector.broadcast %cst_26 : f32 to vector<1x128xf32>
    %71 = arith.mulf %69, %70 : vector<1x128xf32>
    %72 = vector.broadcast %71 : vector<1x128xf32> to vector<32x128xf32>
    %73 = arith.subf %59, %72 : vector<32x128xf32>
    %74 = arith.mulf %73, %73 : vector<32x128xf32>
    %cst_27 = arith.constant dense<0.000000e+00> : vector<128xf32>
    %75 = vector.multi_reduction <add>, %74, %cst_27 [0] : vector<32x128xf32> to vector<128xf32>
    %76 = vector.shape_cast %75 : vector<128xf32> to vector<1x128xf32>
    %c8_i32_28 = arith.constant 8 : i32
    %77 = tpu.dynamic_rotate %76 by %c8_i32_28 dim 1 : vector<1x128xf32>, i32 -> vector<1x128xf32>
    %78 = arith.addf %76, %77 : vector<1x128xf32>
    %c16_i32_29 = arith.constant 16 : i32
    %79 = tpu.dynamic_rotate %78 by %c16_i32_29 dim 1 : vector<1x128xf32>, i32 -> vector<1x128xf32>
    %80 = arith.addf %78, %79 : vector<1x128xf32>
    %c32_i32_30 = arith.constant 32 : i32
    %81 = tpu.dynamic_rotate %80 by %c32_i32_30 dim 1 : vector<1x128xf32>, i32 -> vector<1x128xf32>
    %82 = arith.addf %80, %81 : vector<1x128xf32>
    %c64_i32_31 = arith.constant 64 : i32
    %83 = tpu.dynamic_rotate %82 by %c64_i32_31 dim 1 : vector<1x128xf32>, i32 -> vector<1x128xf32>
    %84 = arith.addf %82, %83 : vector<1x128xf32>
    %cst_32 = arith.constant 0.001953125 : f32
    %85 = vector.broadcast %cst_32 : f32 to vector<1x128xf32>
    %86 = arith.mulf %84, %85 : vector<1x128xf32>
    %c0_33 = arith.constant 0 : index
    %c0_34 = arith.constant 0 : index
    %87 = vector.load %arg2[%c0_33, %c0_34] : memref<1x128xf32, #tpu.memory_space<vmem>>, vector<1x128xf32>
    %cst_35 = arith.constant 9.99999974E-6 : f32
    %88 = vector.broadcast %cst_35 : f32 to vector<1x128xf32>
    %89 = arith.addf %86, %88 : vector<1x128xf32>
    %90 = math.rsqrt %89 : vector<1x128xf32>
    %91 = arith.mulf %87, %90 : vector<1x128xf32>
    %92 = vector.broadcast %91 : vector<1x128xf32> to vector<32x128xf32>
    %93 = arith.mulf %73, %92 : vector<32x128xf32>
    %c0_36 = arith.constant 0 : index
    %c0_37 = arith.constant 0 : index
    %94 = vector.load %arg3[%c0_36, %c0_37] : memref<1x128xf32, #tpu.memory_space<vmem>>, vector<1x128xf32>
    %95 = vector.broadcast %94 : vector<1x128xf32> to vector<32x128xf32>
    %96 = arith.addf %93, %95 : vector<32x128xf32>
    %cst_38 = arith.constant 0.00999999977 : f32
    %97 = vector.broadcast %cst_38 : f32 to vector<32x128xf32>
    %98 = arith.mulf %97, %96 : vector<32x128xf32>
    %99 = arith.maximumf %96, %98 : vector<32x128xf32>
    %100 = vector.shape_cast %99 : vector<32x128xf32> to vector<16x2x128xf32>
    %101 = vector.extract_strided_slice %100 {offsets = [0, 0, 0], sizes = [16, 1, 128], strides = [1, 1, 1]} : vector<16x2x128xf32> to vector<16x1x128xf32>
    %102 = vector.shape_cast %101 : vector<16x1x128xf32> to vector<16x128xf32>
    %103 = vector.extract_strided_slice %100 {offsets = [0, 1, 0], sizes = [16, 1, 128], strides = [1, 1, 1]} : vector<16x2x128xf32> to vector<16x1x128xf32>
    %104 = vector.shape_cast %103 : vector<16x1x128xf32> to vector<16x128xf32>
    %105 = arith.maximumf %102, %104 : vector<16x128xf32>
    %106 = vector.shape_cast %105 : vector<16x128xf32> to vector<16x8x16xf32>
    %107 = vector.extract_strided_slice %106 {offsets = [0, 0, 0], sizes = [16, 8, 8], strides = [1, 1, 1]} : vector<16x8x16xf32> to vector<16x8x8xf32>
    %108 = vector.extract_strided_slice %106 {offsets = [0, 0, 8], sizes = [16, 8, 8], strides = [1, 1, 1]} : vector<16x8x16xf32> to vector<16x8x8xf32>
    %109 = arith.maximumf %107, %108 : vector<16x8x8xf32>
    %110 = vector.shape_cast %109 : vector<16x8x8xf32> to vector<2x8x64xf32>
    %111 = vector.shape_cast %110 : vector<2x8x64xf32> to vector<16x64xf32>
    %112 = tpu.iota {dimensions = array<i32: 0>} : vector<16x16xi32>
    %113 = tpu.iota {dimensions = array<i32: 1>} : vector<16x16xi32>
    %c8_i32_39 = arith.constant 8 : i32
    %c0_i32_40 = arith.constant 0 : i32
    %114 = arith.cmpi eq, %c8_i32_39, %c0_i32_40 : i32
    %c1_i32_41 = arith.constant 1 : i32
    %115 = arith.select %114, %c1_i32_41, %c8_i32_39 : i32
    %116 = vector.broadcast %115 : i32 to vector<16x16xi32>
    %117 = arith.remsi %112, %116 : vector<16x16xi32>
    %c0_i32_42 = arith.constant 0 : i32
    %118 = vector.broadcast %c0_i32_42 : i32 to vector<16x16xi32>
    %119 = arith.cmpi ne, %117, %118 : vector<16x16xi32>
    %c0_i32_43 = arith.constant 0 : i32
    %120 = vector.broadcast %c0_i32_43 : i32 to vector<16x16xi32>
    %121 = arith.cmpi slt, %117, %120 : vector<16x16xi32>
    %c0_i32_44 = arith.constant 0 : i32
    %122 = arith.cmpi slt, %115, %c0_i32_44 : i32
    %123 = vector.broadcast %122 : i1 to vector<16x16xi1>
    %124 = vector.broadcast %123 : vector<16x16xi1> to vector<16x16xi1>
    %125 = arith.xori %121, %124 : vector<16x16xi1>
    %126 = arith.andi %125, %119 : vector<16x16xi1>
    %127 = vector.broadcast %115 : i32 to vector<16x16xi32>
    %128 = arith.addi %117, %127 : vector<16x16xi32>
    %129 = arith.select %126, %128, %117 : vector<16x16xi1>, vector<16x16xi32>
    %c1_i32_45 = arith.constant 1 : i32
    %130 = vector.broadcast %c1_i32_45 : i32 to vector<16x16xi32>
    %131 = arith.subi %112, %130 : vector<16x16xi32>
    %132 = arith.cmpi eq, %113, %131 : vector<16x16xi32>
    %c0_i32_46 = arith.constant 0 : i32
    %133 = vector.broadcast %c0_i32_46 : i32 to vector<16x16xi32>
    %134 = arith.cmpi ne, %129, %133 : vector<16x16xi32>
    %135 = arith.andi %132, %134 : vector<16x16xi1>
    %cst_47 = arith.constant 1.000000e+00 : f32
    %cst_48 = arith.constant 0.000000e+00 : f32
    %136 = vector.broadcast %cst_47 : f32 to vector<16x16xf32>
    %137 = vector.broadcast %cst_48 : f32 to vector<16x16xf32>
    %138 = arith.select %135, %136, %137 : vector<16x16xi1>, vector<16x16xf32>
    %c1_i32_49 = arith.constant 1 : i32
    %139 = vector.broadcast %c1_i32_49 : i32 to vector<16x16xi32>
    %140 = arith.addi %112, %139 : vector<16x16xi32>
    %141 = arith.cmpi eq, %113, %140 : vector<16x16xi32>
    %c7_i32 = arith.constant 7 : i32
    %142 = vector.broadcast %c7_i32 : i32 to vector<16x16xi32>
    %143 = arith.cmpi ne, %129, %142 : vector<16x16xi32>
    %144 = arith.andi %141, %143 : vector<16x16xi1>
    %cst_50 = arith.constant 1.000000e+00 : f32
    %cst_51 = arith.constant 0.000000e+00 : f32
    %145 = vector.broadcast %cst_50 : f32 to vector<16x16xf32>
    %146 = vector.broadcast %cst_51 : f32 to vector<16x16xf32>
    %147 = arith.select %144, %145, %146 : vector<16x16xi1>, vector<16x16xf32>
    %c1_52 = arith.constant 1 : index
    %c0_53 = arith.constant 0 : index
    %c0_54 = arith.constant 0 : index
    %148 = vector.load %arg4[%c1_52, %c0_53, %c0_54] : memref<3x64x128xf32, #tpu.memory_space<vmem>>, vector<1x64x128xf32>
    %149 = vector.shape_cast %148 : vector<1x64x128xf32> to vector<64x128xf32>
    %cst_55 = arith.constant dense<0.000000e+00> : vector<16x128xf32>
    %150 = tpu.matmul %111, %149, %cst_55 {dimension_numbers = #tpu.dot_dimension_numbers<[1], [0], [0], [1], [0, 0, 1, 1], [], []>} : vector<16x64xf32>, vector<64x128xf32>, vector<16x128xf32> -> vector<16x128xf32>
    %cst_56 = arith.constant dense<0.000000e+00> : vector<16x64xf32>
    %151 = tpu.matmul %138, %111, %cst_56 {dimension_numbers = #tpu.dot_dimension_numbers<[1], [0], [0], [1], [0, 0, 1, 1], [], []>} : vector<16x16xf32>, vector<16x64xf32>, vector<16x64xf32> -> vector<16x64xf32>
    %c0_57 = arith.constant 0 : index
    %c0_58 = arith.constant 0 : index
    %c0_59 = arith.constant 0 : index
    %152 = vector.load %arg4[%c0_57, %c0_58, %c0_59] : memref<3x64x128xf32, #tpu.memory_space<vmem>>, vector<1x64x128xf32>
    %153 = vector.shape_cast %152 : vector<1x64x128xf32> to vector<64x128xf32>
    %cst_60 = arith.constant dense<0.000000e+00> : vector<16x128xf32>
    %154 = tpu.matmul %151, %153, %cst_60 {dimension_numbers = #tpu.dot_dimension_numbers<[1], [0], [0], [1], [0, 0, 1, 1], [], []>} : vector<16x64xf32>, vector<64x128xf32>, vector<16x128xf32> -> vector<16x128xf32>
    %155 = arith.addf %150, %154 : vector<16x128xf32>
    %cst_61 = arith.constant dense<0.000000e+00> : vector<16x64xf32>
    %156 = tpu.matmul %147, %111, %cst_61 {dimension_numbers = #tpu.dot_dimension_numbers<[1], [0], [0], [1], [0, 0, 1, 1], [], []>} : vector<16x16xf32>, vector<16x64xf32>, vector<16x64xf32> -> vector<16x64xf32>
    %c2_62 = arith.constant 2 : index
    %c0_63 = arith.constant 0 : index
    %c0_64 = arith.constant 0 : index
    %157 = vector.load %arg4[%c2_62, %c0_63, %c0_64] : memref<3x64x128xf32, #tpu.memory_space<vmem>>, vector<1x64x128xf32>
    %158 = vector.shape_cast %157 : vector<1x64x128xf32> to vector<64x128xf32>
    %cst_65 = arith.constant dense<0.000000e+00> : vector<16x128xf32>
    %159 = tpu.matmul %156, %158, %cst_65 {dimension_numbers = #tpu.dot_dimension_numbers<[1], [0], [0], [1], [0, 0, 1, 1], [], []>} : vector<16x64xf32>, vector<64x128xf32>, vector<16x128xf32> -> vector<16x128xf32>
    %160 = arith.addf %155, %159 : vector<16x128xf32>
    %cst_66 = arith.constant dense<0.000000e+00> : vector<128xf32>
    %161 = vector.multi_reduction <add>, %160, %cst_66 [0] : vector<16x128xf32> to vector<128xf32>
    %162 = vector.shape_cast %161 : vector<128xf32> to vector<1x128xf32>
    %c16_i32_67 = arith.constant 16 : i32
    %163 = tpu.dynamic_rotate %162 by %c16_i32_67 dim 1 : vector<1x128xf32>, i32 -> vector<1x128xf32>
    %164 = arith.addf %162, %163 : vector<1x128xf32>
    %c32_i32_68 = arith.constant 32 : i32
    %165 = tpu.dynamic_rotate %164 by %c32_i32_68 dim 1 : vector<1x128xf32>, i32 -> vector<1x128xf32>
    %166 = arith.addf %164, %165 : vector<1x128xf32>
    %c64_i32_69 = arith.constant 64 : i32
    %167 = tpu.dynamic_rotate %166 by %c64_i32_69 dim 1 : vector<1x128xf32>, i32 -> vector<1x128xf32>
    %168 = arith.addf %166, %167 : vector<1x128xf32>
    %cst_70 = arith.constant 7.812500e-03 : f32
    %169 = vector.broadcast %cst_70 : f32 to vector<1x128xf32>
    %170 = arith.mulf %168, %169 : vector<1x128xf32>
    %171 = vector.broadcast %170 : vector<1x128xf32> to vector<16x128xf32>
    %172 = arith.subf %160, %171 : vector<16x128xf32>
    %173 = arith.mulf %172, %172 : vector<16x128xf32>
    %cst_71 = arith.constant dense<0.000000e+00> : vector<128xf32>
    %174 = vector.multi_reduction <add>, %173, %cst_71 [0] : vector<16x128xf32> to vector<128xf32>
    %175 = vector.shape_cast %174 : vector<128xf32> to vector<1x128xf32>
    %c16_i32_72 = arith.constant 16 : i32
    %176 = tpu.dynamic_rotate %175 by %c16_i32_72 dim 1 : vector<1x128xf32>, i32 -> vector<1x128xf32>
    %177 = arith.addf %175, %176 : vector<1x128xf32>
    %c32_i32_73 = arith.constant 32 : i32
    %178 = tpu.dynamic_rotate %177 by %c32_i32_73 dim 1 : vector<1x128xf32>, i32 -> vector<1x128xf32>
    %179 = arith.addf %177, %178 : vector<1x128xf32>
    %c64_i32_74 = arith.constant 64 : i32
    %180 = tpu.dynamic_rotate %179 by %c64_i32_74 dim 1 : vector<1x128xf32>, i32 -> vector<1x128xf32>
    %181 = arith.addf %179, %180 : vector<1x128xf32>
    %cst_75 = arith.constant 7.812500e-03 : f32
    %182 = vector.broadcast %cst_75 : f32 to vector<1x128xf32>
    %183 = arith.mulf %181, %182 : vector<1x128xf32>
    %c0_76 = arith.constant 0 : index
    %c0_77 = arith.constant 0 : index
    %184 = vector.load %arg5[%c0_76, %c0_77] : memref<1x128xf32, #tpu.memory_space<vmem>>, vector<1x128xf32>
    %cst_78 = arith.constant 9.99999974E-6 : f32
    %185 = vector.broadcast %cst_78 : f32 to vector<1x128xf32>
    %186 = arith.addf %183, %185 : vector<1x128xf32>
    %187 = math.rsqrt %186 : vector<1x128xf32>
    %188 = arith.mulf %184, %187 : vector<1x128xf32>
    %189 = vector.broadcast %188 : vector<1x128xf32> to vector<16x128xf32>
    %190 = arith.mulf %172, %189 : vector<16x128xf32>
    %c0_79 = arith.constant 0 : index
    %c0_80 = arith.constant 0 : index
    %191 = vector.load %arg6[%c0_79, %c0_80] : memref<1x128xf32, #tpu.memory_space<vmem>>, vector<1x128xf32>
    %192 = vector.broadcast %191 : vector<1x128xf32> to vector<16x128xf32>
    %193 = arith.addf %190, %192 : vector<16x128xf32>
    %cst_81 = arith.constant 0.00999999977 : f32
    %194 = vector.broadcast %cst_81 : f32 to vector<16x128xf32>
    %195 = arith.mulf %194, %193 : vector<16x128xf32>
    %196 = arith.maximumf %193, %195 : vector<16x128xf32>
    %197 = vector.shape_cast %196 : vector<16x128xf32> to vector<8x2x128xf32>
    %198 = vector.extract_strided_slice %197 {offsets = [0, 0, 0], sizes = [8, 1, 128], strides = [1, 1, 1]} : vector<8x2x128xf32> to vector<8x1x128xf32>
    %199 = vector.shape_cast %198 : vector<8x1x128xf32> to vector<8x128xf32>
    %200 = vector.extract_strided_slice %197 {offsets = [0, 1, 0], sizes = [8, 1, 128], strides = [1, 1, 1]} : vector<8x2x128xf32> to vector<8x1x128xf32>
    %201 = vector.shape_cast %200 : vector<8x1x128xf32> to vector<8x128xf32>
    %202 = arith.maximumf %199, %201 : vector<8x128xf32>
    %203 = vector.shape_cast %202 : vector<8x128xf32> to vector<8x4x32xf32>
    %204 = vector.extract_strided_slice %203 {offsets = [0, 0, 0], sizes = [8, 4, 16], strides = [1, 1, 1]} : vector<8x4x32xf32> to vector<8x4x16xf32>
    %205 = vector.extract_strided_slice %203 {offsets = [0, 0, 16], sizes = [8, 4, 16], strides = [1, 1, 1]} : vector<8x4x32xf32> to vector<8x4x16xf32>
    %206 = arith.maximumf %204, %205 : vector<8x4x16xf32>
    %207 = vector.shape_cast %206 : vector<8x4x16xf32> to vector<2x4x64xf32>
    %208 = vector.shape_cast %207 : vector<2x4x64xf32> to vector<8x64xf32>
    %209 = tpu.iota {dimensions = array<i32: 0>} : vector<8x8xi32>
    %210 = tpu.iota {dimensions = array<i32: 1>} : vector<8x8xi32>
    %c4_i32 = arith.constant 4 : i32
    %c0_i32_82 = arith.constant 0 : i32
    %211 = arith.cmpi eq, %c4_i32, %c0_i32_82 : i32
    %c1_i32_83 = arith.constant 1 : i32
    %212 = arith.select %211, %c1_i32_83, %c4_i32 : i32
    %213 = vector.broadcast %212 : i32 to vector<8x8xi32>
    %214 = arith.remsi %209, %213 : vector<8x8xi32>
    %c0_i32_84 = arith.constant 0 : i32
    %215 = vector.broadcast %c0_i32_84 : i32 to vector<8x8xi32>
    %216 = arith.cmpi ne, %214, %215 : vector<8x8xi32>
    %c0_i32_85 = arith.constant 0 : i32
    %217 = vector.broadcast %c0_i32_85 : i32 to vector<8x8xi32>
    %218 = arith.cmpi slt, %214, %217 : vector<8x8xi32>
    %c0_i32_86 = arith.constant 0 : i32
    %219 = arith.cmpi slt, %212, %c0_i32_86 : i32
    %220 = vector.broadcast %219 : i1 to vector<8x8xi1>
    %221 = vector.broadcast %220 : vector<8x8xi1> to vector<8x8xi1>
    %222 = arith.xori %218, %221 : vector<8x8xi1>
    %223 = arith.andi %222, %216 : vector<8x8xi1>
    %224 = vector.broadcast %212 : i32 to vector<8x8xi32>
    %225 = arith.addi %214, %224 : vector<8x8xi32>
    %226 = arith.select %223, %225, %214 : vector<8x8xi1>, vector<8x8xi32>
    %c1_i32_87 = arith.constant 1 : i32
    %227 = vector.broadcast %c1_i32_87 : i32 to vector<8x8xi32>
    %228 = arith.subi %209, %227 : vector<8x8xi32>
    %229 = arith.cmpi eq, %210, %228 : vector<8x8xi32>
    %c0_i32_88 = arith.constant 0 : i32
    %230 = vector.broadcast %c0_i32_88 : i32 to vector<8x8xi32>
    %231 = arith.cmpi ne, %226, %230 : vector<8x8xi32>
    %232 = arith.andi %229, %231 : vector<8x8xi1>
    %cst_89 = arith.constant 1.000000e+00 : f32
    %cst_90 = arith.constant 0.000000e+00 : f32
    %233 = vector.broadcast %cst_89 : f32 to vector<8x8xf32>
    %234 = vector.broadcast %cst_90 : f32 to vector<8x8xf32>
    %235 = arith.select %232, %233, %234 : vector<8x8xi1>, vector<8x8xf32>
    %c1_i32_91 = arith.constant 1 : i32
    %236 = vector.broadcast %c1_i32_91 : i32 to vector<8x8xi32>
    %237 = arith.addi %209, %236 : vector<8x8xi32>
    %238 = arith.cmpi eq, %210, %237 : vector<8x8xi32>
    %c3_i32 = arith.constant 3 : i32
    %239 = vector.broadcast %c3_i32 : i32 to vector<8x8xi32>
    %240 = arith.cmpi ne, %226, %239 : vector<8x8xi32>
    %241 = arith.andi %238, %240 : vector<8x8xi1>
    %cst_92 = arith.constant 1.000000e+00 : f32
    %cst_93 = arith.constant 0.000000e+00 : f32
    %242 = vector.broadcast %cst_92 : f32 to vector<8x8xf32>
    %243 = vector.broadcast %cst_93 : f32 to vector<8x8xf32>
    %244 = arith.select %241, %242, %243 : vector<8x8xi1>, vector<8x8xf32>
    %c1_94 = arith.constant 1 : index
    %c0_95 = arith.constant 0 : index
    %c0_96 = arith.constant 0 : index
    %245 = vector.load %arg7[%c1_94, %c0_95, %c0_96] : memref<3x64x128xf32, #tpu.memory_space<vmem>>, vector<1x64x128xf32>
    %246 = vector.shape_cast %245 : vector<1x64x128xf32> to vector<64x128xf32>
    %cst_97 = arith.constant dense<0.000000e+00> : vector<8x128xf32>
    %247 = tpu.matmul %208, %246, %cst_97 {dimension_numbers = #tpu.dot_dimension_numbers<[1], [0], [0], [1], [0, 0, 1, 1], [], []>} : vector<8x64xf32>, vector<64x128xf32>, vector<8x128xf32> -> vector<8x128xf32>
    %cst_98 = arith.constant dense<0.000000e+00> : vector<8x64xf32>
    %248 = tpu.matmul %235, %208, %cst_98 {dimension_numbers = #tpu.dot_dimension_numbers<[1], [0], [0], [1], [0, 0, 1, 1], [], []>} : vector<8x8xf32>, vector<8x64xf32>, vector<8x64xf32> -> vector<8x64xf32>
    %c0_99 = arith.constant 0 : index
    %c0_100 = arith.constant 0 : index
    %c0_101 = arith.constant 0 : index
    %249 = vector.load %arg7[%c0_99, %c0_100, %c0_101] : memref<3x64x128xf32, #tpu.memory_space<vmem>>, vector<1x64x128xf32>
    %250 = vector.shape_cast %249 : vector<1x64x128xf32> to vector<64x128xf32>
    %cst_102 = arith.constant dense<0.000000e+00> : vector<8x128xf32>
    %251 = tpu.matmul %248, %250, %cst_102 {dimension_numbers = #tpu.dot_dimension_numbers<[1], [0], [0], [1], [0, 0, 1, 1], [], []>} : vector<8x64xf32>, vector<64x128xf32>, vector<8x128xf32> -> vector<8x128xf32>
    %252 = arith.addf %247, %251 : vector<8x128xf32>
    %cst_103 = arith.constant dense<0.000000e+00> : vector<8x64xf32>
    %253 = tpu.matmul %244, %208, %cst_103 {dimension_numbers = #tpu.dot_dimension_numbers<[1], [0], [0], [1], [0, 0, 1, 1], [], []>} : vector<8x8xf32>, vector<8x64xf32>, vector<8x64xf32> -> vector<8x64xf32>
    %c2_104 = arith.constant 2 : index
    %c0_105 = arith.constant 0 : index
    %c0_106 = arith.constant 0 : index
    %254 = vector.load %arg7[%c2_104, %c0_105, %c0_106] : memref<3x64x128xf32, #tpu.memory_space<vmem>>, vector<1x64x128xf32>
    %255 = vector.shape_cast %254 : vector<1x64x128xf32> to vector<64x128xf32>
    %cst_107 = arith.constant dense<0.000000e+00> : vector<8x128xf32>
    %256 = tpu.matmul %253, %255, %cst_107 {dimension_numbers = #tpu.dot_dimension_numbers<[1], [0], [0], [1], [0, 0, 1, 1], [], []>} : vector<8x64xf32>, vector<64x128xf32>, vector<8x128xf32> -> vector<8x128xf32>
    %257 = arith.addf %252, %256 : vector<8x128xf32>
    %cst_108 = arith.constant dense<0.000000e+00> : vector<128xf32>
    %258 = vector.multi_reduction <add>, %257, %cst_108 [0] : vector<8x128xf32> to vector<128xf32>
    %259 = vector.shape_cast %258 : vector<128xf32> to vector<1x128xf32>
    %c32_i32_109 = arith.constant 32 : i32
    %260 = tpu.dynamic_rotate %259 by %c32_i32_109 dim 1 : vector<1x128xf32>, i32 -> vector<1x128xf32>
    %261 = arith.addf %259, %260 : vector<1x128xf32>
    %c64_i32_110 = arith.constant 64 : i32
    %262 = tpu.dynamic_rotate %261 by %c64_i32_110 dim 1 : vector<1x128xf32>, i32 -> vector<1x128xf32>
    %263 = arith.addf %261, %262 : vector<1x128xf32>
    %cst_111 = arith.constant 3.125000e-02 : f32
    %264 = vector.broadcast %cst_111 : f32 to vector<1x128xf32>
    %265 = arith.mulf %263, %264 : vector<1x128xf32>
    %266 = vector.broadcast %265 : vector<1x128xf32> to vector<8x128xf32>
    %267 = arith.subf %257, %266 : vector<8x128xf32>
    %268 = arith.mulf %267, %267 : vector<8x128xf32>
    %cst_112 = arith.constant dense<0.000000e+00> : vector<128xf32>
    %269 = vector.multi_reduction <add>, %268, %cst_112 [0] : vector<8x128xf32> to vector<128xf32>
    %270 = vector.shape_cast %269 : vector<128xf32> to vector<1x128xf32>
    %c32_i32_113 = arith.constant 32 : i32
    %271 = tpu.dynamic_rotate %270 by %c32_i32_113 dim 1 : vector<1x128xf32>, i32 -> vector<1x128xf32>
    %272 = arith.addf %270, %271 : vector<1x128xf32>
    %c64_i32_114 = arith.constant 64 : i32
    %273 = tpu.dynamic_rotate %272 by %c64_i32_114 dim 1 : vector<1x128xf32>, i32 -> vector<1x128xf32>
    %274 = arith.addf %272, %273 : vector<1x128xf32>
    %cst_115 = arith.constant 3.125000e-02 : f32
    %275 = vector.broadcast %cst_115 : f32 to vector<1x128xf32>
    %276 = arith.mulf %274, %275 : vector<1x128xf32>
    %c0_116 = arith.constant 0 : index
    %c0_117 = arith.constant 0 : index
    %277 = vector.load %arg8[%c0_116, %c0_117] : memref<1x128xf32, #tpu.memory_space<vmem>>, vector<1x128xf32>
    %cst_118 = arith.constant 9.99999974E-6 : f32
    %278 = vector.broadcast %cst_118 : f32 to vector<1x128xf32>
    %279 = arith.addf %276, %278 : vector<1x128xf32>
    %280 = math.rsqrt %279 : vector<1x128xf32>
    %281 = arith.mulf %277, %280 : vector<1x128xf32>
    %282 = vector.broadcast %281 : vector<1x128xf32> to vector<8x128xf32>
    %283 = arith.mulf %267, %282 : vector<8x128xf32>
    %c0_119 = arith.constant 0 : index
    %c0_120 = arith.constant 0 : index
    %284 = vector.load %arg9[%c0_119, %c0_120] : memref<1x128xf32, #tpu.memory_space<vmem>>, vector<1x128xf32>
    %285 = vector.broadcast %284 : vector<1x128xf32> to vector<8x128xf32>
    %286 = arith.addf %283, %285 : vector<8x128xf32>
    %cst_121 = arith.constant 0.00999999977 : f32
    %287 = vector.broadcast %cst_121 : f32 to vector<8x128xf32>
    %288 = arith.mulf %287, %286 : vector<8x128xf32>
    %289 = arith.maximumf %286, %288 : vector<8x128xf32>
    %290 = vector.shape_cast %289 : vector<8x128xf32> to vector<4x2x128xf32>
    %291 = vector.extract_strided_slice %290 {offsets = [0, 0, 0], sizes = [4, 1, 128], strides = [1, 1, 1]} : vector<4x2x128xf32> to vector<4x1x128xf32>
    %292 = vector.shape_cast %291 : vector<4x1x128xf32> to vector<4x128xf32>
    %293 = vector.extract_strided_slice %290 {offsets = [0, 1, 0], sizes = [4, 1, 128], strides = [1, 1, 1]} : vector<4x2x128xf32> to vector<4x1x128xf32>
    %294 = vector.shape_cast %293 : vector<4x1x128xf32> to vector<4x128xf32>
    %295 = arith.maximumf %292, %294 : vector<4x128xf32>
    %296 = vector.shape_cast %295 : vector<4x128xf32> to vector<4x2x64xf32>
    %297 = vector.extract_strided_slice %296 {offsets = [0, 0, 0], sizes = [4, 2, 32], strides = [1, 1, 1]} : vector<4x2x64xf32> to vector<4x2x32xf32>
    %298 = vector.extract_strided_slice %296 {offsets = [0, 0, 32], sizes = [4, 2, 32], strides = [1, 1, 1]} : vector<4x2x64xf32> to vector<4x2x32xf32>
    %299 = arith.maximumf %297, %298 : vector<4x2x32xf32>
    %300 = vector.shape_cast %299 : vector<4x2x32xf32> to vector<2x2x64xf32>
    %301 = vector.shape_cast %300 : vector<2x2x64xf32> to vector<4x64xf32>
    %302 = tpu.iota {dimensions = array<i32: 0>} : vector<4x4xi32>
    %303 = tpu.iota {dimensions = array<i32: 1>} : vector<4x4xi32>
    %c2_i32 = arith.constant 2 : i32
    %c0_i32_122 = arith.constant 0 : i32
    %304 = arith.cmpi eq, %c2_i32, %c0_i32_122 : i32
    %c1_i32_123 = arith.constant 1 : i32
    %305 = arith.select %304, %c1_i32_123, %c2_i32 : i32
    %306 = vector.broadcast %305 : i32 to vector<4x4xi32>
    %307 = arith.remsi %302, %306 : vector<4x4xi32>
    %c0_i32_124 = arith.constant 0 : i32
    %308 = vector.broadcast %c0_i32_124 : i32 to vector<4x4xi32>
    %309 = arith.cmpi ne, %307, %308 : vector<4x4xi32>
    %c0_i32_125 = arith.constant 0 : i32
    %310 = vector.broadcast %c0_i32_125 : i32 to vector<4x4xi32>
    %311 = arith.cmpi slt, %307, %310 : vector<4x4xi32>
    %c0_i32_126 = arith.constant 0 : i32
    %312 = arith.cmpi slt, %305, %c0_i32_126 : i32
    %313 = vector.broadcast %312 : i1 to vector<4x4xi1>
    %314 = vector.broadcast %313 : vector<4x4xi1> to vector<4x4xi1>
    %315 = arith.xori %311, %314 : vector<4x4xi1>
    %316 = arith.andi %315, %309 : vector<4x4xi1>
    %317 = vector.broadcast %305 : i32 to vector<4x4xi32>
    %318 = arith.addi %307, %317 : vector<4x4xi32>
    %319 = arith.select %316, %318, %307 : vector<4x4xi1>, vector<4x4xi32>
    %c1_i32_127 = arith.constant 1 : i32
    %320 = vector.broadcast %c1_i32_127 : i32 to vector<4x4xi32>
    %321 = arith.subi %302, %320 : vector<4x4xi32>
    %322 = arith.cmpi eq, %303, %321 : vector<4x4xi32>
    %c0_i32_128 = arith.constant 0 : i32
    %323 = vector.broadcast %c0_i32_128 : i32 to vector<4x4xi32>
    %324 = arith.cmpi ne, %319, %323 : vector<4x4xi32>
    %325 = arith.andi %322, %324 : vector<4x4xi1>
    %cst_129 = arith.constant 1.000000e+00 : f32
    %cst_130 = arith.constant 0.000000e+00 : f32
    %326 = vector.broadcast %cst_129 : f32 to vector<4x4xf32>
    %327 = vector.broadcast %cst_130 : f32 to vector<4x4xf32>
    %328 = arith.select %325, %326, %327 : vector<4x4xi1>, vector<4x4xf32>
    %c1_i32_131 = arith.constant 1 : i32
    %329 = vector.broadcast %c1_i32_131 : i32 to vector<4x4xi32>
    %330 = arith.addi %302, %329 : vector<4x4xi32>
    %331 = arith.cmpi eq, %303, %330 : vector<4x4xi32>
    %c1_i32_132 = arith.constant 1 : i32
    %332 = vector.broadcast %c1_i32_132 : i32 to vector<4x4xi32>
    %333 = arith.cmpi ne, %319, %332 : vector<4x4xi32>
    %334 = arith.andi %331, %333 : vector<4x4xi1>
    %cst_133 = arith.constant 1.000000e+00 : f32
    %cst_134 = arith.constant 0.000000e+00 : f32
    %335 = vector.broadcast %cst_133 : f32 to vector<4x4xf32>
    %336 = vector.broadcast %cst_134 : f32 to vector<4x4xf32>
    %337 = arith.select %334, %335, %336 : vector<4x4xi1>, vector<4x4xf32>
    %c1_135 = arith.constant 1 : index
    %c0_136 = arith.constant 0 : index
    %c0_137 = arith.constant 0 : index
    %338 = vector.load %arg10[%c1_135, %c0_136, %c0_137] : memref<3x64x128xf32, #tpu.memory_space<vmem>>, vector<1x64x128xf32>
    %339 = vector.shape_cast %338 : vector<1x64x128xf32> to vector<64x128xf32>
    %cst_138 = arith.constant dense<0.000000e+00> : vector<4x128xf32>
    %340 = tpu.matmul %301, %339, %cst_138 {dimension_numbers = #tpu.dot_dimension_numbers<[1], [0], [0], [1], [0, 0, 1, 1], [], []>} : vector<4x64xf32>, vector<64x128xf32>, vector<4x128xf32> -> vector<4x128xf32>
    %cst_139 = arith.constant dense<0.000000e+00> : vector<4x64xf32>
    %341 = tpu.matmul %328, %301, %cst_139 {dimension_numbers = #tpu.dot_dimension_numbers<[1], [0], [0], [1], [0, 0, 1, 1], [], []>} : vector<4x4xf32>, vector<4x64xf32>, vector<4x64xf32> -> vector<4x64xf32>
    %c0_140 = arith.constant 0 : index
    %c0_141 = arith.constant 0 : index
    %c0_142 = arith.constant 0 : index
    %342 = vector.load %arg10[%c0_140, %c0_141, %c0_142] : memref<3x64x128xf32, #tpu.memory_space<vmem>>, vector<1x64x128xf32>
    %343 = vector.shape_cast %342 : vector<1x64x128xf32> to vector<64x128xf32>
    %cst_143 = arith.constant dense<0.000000e+00> : vector<4x128xf32>
    %344 = tpu.matmul %341, %343, %cst_143 {dimension_numbers = #tpu.dot_dimension_numbers<[1], [0], [0], [1], [0, 0, 1, 1], [], []>} : vector<4x64xf32>, vector<64x128xf32>, vector<4x128xf32> -> vector<4x128xf32>
    %345 = arith.addf %340, %344 : vector<4x128xf32>
    %cst_144 = arith.constant dense<0.000000e+00> : vector<4x64xf32>
    %346 = tpu.matmul %337, %301, %cst_144 {dimension_numbers = #tpu.dot_dimension_numbers<[1], [0], [0], [1], [0, 0, 1, 1], [], []>} : vector<4x4xf32>, vector<4x64xf32>, vector<4x64xf32> -> vector<4x64xf32>
    %c2_145 = arith.constant 2 : index
    %c0_146 = arith.constant 0 : index
    %c0_147 = arith.constant 0 : index
    %347 = vector.load %arg10[%c2_145, %c0_146, %c0_147] : memref<3x64x128xf32, #tpu.memory_space<vmem>>, vector<1x64x128xf32>
    %348 = vector.shape_cast %347 : vector<1x64x128xf32> to vector<64x128xf32>
    %cst_148 = arith.constant dense<0.000000e+00> : vector<4x128xf32>
    %349 = tpu.matmul %346, %348, %cst_148 {dimension_numbers = #tpu.dot_dimension_numbers<[1], [0], [0], [1], [0, 0, 1, 1], [], []>} : vector<4x64xf32>, vector<64x128xf32>, vector<4x128xf32> -> vector<4x128xf32>
    %350 = arith.addf %345, %349 : vector<4x128xf32>
    %cst_149 = arith.constant dense<0.000000e+00> : vector<128xf32>
    %351 = vector.multi_reduction <add>, %350, %cst_149 [0] : vector<4x128xf32> to vector<128xf32>
    %352 = vector.shape_cast %351 : vector<128xf32> to vector<1x128xf32>
    %c64_i32_150 = arith.constant 64 : i32
    %353 = tpu.dynamic_rotate %352 by %c64_i32_150 dim 1 : vector<1x128xf32>, i32 -> vector<1x128xf32>
    %354 = arith.addf %352, %353 : vector<1x128xf32>
    %cst_151 = arith.constant 1.250000e-01 : f32
    %355 = vector.broadcast %cst_151 : f32 to vector<1x128xf32>
    %356 = arith.mulf %354, %355 : vector<1x128xf32>
    %357 = vector.broadcast %356 : vector<1x128xf32> to vector<4x128xf32>
    %358 = arith.subf %350, %357 : vector<4x128xf32>
    %359 = arith.mulf %358, %358 : vector<4x128xf32>
    %cst_152 = arith.constant dense<0.000000e+00> : vector<128xf32>
    %360 = vector.multi_reduction <add>, %359, %cst_152 [0] : vector<4x128xf32> to vector<128xf32>
    %361 = vector.shape_cast %360 : vector<128xf32> to vector<1x128xf32>
    %c64_i32_153 = arith.constant 64 : i32
    %362 = tpu.dynamic_rotate %361 by %c64_i32_153 dim 1 : vector<1x128xf32>, i32 -> vector<1x128xf32>
    %363 = arith.addf %361, %362 : vector<1x128xf32>
    %cst_154 = arith.constant 1.250000e-01 : f32
    %364 = vector.broadcast %cst_154 : f32 to vector<1x128xf32>
    %365 = arith.mulf %363, %364 : vector<1x128xf32>
    %c0_155 = arith.constant 0 : index
    %c0_156 = arith.constant 0 : index
    %366 = vector.load %arg11[%c0_155, %c0_156] : memref<1x128xf32, #tpu.memory_space<vmem>>, vector<1x128xf32>
    %cst_157 = arith.constant 9.99999974E-6 : f32
    %367 = vector.broadcast %cst_157 : f32 to vector<1x128xf32>
    %368 = arith.addf %365, %367 : vector<1x128xf32>
    %369 = math.rsqrt %368 : vector<1x128xf32>
    %370 = arith.mulf %366, %369 : vector<1x128xf32>
    %371 = vector.broadcast %370 : vector<1x128xf32> to vector<4x128xf32>
    %372 = arith.mulf %358, %371 : vector<4x128xf32>
    %c0_158 = arith.constant 0 : index
    %c0_159 = arith.constant 0 : index
    %373 = vector.load %arg12[%c0_158, %c0_159] : memref<1x128xf32, #tpu.memory_space<vmem>>, vector<1x128xf32>
    %374 = vector.broadcast %373 : vector<1x128xf32> to vector<4x128xf32>
    %375 = arith.addf %372, %374 : vector<4x128xf32>
    %cst_160 = arith.constant 0.00999999977 : f32
    %376 = vector.broadcast %cst_160 : f32 to vector<4x128xf32>
    %377 = arith.mulf %376, %375 : vector<4x128xf32>
    %378 = arith.maximumf %375, %377 : vector<4x128xf32>
    %379 = vector.shape_cast %378 : vector<4x128xf32> to vector<2x2x128xf32>
    %380 = vector.extract_strided_slice %379 {offsets = [0, 0, 0], sizes = [2, 1, 128], strides = [1, 1, 1]} : vector<2x2x128xf32> to vector<2x1x128xf32>
    %381 = vector.shape_cast %380 : vector<2x1x128xf32> to vector<2x128xf32>
    %382 = vector.extract_strided_slice %379 {offsets = [0, 1, 0], sizes = [2, 1, 128], strides = [1, 1, 1]} : vector<2x2x128xf32> to vector<2x1x128xf32>
    %383 = vector.shape_cast %382 : vector<2x1x128xf32> to vector<2x128xf32>
    %384 = arith.maximumf %381, %383 : vector<2x128xf32>
    %385 = vector.shape_cast %384 : vector<2x128xf32> to vector<2x1x128xf32>
    %386 = vector.extract_strided_slice %385 {offsets = [0, 0, 0], sizes = [2, 1, 64], strides = [1, 1, 1]} : vector<2x1x128xf32> to vector<2x1x64xf32>
    %387 = vector.extract_strided_slice %385 {offsets = [0, 0, 64], sizes = [2, 1, 64], strides = [1, 1, 1]} : vector<2x1x128xf32> to vector<2x1x64xf32>
    %388 = arith.maximumf %386, %387 : vector<2x1x64xf32>
    %389 = vector.shape_cast %388 : vector<2x1x64xf32> to vector<2x64xf32>
    %c0_161 = arith.constant 0 : index
    %c0_162 = arith.constant 0 : index
    %390 = vector.load %arg13[%c0_161, %c0_162] : memref<64x32xf32, #tpu.memory_space<vmem>>, vector<64x32xf32>
    %cst_163 = arith.constant dense<0.000000e+00> : vector<2x32xf32>
    %391 = tpu.matmul %389, %390, %cst_163 {dimension_numbers = #tpu.dot_dimension_numbers<[1], [0], [0], [1], [0, 0, 1, 1], [], []>} : vector<2x64xf32>, vector<64x32xf32>, vector<2x32xf32> -> vector<2x32xf32>
    %c0_164 = arith.constant 0 : index
    %c0_165 = arith.constant 0 : index
    %392 = vector.load %arg14[%c0_164, %c0_165] : memref<1x32xf32, #tpu.memory_space<vmem>>, vector<1x32xf32>
    %393 = vector.broadcast %392 : vector<1x32xf32> to vector<2x32xf32>
    %394 = arith.addf %391, %393 : vector<2x32xf32>
    %cst_166 = arith.constant 0.00999999977 : f32
    %395 = vector.broadcast %cst_166 : f32 to vector<2x32xf32>
    %396 = arith.mulf %395, %394 : vector<2x32xf32>
    %397 = arith.maximumf %394, %396 : vector<2x32xf32>
    %c0_167 = arith.constant 0 : index
    %c0_168 = arith.constant 0 : index
    %398 = vector.load %arg15[%c0_167, %c0_168] : memref<32x16xf32, #tpu.memory_space<vmem>>, vector<32x16xf32>
    %cst_169 = arith.constant dense<0.000000e+00> : vector<2x16xf32>
    %399 = tpu.matmul %397, %398, %cst_169 {dimension_numbers = #tpu.dot_dimension_numbers<[1], [0], [0], [1], [0, 0, 1, 1], [], []>} : vector<2x32xf32>, vector<32x16xf32>, vector<2x16xf32> -> vector<2x16xf32>
    %c0_170 = arith.constant 0 : index
    %c0_171 = arith.constant 0 : index
    %400 = vector.load %arg16[%c0_170, %c0_171] : memref<1x16xf32, #tpu.memory_space<vmem>>, vector<1x16xf32>
    %401 = vector.broadcast %400 : vector<1x16xf32> to vector<2x16xf32>
    %402 = arith.addf %399, %401 : vector<2x16xf32>
    %cst_172 = arith.constant 0.00999999977 : f32
    %403 = vector.broadcast %cst_172 : f32 to vector<2x16xf32>
    %404 = arith.mulf %403, %402 : vector<2x16xf32>
    %405 = arith.maximumf %402, %404 : vector<2x16xf32>
    %c0_173 = arith.constant 0 : index
    %c0_174 = arith.constant 0 : index
    %406 = vector.load %arg17[%c0_173, %c0_174] : memref<2x16xf32, #tpu.memory_space<vmem>>, vector<2x16xf32>
    tpu.vector_store %arg17[%c0_173, %c0_174], %405 {strides = array<i32>} : memref<2x16xf32, #tpu.memory_space<vmem>>, vector<2x16xf32>,
    return
  }
}

</mosaic_0001>

<bundles_post_ra>
// kernel: _lambda_.1
= control target key start
LH: loop header
LB: loop body
LE: loop exit
PB: predicated region body
PF: predicated region fallthrough
CT: control target
= control target key end

     0   :  { %s8688_s0 = inlined_call_operand.hbm [shape: f32[2,4,16,16], index: 0, kind: input, shape index: {}]   ;;  %s8689_s1 = inlined_call_operand.hbm [shape: f32[3,64,128], index: 1, kind: input, shape index: {}]   ;;  %s8690_s2 = inlined_call_operand.hbm [shape: f32[1,128], index: 2, kind: input, shape index: {}]   ;;  %s8691_s3 = inlined_call_operand.hbm [shape: f32[1,128], index: 3, kind: input, shape index: {}]   ;;  %s8692_s4 = inlined_call_operand.hbm [shape: f32[3,64,128], index: 4, kind: input, shape index: {}]   ;;  %s8693_s5 = inlined_call_operand.vmem [shape: f32[1,128], index: 5, kind: input, shape index: {}]   ;;  %s8694_s6 = inlined_call_operand.vmem [shape: f32[1,128], index: 6, kind: input, shape index: {}]   ;;  %s8695_s7 = inlined_call_operand.hbm [shape: f32[3,64,128], index: 7, kind: input, shape index: {}]   ;;  %s8696_s8 = inlined_call_operand.vmem [shape: f32[1,128], index: 8, kind: input, shape index: {}]   ;;  %s8697_s9 = inlined_call_operand.vmem [shape: f32[1,128], index: 9, kind: input, shape index: {}]   ;;  %s8698_s10 = inlined_call_operand.hbm [shape: f32[3,64,128], index: 10, kind: input, shape index: {}]   ;;  %s8699_s11 = inlined_call_operand.vmem [shape: f32[1,128], index: 11, kind: input, shape index: {}]   ;;  %s8700_s12 = inlined_call_operand.vmem [shape: f32[1,128], index: 12, kind: input, shape index: {}]   ;;  %s8701_s13 = inlined_call_operand.hbm [shape: f32[64,32], index: 13, kind: input, shape index: {}]   ;;  %s8702_s14 = inlined_call_operand.vmem [shape: f32[1,32], index: 14, kind: input, shape index: {}]   ;;  %s8703_s15 = inlined_call_operand.hbm [shape: f32[32,16], index: 15, kind: input, shape index: {}]   ;;  %s8704_s16 = inlined_call_operand.vmem [shape: f32[1,16], index: 16, kind: input, shape index: {}]   ;;  %s8705_s17 = inlined_call_operand.hbm [shape: f32[2,16], index: 17, kind: output, shape index: {}]  }
   0x1   :  { %8765 = sst [smem:[#allocation82_spill]] %s8688_s0 }
   0x2   :  { %8766 = sst [smem:[#allocation83_spill]] %s8689_s1 }
   0x3   :  { %22 = vsyncpa [#allocation3], 0 }
   0x4   :  { %23 = vsyncpa [#allocation6], 0 }
   0x5   :  { %24 = vsyncpa [#allocation9], 0 }
   0x6   :  { %25 = vsyncpa [#allocation12], 0 }
   0x7   :  { %26 = vsyncpa [#allocation15], 0 }
   0x8   :  { %27 = vsyncpa [#allocation4], 0  ;;  %s6447_s24 = smov [#allocation5]   ;;  %s6448_s26 = smov [#allocation8]  }
   0x9   :  { %s45_s25 = sshll.u32 %s6447_s24, 4  ;;  %s68_s27 = sshll.u32 %s6448_s26, 4  ;;  %s46_s25 = int_to_ptr.vmem [resolvable:$true] %s45_s25  ;;  %s69_s27 = int_to_ptr.vmem [resolvable:$true] %s68_s27 }
   0xa   :  { %s6243_s28 = scalar_lea.vmem %s46_s25, 3072  ;;  %p6248_p1 = scmp.lt.s32.totalorder %s46_s25, %s46_s25 }
   0xb   :  { %p6244_p0 = scmp.ne.s32.totalorder %s46_s25, %s6243_s28  ;;  %p6249_p2 = scmp.lt.s32.totalorder %s6243_s28, %s6243_s28 }
   0xd   :  { %p6250_p3 = por %p6249_p2, %p6248_p1 }
   0xf   :  { %p6251_p4 = pnand %p6250_p3, %p6244_p0 }
  0x11   :  { %6254 = shalt.err (!%p6251_p4)
}
  0x12   :  { %s6449_s29 = smov 128   ;;  %s6450_s0 = smov 8  }
  0x13   :  { %s8767_s19 = sld [smem:[#allocation83_spill]]  ;;  %s6263_s1 = scalar_lea.vmem %s69_s27, 16 }
  0x14   :  { %p6264_p5 = scmp.ne.s32.totalorder %s69_s27, %s6263_s1  ;;  %s6267_s20 = scalar_lea.vmem %s69_s27, 32 }
  0x15   :  { %p6268_p6 = scmp.lt.s32.totalorder %s69_s27, %s69_s27  ;;  %p6269_p7 = scmp.lt.s32.totalorder %s6267_s20, %s6263_s1 }
  0x17   :  { %p6270_p8 = por %p6269_p7, %p6268_p6 }
  0x19   :  { %51 = dma.hbm_to_vmem [thread:$0]  %s8767_s19, 3072, %s46_s25, [#allocation6], %s6449_s29, %s6449_s29, %s6450_s0  }
  0x1a   :  { %p6271_p9 = pnand %p6270_p8, %p6264_p5 }
  0x1c   :  { %6274 = shalt.err (!%p6271_p9)
}
  0x1d   :  { %71 = dma.hbm_to_vmem [thread:$0]  %s8691_s3, 16, %s69_s27, [#allocation9]  }
  0x1e   :  { %s6451_s23 = smov [#allocation11]   ;;  %s6452_s26 = smov [#allocation14]  }
  0x1f   :  { %s93_s24 = sshll.u32 %s6451_s23, 4  ;;  %s125_s28 = sshll.u32 %s6452_s26, 4  ;;  %s94_s24 = int_to_ptr.vmem [resolvable:$true] %s93_s24  ;;  %s126_s28 = int_to_ptr.vmem [resolvable:$true] %s125_s28 }
  0x20   :  { %s6283_s30 = scalar_lea.vmem %s94_s24, 3072  ;;  %p6288_p11 = scmp.lt.s32.totalorder %s94_s24, %s94_s24 }
  0x21   :  { %p6284_p10 = scmp.ne.s32.totalorder %s94_s24, %s6283_s30  ;;  %p6289_p12 = scmp.lt.s32.totalorder %s6283_s30, %s6283_s30 }
  0x23   :  { %p6290_p13 = por %p6289_p12, %p6288_p11 }
  0x25   :  { %p6291_p0 = pnand %p6290_p13, %p6284_p10 }
  0x27   :  { %6294 = shalt.err (!%p6291_p0)
}
  0x28   :  { %99 = dma.hbm_to_vmem [thread:$0]  %s8695_s7, 3072, %s94_s24, [#allocation12], %s6449_s29, %s6449_s29, %s6450_s0  }
  0x29   :  { %s6303_s3 = scalar_lea.vmem %s126_s28, 1024  ;;  %p6308_p2 = scmp.lt.s32.totalorder %s126_s28, %s126_s28 }
  0x2a   :  { %p6304_p1 = scmp.ne.s32.totalorder %s126_s28, %s6303_s3  ;;  %p6309_p3 = scmp.lt.s32.totalorder %s6303_s3, %s6303_s3 }
  0x2c   :  { %p6310_p4 = por %p6309_p3, %p6308_p2 }
  0x2e   :  { %p6311_p5 = pnand %p6310_p4, %p6304_p1 }
  0x30   :  { %6314 = shalt.err (!%p6311_p5)
}
  0x31   :  { %131 = dma.hbm_to_vmem [thread:$0]  %s8701_s13, 1024, %s126_s28, [#allocation15], %s6449_s29, %s6449_s29, %s6450_s0  }
  0x32   :  { %s6453_s1 = smov [#allocation2]   ;;  %s6454_s21 = smov [#allocation7]  }
  0x33   :  { %s33_s20 = sshll.u32 %s6453_s1, 4  ;;  %s58_s22 = sshll.u32 %s6454_s21, 4  ;;  %s34_s20 = int_to_ptr.vmem [resolvable:$true] %s33_s20  ;;  %s59_s22 = int_to_ptr.vmem [resolvable:$true] %s58_s22 }
  0x34   :  { %s6323_s7 = scalar_lea.vmem %s34_s20, 2048  ;;  %p6328_p7 = scmp.lt.s32.totalorder %s34_s20, %s34_s20 }
  0x35   :  { %p6324_p6 = scmp.ne.s32.totalorder %s34_s20, %s6323_s7  ;;  %p6329_p8 = scmp.lt.s32.totalorder %s6323_s7, %s6323_s7 }
  0x37   :  { %p6330_p9 = por %p6329_p8, %p6328_p7 }
  0x39   :  { %p6331_p10 = pnand %p6330_p9, %p6324_p6 }
  0x3b   :  { %6334 = shalt.err (!%p6331_p10)
}
  0x3c   :  { %s8768_s26 = sld [smem:[#allocation82_spill]]  ;;  %s6343_s13 = scalar_lea.vmem %s59_s22, 16 }
  0x3d   :  { %p6344_p11 = scmp.ne.s32.totalorder %s59_s22, %s6343_s13  ;;  %s6347_s28 = scalar_lea.vmem %s59_s22, 32 }
  0x3e   :  { %p6348_p12 = scmp.lt.s32.totalorder %s59_s22, %s59_s22  ;;  %p6349_p13 = scmp.lt.s32.totalorder %s6347_s28, %s6343_s13 }
  0x40   :  { %p6350_p0 = por %p6349_p13, %p6348_p12 }
  0x42   :  { %39 = dma.hbm_to_vmem [thread:$0]  %s8768_s26, 2048, %s34_s20, [#allocation3], %s6449_s29, %s6449_s29, %s6450_s0  }
  0x43   :  { %p6351_p1 = pnand %p6350_p0, %p6344_p11 }
  0x45   :  { %6354 = shalt.err (!%p6351_p1)
}
  0x46   :  { %61 = dma.hbm_to_vmem [thread:$0]  %s8690_s2, 16, %s59_s22, [#allocation6]  }
  0x47   :  { %s6455_s18 = smov [#allocation10]   ;;  %s6456_s27 = smov [#allocation13]  }
  0x48   :  { %s77_s3 = sshll.u32 %s6455_s18, 4  ;;  %s109_s19 = sshll.u32 %s6456_s27, 4  ;;  %s78_s3 = int_to_ptr.vmem [resolvable:$true] %s77_s3  ;;  %s110_s19 = int_to_ptr.vmem [resolvable:$true] %s109_s19 }
  0x49   :  { %s6363_s1 = scalar_lea.vmem %s78_s3, 3072  ;;  %p6368_p3 = scmp.lt.s32.totalorder %s78_s3, %s78_s3 }
  0x4a   :  { %p6364_p2 = scmp.ne.s32.totalorder %s78_s3, %s6363_s1  ;;  %p6369_p4 = scmp.lt.s32.totalorder %s6363_s1, %s6363_s1 }
  0x4c   :  { %p6370_p5 = por %p6369_p4, %p6368_p3 }
  0x4e   :  { %p6371_p6 = pnand %p6370_p5, %p6364_p2 }
  0x50   :  { %6374 = shalt.err (!%p6371_p6)
}
  0x51   :  { %83 = dma.hbm_to_vmem [thread:$0]  %s8692_s4, 3072, %s78_s3, [#allocation9], %s6449_s29, %s6449_s29, %s6450_s0  }
  0x52   :  { %s6383_s2 = scalar_lea.vmem %s110_s19, 3072  ;;  %p6388_p8 = scmp.lt.s32.totalorder %s110_s19, %s110_s19 }
  0x53   :  { %p6384_p7 = scmp.ne.s32.totalorder %s110_s19, %s6383_s2  ;;  %p6389_p9 = scmp.lt.s32.totalorder %s6383_s2, %s6383_s2 }
  0x55   :  { %p6390_p10 = por %p6389_p9, %p6388_p8 }
  0x57   :  { %p6391_p11 = pnand %p6390_p10, %p6384_p7 }
  0x59   :  { %6394 = shalt.err (!%p6391_p11)
}
  0x5a   :  { %115 = dma.hbm_to_vmem [thread:$0]  %s8698_s10, 3072, %s110_s19, [#allocation12], %s6449_s29, %s6449_s29, %s6450_s0  }
  0x5b   :  { %s6457_s23 = smov [#allocation16]  }
  0x5c   :  { %s139_s24 = sshll.u32 %s6457_s23, 4  ;;  %s140_s24 = int_to_ptr.vmem [resolvable:$true] %s139_s24 }
  0x5d   :  { %s6403_s26 = scalar_lea.vmem %s140_s24, 512  ;;  %p6408_p13 = scmp.lt.s32.totalorder %s140_s24, %s140_s24 }
  0x5e   :  { %p6404_p12 = scmp.ne.s32.totalorder %s140_s24, %s6403_s26  ;;  %p6409_p0 = scmp.lt.s32.totalorder %s6403_s26, %s6403_s26 }
  0x60   :  { %p6410_p1 = por %p6409_p0, %p6408_p13 }
  0x62   :  { %p6411_p2 = pnand %p6410_p1, %p6404_p12 }
  0x64   :  { %6414 = shalt.err (!%p6411_p2)
}
  0x65   :  { %145 = dma.hbm_to_vmem [thread:$0]  %s8703_s15, 512, %s140_s24, [#allocation15], %s6449_s29, %s6449_s29, %s6450_s0  }
  0x66   :  { %6435 = dma.done.wait [#allocation3], 2048  }
  0x67   :  { %6436 = vsyncadd [#allocation3], 4294965248 }
  0x68   :  { %6437 = dma.done.wait [#allocation6], 3088  }
  0x69   :  { %6438 = vsyncadd [#allocation6], 4294964208 }
  0x6a   :  { %6439 = dma.done.wait [#allocation9], 3088  }
  0x6b   :  { %6440 = vsyncadd [#allocation9], 4294964208 }
  0x6c   :  { %6441 = dma.done.wait [#allocation12], 6144  }
  0x6d   :  { %6442 = vsyncadd [#allocation12], 4294961152 }
  0x6e   :  { %6443 = dma.done.wait [#allocation15], 1536  }
  0x6f   :  { %6444 = vsyncadd [#allocation15], 4294965760  ;;  %v186_v0 = vld [vmem:[#allocation2 + $0x58] sm:$0xff]  ;;  %v185_v1 = vld [vmem:[#allocation2 + $0x50] sm:$0xff]  ;;  %s6458_s10 = smov 16   ;;  %v254_v4 = vlaneseq  ;;  %s6459_s15 = smov 32  }
  0x70   :  { %201 = vrot.lane.b32.xlu0 %v186_v0, %s6458_s10  ;;  %199 = vrot.lane.b32.xlu1 %v185_v1, %s6458_s10  ;;  %v188_v2 = vld [vmem:[#allocation2 + $0x68] sm:$0xff]  ;;  %v190_v3 = vld [vmem:[#allocation2 + $0x78] sm:$0xff]  ;;  %s6460_s29 = smov 48   ;;  %v461_v7 = vld [vmem:[#allocation5 + $0x30] sm:$0xff]  ;;  %vm244_vm3 = vcmask 261120   ;;  %v8706_v16 = vmov 0.0  }
  0x71   :  { %v462_v5 = vld [vmem:[#allocation5 + $0x38] sm:$0xff]  ;;  %v6614_v6 = vshrl.u32 %v254_v4, 7  ;;  %v187_v8 = vld [vmem:[#allocation2 + $0x60] sm:$0xff]  ;;  %v6618_v10 = vand.u32 127, %v254_v4  ;;  %v460_v13 = vld [vmem:[#allocation5 + $0x28] sm:$0xff]  ;;  %vm239_vm4 = vcmask 130048  }
  0x72   :  { %v178_v9 = vld [vmem:[#allocation2 + $0x18] sm:$0xff]  ;;  %5885 = vmatprep.subr.mxu1 %v462_v5  ;;  %v189_v14 = vld [vmem:[#allocation2 + $0x70] sm:$0xff]  ;;  %v180_v15 = vld [vmem:[#allocation2 + $0x28] sm:$0xff]  ;;  %vm249_vm5 = vcmask 392192   ;;  %vm463_vm11 = vcmask 523264   ;;  %s6462_s28 = smov 64  }
  0x73   :  { %8769 = vst [vmem:[#allocation24_spill] sm:$0xff] %v6614_v6  ;;  %8770 = vst [vmem:[#allocation25_spill] sm:$0xff] %v6618_v10  ;;  %v265_v11 = vand.u32 15, %v6614_v6  ;;  %v6622_v12 = vadd.s32 4294967295, %v6614_v6  ;;  %5886 = vmatpush3.msra.mxu1 %v462_v5  ;;  %v459_v18 = vld [vmem:[#allocation5 + $0x20] sm:$0xff]  ;;  %v458_v19 = vld [vmem:[#allocation5 + $0x18] sm:$0xff] }
  0x74   :  { %217 = vrot.lane.b32.xlu0 %v188_v2, %s6459_s15  ;;  %233 = vrot.lane.b32.xlu1 %v190_v3, %s6460_s29  ;;  %v182_v20 = vld [vmem:[#allocation2 + $0x38] sm:$0xff]  ;;  %v177_v21 = vld [vmem:[#allocation2 + $0x10] sm:$0xff]  ;;  %v179_v23 = vld [vmem:[#allocation2 + $0x20] sm:$0xff]  ;;  %v6648_v38 = vadd.s32 16, %v6614_v6  ;;  %v6652_v40 = vadd.s32 8, %v6614_v6  ;;  %v6667_v50 = vadd.s32 24, %v6614_v6 }
  0x75   :  { %8771 = vst [vmem:[#allocation26_spill] sm:$0xff] %v6622_v12  ;;  %5887 = vmatprep.subr.mxu1 %v461_v7  ;;  %vm8763_vm0 = vcmp.eq.s32.totalorder %v6618_v10, %v6622_v12  ;;  %vm317_vm1 = vcmp.ne.s32.totalorder %v265_v11, 0  ;;  %v457_v22 = vld [vmem:[#allocation5 + $0x10] sm:$0xff]  ;;  %v456_v25 = vld [vmem:[#allocation5 + $0x8] sm:$0xff]  ;;  %v455_v26 = vld [vmem:[#allocation5] sm:$0xff]  ;;  %s6464_s30 = smov 112  }
  0x76   :  { %vm321_vm2 = vmand %vm8763_vm0, %vm317_vm1  ;;  %5888 = vmatpush3.msra.mxu1 %v461_v7  ;;  %v181_v24 = vld [vmem:[#allocation2 + $0x30] sm:$0xff]  ;;  %v184_v29 = vld [vmem:[#allocation2 + $0x48] sm:$0xff]  ;;  %8772 = vst [vmem:[#allocation27_spill] sm:$0xff] %v6652_v40  ;;  %v279_v46 = vand.u32 15, %v6648_v38  ;;  %v5602_v47 = vadd.s32 4294967295, %v6648_v38  ;;  %v6664_v49 = vadd.s32 4294967295, %v6652_v40 }
  0x77   :  { %v325_v17 = vsel %vm321_vm2, 1.0, %v8706_v16  ;;  %5889 = vmatprep.subr.mxu1 %v460_v13  ;;  %v183_v35 = vld [vmem:[#allocation2 + $0x40] sm:$0xff]  ;;  %v176_v42 = vld [vmem:[#allocation2 + $0x8] sm:$0xff]  ;;  %v5603_v56 = vadd.s32 4294967295, %v6667_v50  ;;  %v357_v63 = vld [vmem:[#allocation5 + $0x78] sm:$0xff]  ;;  %s6465_s25 = smov 96  }
  0x78   :  { %215 = vrot.lane.b32.xlu0 %v187_v8, %s6459_s15  ;;  %197 = vrot.lane.b32.xlu1 %v178_v9, %s6458_s10  ;;  %8773 = vst [vmem:[#allocation28_spill] sm:$0xff] %v6664_v49  ;;  %v175_v55 = vld [vmem:[#allocation2] sm:$0xff]  ;;  %vm315_vm6 = vcmp.eq.s32.totalorder %v6618_v10, %v5602_v47  ;;  %vm319_vm7 = vcmp.ne.s32.totalorder %v279_v46, 0  ;;  %vm314_vm8 = vcmp.eq.s32.totalorder %v6618_v10, %v6664_v49  ;;  %v356_v1 = vld [vmem:[#allocation5 + $0x70] sm:$0xff]  ;;  %v355_v3 = vld [vmem:[#allocation5 + $0x68] sm:$0xff]  ;;  %s6466_s18 = smov 80  }
  0x79   :  { %5879 = vmatprep.mubr.msk.f32.mxu0 %vm244_vm3, %v325_v17  ;;  %5890 = vmatpush3.msra.mxu1 %v460_v13  ;;  %vm323_vm9 = vmand %vm315_vm6, %vm319_vm7  ;;  %v326_v62 = vsel %vm314_vm8, 1.0, %v8706_v16  ;;  %vm316_vm10 = vcmp.eq.s32.totalorder %v6618_v10, %v5603_v56  ;;  %v354_v4 = vld [vmem:[#allocation5 + $0x60] sm:$0xff]  ;;  %v353_v5 = vld [vmem:[#allocation5 + $0x58] sm:$0xff]  ;;  %v272_v17 = vand.u32 15, %v6652_v40  ;;  %s6468_s3 = smov 120   ;;  %s6469_s27 = smov 24  }
  0x7a   :  { %5891 = vmatprep.subr.mxu1 %v459_v18  ;;  %v327_v0 = vsel %vm323_vm9, 1.0, %v8706_v16  ;;  %v328_v2 = vsel %vm316_vm10, 1.0, %v8706_v16  ;;  %v352_v7 = vld [vmem:[#allocation5 + $0x50] sm:$0xff]  ;;  %v351_v8 = vld [vmem:[#allocation5 + $0x48] sm:$0xff]  ;;  %v350_v9 = vld [vmem:[#allocation5 + $0x40] sm:$0xff]  ;;  %vm1351_vm9 = vcmask 1041409  }
  0x7b   :  { %5892 = vmatpush3.msra.mxu1 %v459_v18  ;;  %v763_v11 = vld [vmem:[#allocation5 + $0xb8] sm:$0xff]  ;;  %v762_v13 = vld [vmem:[#allocation5 + $0xb0] sm:$0xff]  ;;  %vm338_vm14 = vcmp.ne.s32.totalorder %v272_v17, 15  ;;  %vm1353_vm10 = vcmask 1043459   ;;  %s6471_s19 = smov 56   ;;  %s6473_s13 = smov [#allocation17]  }
  0x7c   :  { %231 = vrot.lane.b32.xlu0 %v189_v14, %s6460_s29  ;;  %213 = vrot.lane.b32.xlu1 %v180_v15, %s6459_s15  ;;  %v6705_v14 = vadd.s32 1, %v6614_v6  ;;  %v6708_v15 = vadd.s32 1, %v6652_v40 }
  0x7d   :  { %5893 = vmatprep.subr.mxu1 %v458_v19 }
  0x7e   :  { %5894 = vmatpush3.msra.mxu1 %v458_v19  ;;  %8774 = vst [vmem:[#allocation29_spill] sm:$0xff] %v6705_v14  ;;  %8775 = vst [vmem:[#allocation30_spill] sm:$0xff] %v6708_v15  ;;  %vm333_vm12 = vcmp.eq.s32.totalorder %v6618_v10, %v6705_v14  ;;  %vm334_vm13 = vcmp.eq.s32.totalorder %v6618_v10, %v6708_v15 }
  0x7f   :  { %5895 = vmatprep.subr.mxu1 %v457_v22  ;;  %vm342_vm15 = vmand %vm334_vm13, %vm338_vm14  ;;  %vm1355_vm14 = vcmask 1045509  }
  0x80   :  { %229 = vrot.lane.b32.xlu1 %v182_v20, %s6460_s29  ;;  %195 = vrot.lane.b32.xlu0 %v177_v21, %s6458_s10  ;;  %v331_v20 = vadd.s32 1, %v6648_v38  ;;  %v286_v21 = vand.u32 15, %v6667_v50 }
  0x81   :  { %5896 = vmatpush3.msra.mxu1 %v457_v22  ;;  %v332_v22 = vadd.s32 1, %v6667_v50 }
  0x82   :  { %5897 = vmatprep.subr.mxu1 %v456_v25  ;;  %vm335_vm1 = vcmp.eq.s32.totalorder %v6618_v10, %v331_v20  ;;  %vm340_vm6 = vcmp.ne.s32.totalorder %v286_v21, 15 }
  0x83   :  { %5898 = vmatpush3.msra.mxu1 %v456_v25  ;;  %v345_v25 = vsel %vm333_vm12, 1.0, %v8706_v16  ;;  %vm336_vm2 = vcmp.eq.s32.totalorder %v6618_v10, %v332_v22 }
  0x84   :  { %211 = vrot.lane.b32.xlu0 %v179_v23, %s6459_s15  ;;  %227 = vrot.lane.b32.xlu1 %v181_v24, %s6460_s29  ;;  %vm344_vm7 = vmand %vm336_vm2, %vm340_vm6  ;;  %vm3140_vm6 = vcmask 64512  }
  0x85   :  { %5899 = vmatprep.subr.mxu1 %v455_v26 }
  0x86   :  { %5900 = vmatpush3.msra.mxu1 %v455_v26  ;;  %v346_v26 = vsel %vm342_vm15, 1.0, %v8706_v16  ;;  %vm8764_vm15 = vcmask 1047559  }
  0xe2   :  { %v202_v27 = vpop.permute.xlu0 %201  ;;  %v200_v28 = vpop.permute.xlu1 %199 }
  0xe3   :  { %v243_v30 = vsel %vm239_vm4, %v184_v29, %v202_v27  ;;  %v242_v39 = vsel %vm239_vm4, %v183_v35, %v200_v28  ;;  %v347_v27 = vsel %vm335_vm1, 1.0, %v8706_v16  ;;  %v348_v28 = vsel %vm344_vm7, 1.0, %v8706_v16  ;;  %v761_v29 = vld [vmem:[#allocation5 + $0xa8] sm:$0xff] }
  0xe4   :  { %vm3145_vm7 = vcmask 195584  }
  0xe6   :  { %v218_v31 = vpop.permute.xlu0 %217  ;;  %v234_v32 = vpop.permute.xlu1 %233 }
  0xe7   :  { %v248_v33 = vsel %vm244_vm3, %v243_v30, %v218_v31  ;;  %v760_v30 = vld [vmem:[#allocation5 + $0xa0] sm:$0xff]  ;;  %v759_v31 = vld [vmem:[#allocation5 + $0x98] sm:$0xff] }
  0xe8   :  { %v6642_v34 = vsel %vm249_vm5, %v248_v33, %v234_v32  ;;  %v758_v32 = vld [vmem:[#allocation5 + $0x90] sm:$0xff]  ;;  %v757_v33 = vld [vmem:[#allocation5 + $0x88] sm:$0xff] }
  0xe9   :  { %5871 = vmatprep.subr.mxu0 %v6642_v34  ;;  %5929 = vmatprep.subr.mxu1 %v6642_v34 }
  0xea   :  { %v216_v36 = vpop.permute.xlu0 %215  ;;  %5872 = vmatpush3.msra.mxu0 %v6642_v34  ;;  %v198_v37 = vpop.permute.xlu1 %197 }
  0xeb   :  { %v247_v41 = vsel %vm244_vm3, %v242_v39, %v216_v36  ;;  %v241_v48 = vsel %vm239_vm4, %v176_v42, %v198_v37 }
  0xee   :  { %v232_v43 = vpop.permute.xlu0 %231  ;;  %v214_v44 = vpop.permute.xlu1 %213 }
  0xef   :  { %v6656_v45 = vsel %vm249_vm5, %v247_v41, %v232_v43  ;;  %v246_v51 = vsel %vm244_vm3, %v241_v48, %v214_v44 }
  0xf0   :  { %5873 = vmatprep.subr.mxu0 %v6656_v45 }
  0xf1   :  { %5874 = vmatpush3.msra.mxu0 %v6656_v45 }
  0xf2   :  { %v230_v52 = vpop.permute.xlu1 %229  ;;  %v196_v53 = vpop.permute.xlu0 %195 }
  0xf3   :  { %v6671_v54 = vsel %vm249_vm5, %v246_v51, %v230_v52  ;;  %v240_v57 = vsel %vm239_vm4, %v175_v55, %v196_v53 }
  0xf4   :  { %5875 = vmatprep.subr.mxu0 %v6671_v54 }
  0xf5   :  { %5876 = vmatpush3.msra.mxu0 %v6671_v54 }
  0xf6   :  { %v212_v58 = vpop.permute.xlu0 %211  ;;  %v228_v59 = vpop.permute.xlu1 %227 }
  0xf7   :  { %v245_v60 = vsel %vm244_vm3, %v240_v57, %v212_v58 }
  0xf8   :  { %v6682_v61 = vsel %vm249_vm5, %v245_v60, %v228_v59 }
  0xf9   :  { %5877 = vmatprep.subr.mxu0 %v6682_v61 }
  0xfa   :  { %5878 = vmatpush3.msra.mxu0 %v6682_v61 }
  0xfb   :  { %5880 = vmatmul.mubr.msk.f32.vlgmr.msra.gmra.mxu0 %vm244_vm3, %v326_v62  ;;  %5907 = vmatprep.subr.mxu0 %v357_v63 }
  0xfc   :  { %5908 = vmatpush3.msra.mxu0 %v357_v63  ;;  %5882 = vmatprep.mubr.msk.f32.mxu0 %vm244_vm3, %v327_v0 }
  0xfd   :  { %5909 = vmatprep.subr.mxu0 %v356_v1 }
  0xfe   :  { %5910 = vmatpush3.msra.mxu0 %v356_v1 }
  0xff   :  { %5883 = vmatmul.mubr.msk.f32.gmra.mxu0 %vm244_vm3, %v328_v2  ;;  %5911 = vmatprep.subr.mxu0 %v355_v3 }
 0x100   :  { %5912 = vmatpush3.msra.mxu0 %v355_v3  ;;  %5923 = vmatprep.mubr.msk.f32.mxu0 %vm463_vm11, %v6682_v61 }
 0x101   :  { %5913 = vmatprep.subr.mxu0 %v354_v4 }
 0x102   :  { %5914 = vmatpush3.msra.mxu0 %v354_v4 }
 0x103   :  { %5915 = vmatprep.subr.mxu0 %v353_v5 }
 0x104   :  { %5916 = vmatpush3.msra.mxu0 %v353_v5 }
 0x105   :  { %5917 = vmatprep.subr.mxu0 %v352_v7 }
 0x106   :  { %5918 = vmatpush3.msra.mxu0 %v352_v7 }
 0x107   :  { %5919 = vmatprep.subr.mxu0 %v351_v8 }
 0x108   :  { %5920 = vmatpush3.msra.mxu0 %v351_v8 }
 0x109   :  { %5921 = vmatprep.subr.mxu0 %v350_v9 }
 0x10a   :  { %5922 = vmatpush3.msra.mxu0 %v350_v9 }
 0x10b   :  { %5924 = vmatmul.mubr.msk.f32.vlgmr.msra.gmra.mxu0 %vm463_vm11, %v6671_v54  ;;  %5943 = vmatprep.subr.mxu0 %v763_v11 }
 0x10c   :  { %5926 = vmatprep.mubr.msk.f32.mxu0 %vm463_vm11, %v6656_v45  ;;  %5944 = vmatpush3.msra.mxu0 %v763_v11 }
 0x10d   :  { %5945 = vmatprep.subr.mxu0 %v762_v13 }
 0x10e   :  { %5946 = vmatpush3.msra.mxu0 %v762_v13 }
 0x10f   :  { %5927 = vmatmul.mubr.msk.f32.gmra.mxu0 %vm463_vm11, %v6642_v34  ;;  %5947 = vmatprep.subr.mxu0 %v761_v29 }
 0x110   :  { %5948 = vmatpush3.msra.mxu0 %v761_v29 }
 0x111   :  { %5949 = vmatprep.subr.mxu0 %v760_v30 }
 0x112   :  { %5950 = vmatpush3.msra.mxu0 %v760_v30 }
 0x113   :  { %5951 = vmatprep.subr.mxu0 %v759_v31 }
 0x114   :  { %5952 = vmatpush3.msra.mxu0 %v759_v31 }
 0x115   :  { %5953 = vmatprep.subr.mxu0 %v758_v32 }
 0x116   :  { %5954 = vmatpush3.msra.mxu0 %v758_v32 }
 0x117   :  { %5955 = vmatprep.subr.mxu0 %v757_v33 }
 0x118   :  { %5956 = vmatpush3.msra.mxu0 %v757_v33 }
 0x1bb   :  { %v5881_v18 = vpop.f32.mrf.mxu0 }
 0x1bd   :  { %v436_v19 = vpop.f32.mrf.mxu0 }
 0x1be   :  { %5901 = vmatprep.mubr.msk.f32.mxu1 %vm463_vm11, %v436_v19  ;;  %v6754_v19 = vsub.s32 0, %v6614_v6 }
 0x1bf   :  { %v5884_v23 = vpop.f32.mrf.mxu0  ;;  %5902 = vmatmul.mubr.msk.f32.vlgmr.msra.gmra.mxu1 %vm463_vm11, %v5881_v18 }
 0x1c0   :  { %5930 = vmatpush3.msra.mxu1 %v6642_v34  ;;  %v756_v34 = vld [vmem:[#allocation5 + $0x80] sm:$0xff]  ;;  %8776 = vst [vmem:[#allocation31_spill] sm:$0xff] %v6754_v19 }
 0x1c1   :  { %5931 = vmatprep.subr.mxu1 %v6656_v45  ;;  %v446_v24 = vpop.f32.mrf.mxu0  ;;  %5957 = vmatprep.subr.mxu0 %v756_v34 }
 0x1c2   :  { %5932 = vmatpush3.msra.mxu1 %v6656_v45  ;;  %5904 = vmatprep.mubr.msk.f32.mxu1 %vm463_vm11, %v446_v24 }
 0x1c3   :  { %5933 = vmatprep.subr.mxu1 %v6671_v54  ;;  %5905 = vmatmul.mubr.msk.f32.gmra.mxu1 %vm463_vm11, %v5884_v23 }
 0x1c4   :  { %5934 = vmatpush3.msra.mxu1 %v6671_v54  ;;  %5937 = vmatprep.mubr.msk.f32.mxu1 %vm244_vm3, %v345_v25 }
 0x1c5   :  { %5935 = vmatprep.subr.mxu1 %v6682_v61  ;;  %5958 = vmatpush3.msra.mxu0 %v756_v34 }
 0x1c6   :  { %5936 = vmatpush3.msra.mxu1 %v6682_v61 }
 0x1c7   :  { %5938 = vmatmul.mubr.msk.f32.vlgmr.msra.gmra.mxu1 %vm244_vm3, %v346_v26 }
 0x1c8   :  { %5940 = vmatprep.mubr.msk.f32.mxu1 %vm244_vm3, %v347_v27 }
 0x1cb   :  { %5941 = vmatmul.mubr.msk.f32.gmra.mxu1 %vm244_vm3, %v348_v28  ;;  %v5925_v44 = vpop.f32.mrf.mxu0 }
 0x1cd   :  { %v639_v45 = vpop.f32.mrf.mxu0 }
 0x1cf   :  { %v5928_v46 = vpop.f32.mrf.mxu0 }
 0x1d1   :  { %v649_v47 = vpop.f32.mrf.mxu0 }
 0x27f   :  { %v5903_v35 = vpop.f32.mrf.mxu1 }
 0x280   :  { %v645_v52 = vadd.f32 %v5925_v44, %v5903_v35 }
 0x281   :  { %v542_v36 = vpop.f32.mrf.mxu1 }
 0x282   :  { %v640_v50 = vadd.f32 %v639_v45, %v542_v36 }
 0x283   :  { %v5906_v37 = vpop.f32.mrf.mxu1 }
 0x284   :  { %v655_v58 = vadd.f32 %v5928_v46, %v5906_v37 }
 0x285   :  { %v552_v38 = vpop.f32.mrf.mxu1 }
 0x286   :  { %v650_v55 = vadd.f32 %v649_v47, %v552_v38 }
 0x287   :  { %v5939_v39 = vpop.f32.mrf.mxu1 }
 0x289   :  { %v736_v41 = vpop.f32.mrf.mxu1 }
 0x28a   :  { %5959 = vmatprep.mubr.msk.f32.mxu0 %vm463_vm11, %v736_v41 }
 0x28b   :  { %v5942_v42 = vpop.f32.mrf.mxu1  ;;  %5960 = vmatmul.mubr.msk.f32.vlgmr.msra.gmra.mxu0 %vm463_vm11, %v5939_v39 }
 0x28d   :  { %v746_v43 = vpop.f32.mrf.mxu1 }
 0x28e   :  { %5962 = vmatprep.mubr.msk.f32.mxu0 %vm463_vm11, %v746_v43 }
 0x28f   :  { %5963 = vmatmul.mubr.msk.f32.gmra.mxu0 %vm463_vm11, %v5942_v42 }
 0x34b   :  { %v5961_v48 = vpop.f32.mrf.mxu0 }
 0x34c   :  { %v862_v56 = vadd.f32 %v5961_v48, %v645_v52  ;;  %v921_v52 = vld [vmem:[#allocation7] sm:$0x1] }
 0x34d   :  { %v842_v51 = vpop.f32.mrf.mxu0 }
 0x34e   :  { %v861_v53 = vadd.f32 %v842_v51, %v640_v50 }
 0x34f   :  { %v5964_v54 = vpop.f32.mrf.mxu0 }
 0x350   :  { %v865_v59 = vadd.f32 %v862_v56, %v861_v53  ;;  %v864_v61 = vadd.f32 %v5964_v54, %v655_v58  ;;  %v5624_v58 = vld [vmem:[#allocation8] ss:$0 sm:$0xff] }
 0x351   :  { %v852_v57 = vpop.f32.mrf.mxu0 }
 0x352   :  { %v863_v60 = vadd.f32 %v852_v57, %v650_v55  ;;  %v6463_v55 = vmov 1983009808  }
 0x354   :  { %v866_v62 = vadd.f32 %v865_v59, %v863_v60 }
 0x356   :  { %v867_v63 = vadd.f32 %v866_v62, %v864_v61 }
 0x358   :  { %v868_v0 = vrot.slane %v867_v63, 4 }
 0x35a   :  { %v869_v1 = vadd.f32 %v868_v0, %v867_v63 }
 0x35c   :  { %v870_v2 = vrot.slane %v869_v1, 2 }
 0x35e   :  { %v871_v3 = vadd.f32 %v870_v2, %v869_v1 }
 0x360   :  { %v872_v4 = vrot.slane %v871_v3, 1 }
 0x362   :  { %v873_v5 = vadd.f32 %v872_v4, %v871_v3 }
 0x364   :  { %874 = vrot.lane.b32.xlu0 %v873_v5, %s6450_s0 }
 0x3d6   :  { %v875_v7 = vpop.permute.xlu0 %874 }
 0x3d7   :  { %v876_v8 = vadd.f32 %v875_v7, %v873_v5 }
 0x3d9   :  { %877 = vrot.lane.b32.xlu1 %v876_v8, %s6458_s10 }
 0x44b   :  { %v878_v9 = vpop.permute.xlu1 %877 }
 0x44c   :  { %v879_v11 = vadd.f32 %v878_v9, %v876_v8 }
 0x44e   :  { %880 = vrot.lane.b32.xlu0 %v879_v11, %s6459_s15 }
 0x4c0   :  { %v881_v13 = vpop.permute.xlu0 %880 }
 0x4c1   :  { %v882_v17 = vadd.f32 %v881_v13, %v879_v11 }
 0x4c3   :  { %883 = vrot.lane.b32.xlu1 %v882_v17, %s6462_s28 }
 0x535   :  { %v884_v18 = vpop.permute.xlu1 %883 }
 0x536   :  { %v885_v20 = vadd.f32 %v884_v18, %v882_v17 }
 0x538   :  { %v886_v21 = vmul.f32 0.001953125, %v885_v20 }
 0x53a   :  { %v890_v22 = vrot.slane %v886_v21, %v6754_v19 }
 0x53c   :  { %v891_v23 = vsub.f32 %v861_v53, %v890_v22  ;;  %v892_v24 = vsub.f32 %v862_v56, %v890_v22  ;;  %v893_v25 = vsub.f32 %v863_v60, %v890_v22  ;;  %v894_v26 = vsub.f32 %v864_v61, %v890_v22 }
 0x53d   :  { %v960_v56 = vunpack.c.l.s4 %v6463_v55 }
 0x53e   :  { %v895_v27 = vmul.f32 %v891_v23, %v891_v23  ;;  %v896_v28 = vmul.f32 %v892_v24, %v892_v24  ;;  %v897_v29 = vmul.f32 %v893_v25, %v893_v25  ;;  %v898_v31 = vmul.f32 %v894_v26, %v894_v26 }
 0x53f   :  { %v961_v61 = vunpack.c.0.s8 %v960_v56 }
 0x540   :  { %v899_v30 = vadd.f32 %v896_v28, %v895_v27 }
 0x541   :  { %v6763_v1 = vsub.s32 %v961_v61, %v6614_v6 }
 0x542   :  { %v900_v32 = vadd.f32 %v899_v30, %v897_v29 }
 0x543   :  { %8777 = vst [vmem:[#allocation32_spill] sm:$0xff] %v6763_v1 }
 0x544   :  { %v901_v33 = vadd.f32 %v900_v32, %v898_v31 }
 0x546   :  { %v902_v34 = vrot.slane %v901_v33, 4 }
 0x548   :  { %v903_v35 = vadd.f32 %v902_v34, %v901_v33 }
 0x54a   :  { %v904_v36 = vrot.slane %v903_v35, 2 }
 0x54c   :  { %v905_v37 = vadd.f32 %v904_v36, %v903_v35 }
 0x54e   :  { %v906_v38 = vrot.slane %v905_v37, 1 }
 0x550   :  { %v907_v39 = vadd.f32 %v906_v38, %v905_v37 }
 0x552   :  { %908 = vrot.lane.b32.xlu0 %v907_v39, %s6450_s0 }
 0x5c4   :  { %v909_v41 = vpop.permute.xlu0 %908 }
 0x5c5   :  { %v910_v42 = vadd.f32 %v909_v41, %v907_v39 }
 0x5c7   :  { %911 = vrot.lane.b32.xlu1 %v910_v42, %s6458_s10 }
 0x639   :  { %v912_v43 = vpop.permute.xlu1 %911 }
 0x63a   :  { %v913_v44 = vadd.f32 %v912_v43, %v910_v42 }
 0x63c   :  { %914 = vrot.lane.b32.xlu0 %v913_v44, %s6459_s15 }
 0x6ae   :  { %v915_v45 = vpop.permute.xlu0 %914 }
 0x6af   :  { %v916_v46 = vadd.f32 %v915_v45, %v913_v44 }
 0x6b1   :  { %917 = vrot.lane.b32.xlu1 %v916_v46, %s6462_s28 }
 0x723   :  { %v918_v47 = vpop.permute.xlu1 %917 }
 0x724   :  { %v919_v48 = vadd.f32 %v918_v47, %v916_v46 }
 0x726   :  { %v920_v50 = vmul.f32 0.001953125, %v919_v48 }
 0x728   :  { %v922_v51 = vadd.f32 1e-05, %v920_v50 }
 0x72a   :  { %6227 = vrsqrt.f32 %v922_v51 }
 0x737   :  { %v6228_v53 = vpop.eup %6227 }
 0x738   :  { %v924_v54 = vmul.f32 %v6228_v53, %v921_v52 }
 0x73a   :  { %v929_v57 = vrot.slane %v924_v54, %v6754_v19 }
 0x73c   :  { %v933_v59 = vmul.f32 %v929_v57, %v893_v25  ;;  %v934_v60 = vmul.f32 %v929_v57, %v894_v26  ;;  %v931_v11 = vmul.f32 %v929_v57, %v891_v23  ;;  %v932_v25 = vmul.f32 %v929_v57, %v892_v24 }
 0x73e   :  { %v944_v62 = vadd.f32 %v5624_v58, %v933_v59  ;;  %v945_v63 = vadd.f32 %v5624_v58, %v934_v60  ;;  %v942_v26 = vadd.f32 %v5624_v58, %v931_v11  ;;  %v943_v29 = vadd.f32 %v5624_v58, %v932_v25 }
 0x740   :  { %v948_v0 = vmul.f32 0.01, %v944_v62  ;;  %v949_v2 = vmul.f32 0.01, %v945_v63  ;;  %v946_v30 = vmul.f32 0.01, %v942_v26 }
 0x741   :  { %v947_v31 = vmul.f32 0.01, %v943_v29 }
 0x742   :  { %v952_v3 = vmax.f32 %v944_v62, %v948_v0  ;;  %v953_v4 = vmax.f32 %v945_v63, %v949_v2  ;;  %v950_v32 = vmax.f32 %v942_v26, %v946_v30 }
 0x743   :  { %v951_v33 = vmax.f32 %v943_v29, %v947_v31 }
 0x744   :  { %v992_v5 = vcombine.high %v952_v3, %v952_v3  ;;  %v6766_v7 = vrot.slane %v952_v3, %v6763_v1  ;;  %v1009_v8 = vcombine.high %v953_v4, %v953_v4  ;;  %v6769_v9 = vrot.slane %v953_v4, %v6763_v1 }
 0x745   :  { %v958_v34 = vcombine.high %v950_v32, %v950_v32  ;;  %v6808_v35 = vrot.slane %v950_v32, %v6763_v1  ;;  %v975_v37 = vcombine.high %v951_v33, %v951_v33  ;;  %v6818_v38 = vrot.slane %v951_v33, %v6763_v1 }
 0x746   :  { %v6772_v13 = vrot.slane %v992_v5, %v6763_v1  ;;  %v6775_v17 = vrot.slane %v1009_v8, %v6763_v1  ;;  %v5633_v18 = vrot.slane %v6766_v7, 9  ;;  %v5637_v22 = vrot.slane %v6769_v9, 9 }
 0x747   :  { %v6813_v36 = vrot.slane %v958_v34, %v6763_v1  ;;  %v5625_v39 = vrot.slane %v6808_v35, 9  ;;  %v6824_v41 = vrot.slane %v975_v37, %v6763_v1  ;;  %v5629_v44 = vrot.slane %v6818_v38, 9 }
 0x748   :  { %v6779_v20 = vmax.f32 %v6766_v7, %v5633_v18  ;;  %v5635_v21 = vrot.slane %v6772_v13, 9  ;;  %v5639_v27 = vrot.slane %v6775_v17, 9  ;;  %v6792_v28 = vmax.f32 %v6769_v9, %v5637_v22 }
 0x749   :  { %v5627_v42 = vrot.slane %v6813_v36, 9  ;;  %v6832_v43 = vmax.f32 %v6808_v35, %v5625_v39  ;;  %v5631_v46 = vrot.slane %v6824_v41, 9  ;;  %v6844_v47 = vmax.f32 %v6818_v38, %v5629_v44 }
 0x74a   :  { %1138 = vrot.lane.b32.xlu0 %v6779_v20, %s6464_s30  ;;  %v6786_v23 = vmax.f32 %v6772_v13, %v5635_v21  ;;  %v6797_v24 = vmax.f32 %v6775_v17, %v5639_v27  ;;  %v1007_v50 = vcombine.high %v6766_v7, %v6766_v7  ;;  %v1008_v51 = vcombine.high %v6772_v13, %v6772_v13 }
 0x74b   :  { %v6838_v45 = vmax.f32 %v6813_v36, %v5627_v42  ;;  %v6849_v48 = vmax.f32 %v6824_v41, %v5631_v46  ;;  %v1024_v53 = vcombine.high %v6769_v9, %v6769_v9  ;;  %v1025_v55 = vcombine.high %v6775_v17, %v6775_v17 }
 0x74c   :  { %1142 = vrot.lane.b32.xlu1 %v6786_v23, %s6464_s30  ;;  %v5634_v52 = vrot.slane %v1007_v50, 9  ;;  %v5636_v54 = vrot.slane %v1008_v51, 9  ;;  %v973_v7 = vcombine.high %v6808_v35, %v6808_v35  ;;  %v974_v9 = vcombine.high %v6813_v36, %v6813_v36 }
 0x74d   :  { %8778 = vst [vmem:[#allocation33_spill] sm:$0xff] %v6849_v48  ;;  %v5638_v57 = vrot.slane %v1024_v53, 9  ;;  %v5640_v59 = vrot.slane %v1025_v55, 9  ;;  %v990_v17 = vcombine.high %v6818_v38, %v6818_v38  ;;  %v991_v22 = vcombine.high %v6824_v41, %v6824_v41 }
 0x74e   :  { %1146 = vrot.lane.b32.xlu0 %v6792_v28, %s6464_s30  ;;  %v6941_v56 = vmax.f32 %v1007_v50, %v5634_v52  ;;  %v6945_v58 = vmax.f32 %v1008_v51, %v5636_v54  ;;  %v5626_v13 = vrot.slane %v973_v7, 9  ;;  %v5628_v21 = vrot.slane %v974_v9, 9 }
 0x74f   :  { %v6951_v61 = vmax.f32 %v1024_v53, %v5638_v57  ;;  %v6957_v63 = vmax.f32 %v1025_v55, %v5640_v59  ;;  %v5630_v27 = vrot.slane %v990_v17, 9  ;;  %v5632_v31 = vrot.slane %v991_v22, 9 }
 0x750   :  { %1150 = vrot.lane.b32.xlu1 %v6797_v24, %s6464_s30  ;;  %v7003_v26 = vmax.f32 %v973_v7, %v5626_v13  ;;  %v7009_v30 = vmax.f32 %v974_v9, %v5628_v21 }
 0x751   :  { %v7015_v33 = vmax.f32 %v990_v17, %v5630_v27  ;;  %v7021_v35 = vmax.f32 %v991_v22, %v5632_v31 }
 0x752   :  { %1170 = vrot.lane.b32.xlu0 %v6779_v20, %s6465_s25 }
 0x753   :  { %8780 = vst [vmem:[#allocation35_spill] sm:$0xff] %v7021_v35 }
 0x754   :  { %1174 = vrot.lane.b32.xlu1 %v6786_v23, %s6465_s25 }
 0x756   :  { %1178 = vrot.lane.b32.xlu0 %v6792_v28, %s6465_s25 }
 0x758   :  { %1182 = vrot.lane.b32.xlu1 %v6797_v24, %s6465_s25 }
 0x75a   :  { %1202 = vrot.lane.b32.xlu0 %v6779_v20, %s6466_s18 }
 0x75c   :  { %1206 = vrot.lane.b32.xlu1 %v6786_v23, %s6466_s18 }
 0x75e   :  { %1210 = vrot.lane.b32.xlu0 %v6792_v28, %s6466_s18 }
 0x760   :  { %1214 = vrot.lane.b32.xlu1 %v6797_v24, %s6466_s18 }
 0x762   :  { %1122 = vrot.lane.b32.xlu0 %v6832_v43, %s6464_s30 }
 0x764   :  { %1126 = vrot.lane.b32.xlu1 %v6838_v45, %s6464_s30 }
 0x766   :  { %1130 = vrot.lane.b32.xlu0 %v6844_v47, %s6464_s30 }
 0x768   :  { %1134 = vrot.lane.b32.xlu1 %v6849_v48, %s6464_s30 }
 0x76a   :  { %1154 = vrot.lane.b32.xlu0 %v6832_v43, %s6465_s25 }
 0x76c   :  { %1158 = vrot.lane.b32.xlu1 %v6838_v45, %s6465_s25 }
 0x76e   :  { %1162 = vrot.lane.b32.xlu0 %v6844_v47, %s6465_s25 }
 0x770   :  { %1166 = vrot.lane.b32.xlu1 %v6849_v48, %s6465_s25 }
 0x772   :  { %1186 = vrot.lane.b32.xlu0 %v6832_v43, %s6466_s18 }
 0x774   :  { %1190 = vrot.lane.b32.xlu1 %v6838_v45, %s6466_s18 }
 0x776   :  { %1194 = vrot.lane.b32.xlu0 %v6844_v47, %s6466_s18 }
 0x778   :  { %1198 = vrot.lane.b32.xlu1 %v6849_v48, %s6466_s18 }
 0x77a   :  { %1234 = vrot.lane.b32.xlu0 %v6779_v20, %s6462_s28 }
 0x77c   :  { %1238 = vrot.lane.b32.xlu1 %v6786_v23, %s6462_s28 }
 0x77e   :  { %1242 = vrot.lane.b32.xlu0 %v6792_v28, %s6462_s28 }
 0x780   :  { %1246 = vrot.lane.b32.xlu1 %v6797_v24, %s6462_s28 }
 0x782   :  { %1266 = vrot.lane.b32.xlu0 %v6779_v20, %s6460_s29 }
 0x784   :  { %1270 = vrot.lane.b32.xlu1 %v6786_v23, %s6460_s29 }
 0x786   :  { %1274 = vrot.lane.b32.xlu0 %v6792_v28, %s6460_s29 }
 0x788   :  { %1278 = vrot.lane.b32.xlu1 %v6797_v24, %s6460_s29 }
 0x78a   :  { %1218 = vrot.lane.b32.xlu0 %v6832_v43, %s6462_s28 }
 0x78c   :  { %1222 = vrot.lane.b32.xlu1 %v6838_v45, %s6462_s28 }
 0x78e   :  { %1226 = vrot.lane.b32.xlu0 %v6844_v47, %s6462_s28 }
 0x790   :  { %1230 = vrot.lane.b32.xlu1 %v6849_v48, %s6462_s28 }
 0x792   :  { %1250 = vrot.lane.b32.xlu0 %v6832_v43, %s6460_s29 }
 0x794   :  { %1254 = vrot.lane.b32.xlu1 %v6838_v45, %s6460_s29 }
 0x796   :  { %1258 = vrot.lane.b32.xlu0 %v6844_v47, %s6460_s29 }
 0x798   :  { %1262 = vrot.lane.b32.xlu1 %v6849_v48, %s6460_s29 }
 0x79a   :  { %1298 = vrot.lane.b32.xlu0 %v6779_v20, %s6459_s15 }
 0x79c   :  { %1302 = vrot.lane.b32.xlu1 %v6786_v23, %s6459_s15 }
 0x79e   :  { %1306 = vrot.lane.b32.xlu0 %v6792_v28, %s6459_s15 }
 0x7a0   :  { %1310 = vrot.lane.b32.xlu1 %v6797_v24, %s6459_s15 }
 0x7a2   :  { %1330 = vrot.lane.b32.xlu0 %v6779_v20, %s6458_s10 }
 0x7a4   :  { %1334 = vrot.lane.b32.xlu1 %v6786_v23, %s6458_s10 }
 0x7a6   :  { %1338 = vrot.lane.b32.xlu0 %v6792_v28, %s6458_s10 }
 0x7a8   :  { %1342 = vrot.lane.b32.xlu1 %v6797_v24, %s6458_s10 }
 0x7aa   :  { %1282 = vrot.lane.b32.xlu0 %v6832_v43, %s6459_s15 }
 0x7ac   :  { %1286 = vrot.lane.b32.xlu1 %v6838_v45, %s6459_s15 }
 0x7ae   :  { %1290 = vrot.lane.b32.xlu0 %v6844_v47, %s6459_s15 }
 0x7b0   :  { %1294 = vrot.lane.b32.xlu1 %v6849_v48, %s6459_s15 }
 0x7b2   :  { %1314 = vrot.lane.b32.xlu0 %v6832_v43, %s6458_s10 }
 0x7b4   :  { %1318 = vrot.lane.b32.xlu1 %v6838_v45, %s6458_s10 }
 0x7b6   :  { %1322 = vrot.lane.b32.xlu0 %v6844_v47, %s6458_s10 }
 0x7b8   :  { %1326 = vrot.lane.b32.xlu1 %v6849_v48, %s6458_s10 }
 0x7ba   :  { %1140 = vrot.lane.b32.xlu0 %v6941_v56, %s6464_s30 }
 0x7bc   :  { %v6947_v60 = vpop.permute.xlu0 %1138  ;;  %1144 = vrot.lane.b32.xlu1 %v6945_v58, %s6464_s30 }
 0x7be   :  { %v6953_v62 = vpop.permute.xlu1 %1142  ;;  %1148 = vrot.lane.b32.xlu0 %v6951_v61, %s6464_s30 }
 0x7c0   :  { %v6959_v0 = vpop.permute.xlu0 %1146  ;;  %1152 = vrot.lane.b32.xlu1 %v6957_v63, %s6464_s30 }
 0x7c2   :  { %v6963_v2 = vpop.permute.xlu1 %1150  ;;  %1172 = vrot.lane.b32.xlu0 %v6941_v56, %s6465_s25 }
 0x7c4   :  { %v6967_v3 = vpop.permute.xlu0 %1170  ;;  %1176 = vrot.lane.b32.xlu1 %v6945_v58, %s6465_s25 }
 0x7c6   :  { %v6971_v4 = vpop.permute.xlu1 %1174  ;;  %1180 = vrot.lane.b32.xlu0 %v6951_v61, %s6465_s25 }
 0x7c8   :  { %v6975_v5 = vpop.permute.xlu0 %1178  ;;  %1184 = vrot.lane.b32.xlu1 %v6957_v63, %s6465_s25 }
 0x7ca   :  { %v6981_v8 = vpop.permute.xlu1 %1182  ;;  %1204 = vrot.lane.b32.xlu0 %v6941_v56, %s6466_s18 }
 0x7cc   :  { %v6987_v11 = vpop.permute.xlu0 %1202  ;;  %1208 = vrot.lane.b32.xlu1 %v6945_v58, %s6466_s18 }
 0x7ce   :  { %v6993_v18 = vpop.permute.xlu1 %1206  ;;  %1212 = vrot.lane.b32.xlu0 %v6951_v61, %s6466_s18 }
 0x7d0   :  { %v6999_v25 = vpop.permute.xlu0 %1210  ;;  %1216 = vrot.lane.b32.xlu1 %v6957_v63, %s6466_s18 }
 0x7d2   :  { %v7005_v29 = vpop.permute.xlu1 %1214  ;;  %1124 = vrot.lane.b32.xlu0 %v7003_v26, %s6464_s30 }
 0x7d4   :  { %v7011_v32 = vpop.permute.xlu0 %1122  ;;  %1128 = vrot.lane.b32.xlu1 %v7009_v30, %s6464_s30 }
 0x7d6   :  { %1132 = vrot.lane.b32.xlu0 %v7015_v33, %s6464_s30  ;;  %v7019_v34 = vpop.permute.xlu1 %1126 }
 0x7d7   :  { %8779 = vst [vmem:[#allocation34_spill] sm:$0xff] %v7019_v34 }
 0x7d8   :  { %v7023_v36 = vpop.permute.xlu0 %1130  ;;  %1136 = vrot.lane.b32.xlu1 %v7021_v35, %s6464_s30 }
 0x7da   :  { %1156 = vrot.lane.b32.xlu0 %v7003_v26, %s6465_s25  ;;  %v7029_v37 = vpop.permute.xlu1 %1134 }
 0x7db   :  { %8781 = vst [vmem:[#allocation36_spill] sm:$0xff] %v7029_v37 }
 0x7dc   :  { %v7031_v38 = vpop.permute.xlu0 %1154  ;;  %1160 = vrot.lane.b32.xlu1 %v7009_v30, %s6465_s25 }
 0x7de   :  { %1164 = vrot.lane.b32.xlu0 %v7015_v33, %s6465_s25  ;;  %v7037_v39 = vpop.permute.xlu1 %1158 }
 0x7df   :  { %8782 = vst [vmem:[#allocation37_spill] sm:$0xff] %v7037_v39 }
 0x7e0   :  { %v7039_v41 = vpop.permute.xlu0 %1162  ;;  %1168 = vrot.lane.b32.xlu1 %v7021_v35, %s6465_s25 }
 0x7e2   :  { %1188 = vrot.lane.b32.xlu0 %v7003_v26, %s6466_s18  ;;  %v7045_v42 = vpop.permute.xlu1 %1166 }
 0x7e3   :  { %8783 = vst [vmem:[#allocation38_spill] sm:$0xff] %v7045_v42 }
 0x7e4   :  { %v7047_v44 = vpop.permute.xlu0 %1186  ;;  %1192 = vrot.lane.b32.xlu1 %v7009_v30, %s6466_s18 }
 0x7e6   :  { %1196 = vrot.lane.b32.xlu0 %v7015_v33, %s6466_s18  ;;  %v7053_v46 = vpop.permute.xlu1 %1190 }
 0x7e7   :  { %8784 = vst [vmem:[#allocation39_spill] sm:$0xff] %v7053_v46 }
 0x7e8   :  { %v7055_v50 = vpop.permute.xlu0 %1194  ;;  %1200 = vrot.lane.b32.xlu1 %v7021_v35, %s6466_s18 }
 0x7ea   :  { %1236 = vrot.lane.b32.xlu0 %v6941_v56, %s6462_s28  ;;  %v7061_v51 = vpop.permute.xlu1 %1198 }
 0x7eb   :  { %8785 = vst [vmem:[#allocation40_spill] sm:$0xff] %v7061_v51 }
 0x7ec   :  { %v7063_v52 = vpop.permute.xlu0 %1234  ;;  %1240 = vrot.lane.b32.xlu1 %v6945_v58, %s6462_s28 }
 0x7ee   :  { %1244 = vrot.lane.b32.xlu0 %v6951_v61, %s6462_s28  ;;  %v7069_v53 = vpop.permute.xlu1 %1238 }
 0x7ef   :  { %8786 = vst [vmem:[#allocation41_spill] sm:$0xff] %v7069_v53 }
 0x7f0   :  { %v7071_v54 = vpop.permute.xlu0 %1242  ;;  %1248 = vrot.lane.b32.xlu1 %v6957_v63, %s6462_s28 }
 0x7f2   :  { %1268 = vrot.lane.b32.xlu0 %v6941_v56, %s6460_s29  ;;  %v7077_v55 = vpop.permute.xlu1 %1246 }
 0x7f3   :  { %8787 = vst [vmem:[#allocation42_spill] sm:$0xff] %v7077_v55  ;;  %v6467_v55 = vmov 1934713408  }
 0x7f4   :  { %v7079_v57 = vpop.permute.xlu0 %1266  ;;  %1272 = vrot.lane.b32.xlu1 %v6945_v58, %s6460_s29 }
 0x7f6   :  { %1276 = vrot.lane.b32.xlu0 %v6951_v61, %s6460_s29  ;;  %v7085_v59 = vpop.permute.xlu1 %1270 }
 0x7f7   :  { %8788 = vst [vmem:[#allocation43_spill] sm:$0xff] %v7085_v59 }
 0x7f8   :  { %v7087_v7 = vpop.permute.xlu0 %1274  ;;  %1280 = vrot.lane.b32.xlu1 %v6957_v63, %s6460_s29 }
 0x7fa   :  { %1220 = vrot.lane.b32.xlu0 %v7003_v26, %s6462_s28  ;;  %v7093_v9 = vpop.permute.xlu1 %1278 }
 0x7fb   :  { %8789 = vst [vmem:[#allocation44_spill] sm:$0xff] %v7093_v9 }
 0x7fc   :  { %v7095_v13 = vpop.permute.xlu0 %1218  ;;  %1224 = vrot.lane.b32.xlu1 %v7009_v30, %s6462_s28 }
 0x7fe   :  { %1228 = vrot.lane.b32.xlu0 %v7015_v33, %s6462_s28  ;;  %v7101_v17 = vpop.permute.xlu1 %1222 }
 0x7ff   :  { %8790 = vst [vmem:[#allocation45_spill] sm:$0xff] %v7101_v17  ;;  %v1382_v17 = vrot.slane %v6941_v56, 7 }
 0x800   :  { %v7103_v21 = vpop.permute.xlu0 %1226  ;;  %1232 = vrot.lane.b32.xlu1 %v7021_v35, %s6462_s28 }
 0x801   :  { %v1383_v9 = vsel %vm1351_vm9, %v1382_v17, %v6779_v20 }
 0x802   :  { %1252 = vrot.lane.b32.xlu0 %v7003_v26, %s6460_s29  ;;  %v7109_v22 = vpop.permute.xlu1 %1230 }
 0x803   :  { %8791 = vst [vmem:[#allocation46_spill] sm:$0xff] %v7109_v22 }
 0x804   :  { %v7111_v27 = vpop.permute.xlu0 %1250  ;;  %1256 = vrot.lane.b32.xlu1 %v7009_v30, %s6460_s29 }
 0x806   :  { %1260 = vrot.lane.b32.xlu0 %v7015_v33, %s6460_s29  ;;  %v7117_v31 = vpop.permute.xlu1 %1254 }
 0x807   :  { %8792 = vst [vmem:[#allocation47_spill] sm:$0xff] %v7117_v31 }
 0x808   :  { %v7119_v16 = vpop.permute.xlu0 %1258  ;;  %1264 = vrot.lane.b32.xlu1 %v7021_v35, %s6460_s29 }
 0x80a   :  { %1300 = vrot.lane.b32.xlu0 %v6941_v56, %s6459_s15  ;;  %v7125_v19 = vpop.permute.xlu1 %1262 }
 0x80b   :  { %8793 = vst [vmem:[#allocation48_spill] sm:$0xff] %v7125_v19 }
 0x80c   :  { %v7127_v15 = vpop.permute.xlu0 %1298  ;;  %1304 = vrot.lane.b32.xlu1 %v6945_v58, %s6459_s15 }
 0x80e   :  { %1308 = vrot.lane.b32.xlu0 %v6951_v61, %s6459_s15  ;;  %v7133_v14 = vpop.permute.xlu1 %1302 }
 0x80f   :  { %8794 = vst [vmem:[#allocation49_spill] sm:$0xff] %v7133_v14 }
 0x810   :  { %v7135_v49 = vpop.permute.xlu0 %1306  ;;  %1312 = vrot.lane.b32.xlu1 %v6957_v63, %s6459_s15 }
 0x812   :  { %1332 = vrot.lane.b32.xlu0 %v6941_v56, %s6458_s10  ;;  %v7141_v40 = vpop.permute.xlu1 %1310  ;;  %v1396_v56 = vrot.slane %v6951_v61, 7 }
 0x813   :  { %8795 = vst [vmem:[#allocation50_spill] sm:$0xff] %v7141_v40 }
 0x814   :  { %v7143_v12 = vpop.permute.xlu0 %1330  ;;  %1336 = vrot.lane.b32.xlu1 %v6945_v58, %s6458_s10  ;;  %v1397_v46 = vsel %vm1351_vm9, %v1396_v56, %v6792_v28 }
 0x816   :  { %1340 = vrot.lane.b32.xlu0 %v6951_v61, %s6458_s10  ;;  %v7149_v10 = vpop.permute.xlu1 %1334 }
 0x817   :  { %8796 = vst [vmem:[#allocation51_spill] sm:$0xff] %v7149_v10 }
 0x818   :  { %v7151_v1 = vpop.permute.xlu0 %1338  ;;  %1344 = vrot.lane.b32.xlu1 %v6957_v63, %s6458_s10 }
 0x81a   :  { %1284 = vrot.lane.b32.xlu0 %v7003_v26, %s6459_s15  ;;  %v7157_v14 = vpop.permute.xlu1 %1342 }
 0x81b   :  { %8797 = vst [vmem:[#allocation52_spill] sm:$0xff] %v7157_v14 }
 0x81c   :  { %v7159_v40 = vpop.permute.xlu0 %1282  ;;  %1288 = vrot.lane.b32.xlu1 %v7009_v30, %s6459_s15 }
 0x81e   :  { %1292 = vrot.lane.b32.xlu0 %v7015_v33, %s6459_s15  ;;  %v7165_v22 = vpop.permute.xlu1 %1286 }
 0x81f   :  { %8798 = vst [vmem:[#allocation53_spill] sm:$0xff] %v7165_v22 }
 0x820   :  { %v7167_v10 = vpop.permute.xlu0 %1290  ;;  %1296 = vrot.lane.b32.xlu1 %v7021_v35, %s6459_s15 }
 0x822   :  { %1316 = vrot.lane.b32.xlu0 %v7003_v26, %s6458_s10  ;;  %v7173_v19 = vpop.permute.xlu1 %1294 }
 0x823   :  { %8799 = vst [vmem:[#allocation54_spill] sm:$0xff] %v7173_v19  ;;  %v1866_v19 = vunpack.c.l.s4 %v6467_v55 }
 0x824   :  { %v7175_v14 = vpop.permute.xlu0 %1314  ;;  %1320 = vrot.lane.b32.xlu1 %v7009_v30, %s6458_s10 }
 0x825   :  { %v1867_v42 = vunpack.c.0.s8 %v1866_v19 }
 0x826   :  { %1324 = vrot.lane.b32.xlu0 %v7015_v33, %s6458_s10  ;;  %v7182_v22 = vpop.permute.xlu1 %1318 }
 0x827   :  { %8800 = vst [vmem:[#allocation55_spill] sm:$0xff] %v7182_v22  ;;  %v1384_v22 = vsel %vm1353_vm10, %v1382_v17, %v1383_v9  ;;  %v7203_v48 = vsub.s32 %v1867_v42, %v6614_v6  ;;  %v1398_v9 = vsel %vm1353_vm10, %v1396_v56, %v1397_v46 }
 0x828   :  { %v7184_v31 = vpop.permute.xlu0 %1322  ;;  %1328 = vrot.lane.b32.xlu1 %v7021_v35, %s6458_s10  ;;  %v1385_v20 = vsel %vm1355_vm14, %v1382_v17, %v1384_v22  ;;  %v1399_v42 = vsel %vm1355_vm14, %v1396_v56, %v1398_v9 }
 0x829   :  { %v1386_v35 = vsel %vm8764_vm15, %v1382_v17, %v1385_v20 }
 0x82a   :  { %v7190_v53 = vpop.permute.xlu1 %1326 }
 0x82b   :  { %8801 = vst [vmem:[#allocation56_spill] sm:$0xff] %v7190_v53 }
 0x82c   :  { %v1141_v59 = vpop.permute.xlu0 %1140 }
 0x82d   :  { %v1438_v51 = vrot.slane %v1141_v59, 7 }
 0x82e   :  { %v7194_v39 = vpop.permute.xlu1 %1144 }
 0x82f   :  { %v1439_v55 = vsel %vm1351_vm9, %v1438_v51, %v6947_v60 }
 0x830   :  { %v1440_v53 = vsel %vm1353_vm10, %v1438_v51, %v1439_v55  ;;  %v1149_v61 = vpop.permute.xlu0 %1148 }
 0x831   :  { %v1441_v19 = vsel %vm1355_vm14, %v1438_v51, %v1440_v53  ;;  %v1452_v59 = vrot.slane %v1149_v61, 7 }
 0x832   :  { %v1442_v37 = vsel %vm8764_vm15, %v1438_v51, %v1441_v19  ;;  %v7208_v28 = vpop.permute.xlu1 %1152 }
 0x833   :  { %v1453_v60 = vsel %vm1351_vm9, %v1452_v59, %v6959_v0  ;;  %v2008_v22 = vcombine.low %v1386_v35, %v1442_v37  ;;  %v8803_v0 = vmov 0.0   ;;  %v1400_v37 = vsel %vm8764_vm15, %v1396_v56, %v1399_v42 }
 0x834   :  { %v1454_v55 = vsel %vm1353_vm10, %v1452_v59, %v1453_v60  ;;  %v1173_v34 = vpop.permute.xlu0 %1172  ;;  %v1350_v42 = vrot.slane %v7003_v26, 7 }
 0x835   :  { %v1455_v53 = vsel %vm1355_vm14, %v1452_v59, %v1454_v55  ;;  %v1494_v61 = vrot.slane %v1173_v34, 7  ;;  %v7217_v46 = vrot.slane %v2008_v22, %v7203_v48 }
 0x836   :  { %v1456_v51 = vsel %vm8764_vm15, %v1452_v59, %v1455_v53  ;;  %v7220_v19 = vpop.permute.xlu1 %1176 }
 0x837   :  { %8802 = vst [vmem:[#allocation57_spill] sm:$0xff] %v7217_v46  ;;  %2280 = vrot.lane.b32.xlu0 %v7217_v46, %s6468_s3  ;;  %v7226_v35 = vcombine.high %v7217_v46, %v8803_v0  ;;  %v2080_v20 = vcombine.low %v1400_v37, %v1456_v51  ;;  %v1495_v34 = vsel %vm1351_vm9, %v1494_v61, %v6967_v3 }
 0x838   :  { %v1181_v17 = vpop.permute.xlu0 %1180  ;;  %v1496_v22 = vsel %vm1353_vm10, %v1494_v61, %v1495_v34 }
 0x839   :  { %8804 = vst [vmem:[#allocation58_spill] sm:$0xff] %v7226_v35  ;;  %2288 = vrot.lane.b32.xlu1 %v7226_v35, %s6468_s3  ;;  %v1508_v59 = vrot.slane %v1181_v17, 7  ;;  %v7236_v60 = vrot.slane %v2080_v20, %v7203_v48  ;;  %v1497_v37 = vsel %vm1355_vm14, %v1494_v61, %v1496_v22  ;;  %v1368_v22 = vrot.slane %v7015_v33, 7 }
 0x83a   :  { %v7233_v9 = vpop.permute.xlu1 %1184 }
 0x83b   :  { %8805 = vst [vmem:[#allocation59_spill] sm:$0xff] %v7236_v60  ;;  %2312 = vrot.lane.b32.xlu0 %v7236_v60, %s6468_s3  ;;  %v7243_v55 = vcombine.high %v7236_v60, %v8803_v0  ;;  %v1509_v53 = vsel %vm1351_vm9, %v1508_v59, %v6975_v5  ;;  %v1352_v5 = vsel %vm1351_vm9, %v1350_v42, %v6832_v43 }
 0x83c   :  { %v1205_v56 = vpop.permute.xlu0 %1204  ;;  %v1498_v60 = vsel %vm8764_vm15, %v1494_v61, %v1497_v37  ;;  %v1354_v35 = vsel %vm1353_vm10, %v1350_v42, %v1352_v5 }
 0x83d   :  { %8806 = vst [vmem:[#allocation60_spill] sm:$0xff] %v7243_v55  ;;  %v1550_v3 = vrot.slane %v1205_v56, 7  ;;  %2320 = vrot.lane.b32.xlu1 %v7243_v55, %s6468_s3  ;;  %v1510_v56 = vsel %vm1353_vm10, %v1508_v59, %v1509_v53 }
 0x83e   :  { %v7250_v51 = vpop.permute.xlu1 %1208  ;;  %v1511_v53 = vsel %vm1355_vm14, %v1508_v59, %v1510_v56  ;;  %v1356_v56 = vsel %vm1355_vm14, %v1350_v42, %v1354_v35 }
 0x83f   :  { %v1551_v17 = vsel %vm1351_vm9, %v1550_v3, %v6987_v11  ;;  %v1358_v35 = vsel %vm8764_vm15, %v1350_v42, %v1356_v56 }
 0x840   :  { %v1552_v20 = vsel %vm1353_vm10, %v1550_v3, %v1551_v17  ;;  %v1213_v34 = vpop.permute.xlu0 %1212 }
 0x841   :  { %v1553_v26 = vsel %vm1355_vm14, %v1550_v3, %v1552_v20  ;;  %v1564_v6 = vrot.slane %v1213_v34, 7 }
 0x842   :  { %v1554_v55 = vsel %vm8764_vm15, %v1550_v3, %v1553_v26  ;;  %v7265_v46 = vpop.permute.xlu1 %1216 }
 0x843   :  { %v1565_v11 = vsel %vm1351_vm9, %v1564_v6, %v6999_v25  ;;  %v2017_v17 = vcombine.low %v1498_v60, %v1554_v55  ;;  %v1369_v25 = vsel %vm1351_vm9, %v1368_v22, %v6844_v47  ;;  %v1512_v60 = vsel %vm8764_vm15, %v1508_v59, %v1511_v53 }
 0x844   :  { %v1566_v20 = vsel %vm1353_vm10, %v1564_v6, %v1565_v11  ;;  %v1125_v34 = vpop.permute.xlu0 %1124 }
 0x845   :  { %v1567_v43 = vsel %vm1355_vm14, %v1564_v6, %v1566_v20  ;;  %v1410_v61 = vrot.slane %v1125_v34, 7  ;;  %v7272_v3 = vrot.slane %v2017_v17, %v7203_v48 }
 0x846   :  { %v1568_v33 = vsel %vm8764_vm15, %v1564_v6, %v1567_v43  ;;  %v7289_v11 = vpop.permute.xlu1 %1128 }
 0x847   :  { %v1411_v55 = vsel %vm1351_vm9, %v1410_v61, %v7011_v32  ;;  %2282 = vrot.lane.b32.xlu0 %v7272_v3, %s6468_s3  ;;  %v7284_v37 = vcombine.high %v7272_v3, %v8803_v0  ;;  %v2089_v5 = vcombine.low %v1512_v60, %v1568_v33  ;;  %v1370_v32 = vsel %vm1353_vm10, %v1368_v22, %v1369_v25 }
 0x848   :  { %v1412_v26 = vsel %vm1353_vm10, %v1410_v61, %v1411_v55  ;;  %v1133_v6 = vpop.permute.xlu0 %1132 }
 0x849   :  { %v1413_v47 = vsel %vm1355_vm14, %v1410_v61, %v1412_v26  ;;  %v1424_v59 = vrot.slane %v1133_v6, 7  ;;  %2290 = vrot.lane.b32.xlu1 %v7284_v37, %s6468_s3  ;;  %v7296_v53 = vrot.slane %v2089_v5, %v7203_v48 }
 0x84a   :  { %v1414_v17 = vsel %vm8764_vm15, %v1410_v61, %v1413_v47  ;;  %v1371_v61 = vsel %vm1355_vm14, %v1368_v22, %v1370_v32  ;;  %v7316_v56 = vpop.permute.xlu1 %1136 }
 0x84b   :  { %v1425_v20 = vsel %vm1351_vm9, %v1424_v59, %v7023_v36  ;;  %v1864_v34 = vcombine.low %v1358_v35, %v1414_v17  ;;  %2314 = vrot.lane.b32.xlu0 %v7296_v53, %s6468_s3  ;;  %v7306_v25 = vcombine.high %v7296_v53, %v8803_v0  ;;  %v1372_v6 = vsel %vm8764_vm15, %v1368_v22, %v1371_v61 }
 0x84c   :  { %v1426_v43 = vsel %vm1353_vm10, %v1424_v59, %v1425_v20  ;;  %v1157_v33 = vpop.permute.xlu0 %1156 }
 0x84d   :  { %v1427_v60 = vsel %vm1355_vm14, %v1424_v59, %v1426_v43  ;;  %v1466_v55 = vrot.slane %v1157_v33, 7  ;;  %v7311_v42 = vrot.slane %v1864_v34, %v7203_v48  ;;  %2322 = vrot.lane.b32.xlu1 %v7306_v25, %s6468_s3 }
 0x84e   :  { %v1428_v36 = vsel %vm8764_vm15, %v1424_v59, %v1427_v60  ;;  %v7339_v34 = vpop.permute.xlu1 %1160 }
 0x84f   :  { %8807 = vst [vmem:[#allocation61_spill] sm:$0xff] %v7311_v42  ;;  %v7320_v26 = vcombine.high %v7311_v42, %v8803_v0  ;;  %2216 = vrot.lane.b32.xlu0 %v7311_v42, %s6468_s3  ;;  %v1936_v47 = vcombine.low %v1372_v6, %v1428_v36  ;;  %v1467_v32 = vsel %vm1351_vm9, %v1466_v55, %v7031_v38 }
 0x850   :  { %v1165_v5 = vpop.permute.xlu0 %1164  ;;  %v1468_v35 = vsel %vm1353_vm10, %v1466_v55, %v1467_v32 }
 0x851   :  { %v1480_v59 = vrot.slane %v1165_v5, 7  ;;  %2224 = vrot.lane.b32.xlu1 %v7320_v26, %s6468_s3  ;;  %v7330_v17 = vrot.slane %v1936_v47, %v7203_v48  ;;  %v1469_v33 = vsel %vm1355_vm14, %v1466_v55, %v1468_v35 }
 0x852   :  { %v1470_v32 = vsel %vm8764_vm15, %v1466_v55, %v1469_v33 }
 0x853   :  { %8808 = vst [vmem:[#allocation62_spill] sm:$0xff] %v7330_v17  ;;  %2248 = vrot.lane.b32.xlu0 %v7330_v17, %s6468_s3  ;;  %v7337_v20 = vcombine.high %v7330_v17, %v8803_v0  ;;  %v1481_v43 = vsel %vm1351_vm9, %v1480_v59, %v7039_v41 }
 0x854   :  { %v1189_v22 = vpop.permute.xlu0 %1188  ;;  %v1482_v6 = vsel %vm1353_vm10, %v1480_v59, %v1481_v43 }
 0x855   :  { %8809 = vst [vmem:[#allocation63_spill] sm:$0xff] %v7337_v20  ;;  %v1522_v38 = vrot.slane %v1189_v22, 7  ;;  %2256 = vrot.lane.b32.xlu1 %v7337_v20, %s6468_s3  ;;  %v7353_v22 = vpop.permute.xlu1 %1168 }
 0x857   :  { %v1523_v61 = vsel %vm1351_vm9, %v1522_v38, %v7047_v44  ;;  %v1483_v44 = vsel %vm1355_vm14, %v1480_v59, %v1482_v6 }
 0x858   :  { %v1524_v60 = vsel %vm1353_vm10, %v1522_v38, %v1523_v61  ;;  %v1197_v36 = vpop.permute.xlu0 %1196 }
 0x859   :  { %v1525_v5 = vsel %vm1355_vm14, %v1522_v38, %v1524_v60  ;;  %v1536_v47 = vrot.slane %v1197_v36, 7  ;;  %v7371_v6 = vpop.permute.xlu1 %1192 }
 0x85a   :  { %v1526_v41 = vsel %vm8764_vm15, %v1522_v38, %v1525_v5  ;;  %v1484_v38 = vsel %vm8764_vm15, %v1480_v59, %v1483_v44 }
 0x85b   :  { %v1537_v35 = vsel %vm1351_vm9, %v1536_v47, %v7055_v50  ;;  %v1873_v17 = vcombine.low %v1470_v32, %v1526_v41 }
 0x85c   :  { %v1538_v61 = vsel %vm1353_vm10, %v1536_v47, %v1537_v35  ;;  %v1237_v20 = vpop.permute.xlu0 %1236 }
 0x85d   :  { %v1539_v43 = vsel %vm1355_vm14, %v1536_v47, %v1538_v61  ;;  %v1606_v42 = vrot.slane %v1237_v20, 7  ;;  %v7361_v60 = vrot.slane %v1873_v17, %v7203_v48  ;;  %v7391_v35 = vpop.permute.xlu1 %1200 }
 0x85e   :  { %v1540_v55 = vsel %vm8764_vm15, %v1536_v47, %v1539_v43 }
 0x85f   :  { %8810 = vst [vmem:[#allocation64_spill] sm:$0xff] %v7361_v60  ;;  %2218 = vrot.lane.b32.xlu0 %v7361_v60, %s6468_s3  ;;  %v7369_v50 = vcombine.high %v7361_v60, %v8803_v0  ;;  %v1945_v36 = vcombine.low %v1484_v38, %v1540_v55  ;;  %v1607_v20 = vsel %vm1351_vm9, %v1606_v42, %v7063_v52 }
 0x860   :  { %v1245_v33 = vpop.permute.xlu0 %1244  ;;  %v1608_v5 = vsel %vm1353_vm10, %v1606_v42, %v1607_v20 }
 0x861   :  { %2226 = vrot.lane.b32.xlu1 %v7369_v50, %s6468_s3  ;;  %v1620_v17 = vrot.slane %v1245_v33, 7  ;;  %v7378_v59 = vrot.slane %v1945_v36, %v7203_v48  ;;  %v1609_v44 = vsel %vm1355_vm14, %v1606_v42, %v1608_v5 }
 0x863   :  { %8811 = vst [vmem:[#allocation65_spill] sm:$0xff] %v7378_v59  ;;  %2250 = vrot.lane.b32.xlu0 %v7378_v59, %s6468_s3  ;;  %v7385_v32 = vcombine.high %v7378_v59, %v8803_v0  ;;  %v1621_v52 = vsel %vm1351_vm9, %v1620_v17, %v7071_v54  ;;  %v1610_v54 = vsel %vm8764_vm15, %v1606_v42, %v1609_v44 }
 0x864   :  { %v1269_v47 = vpop.permute.xlu0 %1268  ;;  %v1622_v38 = vsel %vm1353_vm10, %v1620_v17, %v1621_v52 }
 0x865   :  { %8812 = vst [vmem:[#allocation66_spill] sm:$0xff] %v7385_v32  ;;  %v1662_v41 = vrot.slane %v1269_v47, 7  ;;  %2258 = vrot.lane.b32.xlu1 %v7385_v32, %s6468_s3  ;;  %v1623_v5 = vsel %vm1355_vm14, %v1620_v17, %v1622_v38 }
 0x867   :  { %v1663_v61 = vsel %vm1351_vm9, %v1662_v41, %v7079_v57 }
 0x868   :  { %v1664_v43 = vsel %vm1353_vm10, %v1662_v41, %v1663_v61  ;;  %v1277_v55 = vpop.permute.xlu0 %1276  ;;  %v7405_v61 = vpop.permute.xlu1 %1240 }
 0x869   :  { %v1665_v33 = vsel %vm1355_vm14, %v1662_v41, %v1664_v43  ;;  %v1676_v36 = vrot.slane %v1277_v55, 7 }
 0x86a   :  { %v1666_v20 = vsel %vm8764_vm15, %v1662_v41, %v1665_v33  ;;  %v1624_v41 = vsel %vm8764_vm15, %v1620_v17, %v1623_v5 }
 0x86b   :  { %v1677_v47 = vsel %vm1351_vm9, %v1676_v36, %v7087_v7  ;;  %v2026_v59 = vcombine.low %v1610_v54, %v1666_v20 }
 0x86c   :  { %v1678_v57 = vsel %vm1353_vm10, %v1676_v36, %v1677_v47  ;;  %v1221_v60 = vpop.permute.xlu0 %1220  ;;  %v7426_v17 = vpop.permute.xlu1 %1248 }
 0x86d   :  { %v1679_v52 = vsel %vm1355_vm14, %v1676_v36, %v1678_v57  ;;  %v1578_v32 = vrot.slane %v1221_v60, 7  ;;  %v7409_v43 = vrot.slane %v2026_v59, %v7203_v48 }
 0x86e   :  { %v1680_v42 = vsel %vm8764_vm15, %v1676_v36, %v1679_v52 }
 0x86f   :  { %8813 = vst [vmem:[#allocation67_spill] sm:$0xff] %v7409_v43  ;;  %2284 = vrot.lane.b32.xlu0 %v7409_v43, %s6468_s3  ;;  %v7417_v7 = vcombine.high %v7409_v43, %v8803_v0  ;;  %v2098_v55 = vcombine.low %v1624_v41, %v1680_v42  ;;  %v1579_v38 = vsel %vm1351_vm9, %v1578_v32, %v7095_v13 }
 0x870   :  { %v1229_v44 = vpop.permute.xlu0 %1228  ;;  %v1580_v33 = vsel %vm1353_vm10, %v1578_v32, %v1579_v38  ;;  %v7443_v42 = vpop.permute.xlu1 %1272 }
 0x871   :  { %2292 = vrot.lane.b32.xlu1 %v7417_v7, %s6468_s3  ;;  %v1592_v60 = vrot.slane %v1229_v44, 7  ;;  %v7424_v59 = vrot.slane %v2098_v55, %v7203_v48  ;;  %v1581_v47 = vsel %vm1355_vm14, %v1578_v32, %v1580_v33 }
 0x873   :  { %8814 = vst [vmem:[#allocation68_spill] sm:$0xff] %v7424_v59  ;;  %2316 = vrot.lane.b32.xlu0 %v7424_v59, %s6468_s3  ;;  %v7433_v54 = vcombine.high %v7424_v59, %v8803_v0  ;;  %v1593_v20 = vsel %vm1351_vm9, %v1592_v60, %v7103_v21  ;;  %v1582_v21 = vsel %vm8764_vm15, %v1578_v32, %v1581_v47 }
 0x874   :  { %v1253_v36 = vpop.permute.xlu0 %1252  ;;  %v1594_v41 = vsel %vm1353_vm10, %v1592_v60, %v1593_v20  ;;  %v7458_v32 = vpop.permute.xlu1 %1280 }
 0x875   :  { %8815 = vst [vmem:[#allocation69_spill] sm:$0xff] %v7433_v54  ;;  %v1634_v13 = vrot.slane %v1253_v36, 7  ;;  %2324 = vrot.lane.b32.xlu1 %v7433_v54, %s6468_s3 }
 0x877   :  { %v1635_v5 = vsel %vm1351_vm9, %v1634_v13, %v7111_v27  ;;  %v1595_v27 = vsel %vm1355_vm14, %v1592_v60, %v1594_v41 }
 0x878   :  { %v1636_v57 = vsel %vm1353_vm10, %v1634_v13, %v1635_v5  ;;  %v1261_v52 = vpop.permute.xlu0 %1260 }
 0x879   :  { %v1637_v44 = vsel %vm1355_vm14, %v1634_v13, %v1636_v57  ;;  %v1648_v55 = vrot.slane %v1261_v52, 7 }
 0x87a   :  { %v1638_v38 = vsel %vm8764_vm15, %v1634_v13, %v1637_v44  ;;  %v1596_v13 = vsel %vm8764_vm15, %v1592_v60, %v1595_v27 }
 0x87b   :  { %v1649_v33 = vsel %vm1351_vm9, %v1648_v55, %v7119_v16  ;;  %v1882_v36 = vcombine.low %v1582_v21, %v1638_v38  ;;  %v7481_v21 = vpop.permute.xlu1 %1224 }
 0x87c   :  { %v1650_v5 = vsel %vm1353_vm10, %v1648_v55, %v1649_v33  ;;  %v1301_v59 = vpop.permute.xlu0 %1300 }
 0x87d   :  { %v1651_v43 = vsel %vm1355_vm14, %v1648_v55, %v1650_v5  ;;  %v1718_v54 = vrot.slane %v1301_v59, 7  ;;  %v7455_v20 = vrot.slane %v1882_v36, %v7203_v48 }
 0x87e   :  { %v1652_v57 = vsel %vm8764_vm15, %v1648_v55, %v1651_v43 }
 0x87f   :  { %8816 = vst [vmem:[#allocation70_spill] sm:$0xff] %v7455_v20  ;;  %2220 = vrot.lane.b32.xlu0 %v7455_v20, %s6468_s3  ;;  %v7465_v16 = vcombine.high %v7455_v20, %v8803_v0  ;;  %v1954_v52 = vcombine.low %v1596_v13, %v1652_v57  ;;  %v1719_v59 = vsel %vm1351_vm9, %v1718_v54, %v7127_v15 }
 0x880   :  { %v1309_v47 = vpop.permute.xlu0 %1308  ;;  %v1720_v60 = vsel %vm1353_vm10, %v1718_v54, %v1719_v59  ;;  %v7495_v59 = vpop.permute.xlu1 %1232 }
 0x881   :  { %8817 = vst [vmem:[#allocation71_spill] sm:$0xff] %v7465_v16  ;;  %2228 = vrot.lane.b32.xlu1 %v7465_v16, %s6468_s3  ;;  %v1732_v43 = vrot.slane %v1309_v47, 7  ;;  %v7472_v41 = vrot.slane %v1954_v52, %v7203_v48  ;;  %v1721_v33 = vsel %vm1355_vm14, %v1718_v54, %v1720_v60 }
 0x882   :  { %v1722_v52 = vsel %vm8764_vm15, %v1718_v54, %v1721_v33 }
 0x883   :  { %8818 = vst [vmem:[#allocation72_spill] sm:$0xff] %v7472_v41  ;;  %2252 = vrot.lane.b32.xlu0 %v7472_v41, %s6468_s3  ;;  %v7479_v55 = vcombine.high %v7472_v41, %v8803_v0  ;;  %v1733_v38 = vsel %vm1351_vm9, %v1732_v43, %v7135_v49 }
 0x884   :  { %v1333_v44 = vpop.permute.xlu0 %1332  ;;  %v1734_v57 = vsel %vm1353_vm10, %v1732_v43, %v1733_v38 }
 0x885   :  { %8819 = vst [vmem:[#allocation73_spill] sm:$0xff] %v7479_v55  ;;  %v1774_v15 = vrot.slane %v1333_v44, 7  ;;  %2260 = vrot.lane.b32.xlu1 %v7479_v55, %s6468_s3  ;;  %v1735_v41 = vsel %vm1355_vm14, %v1732_v43, %v1734_v57 }
 0x887   :  { %v1775_v36 = vsel %vm1351_vm9, %v1774_v15, %v7143_v12  ;;  %v1389_v12 = vrot.slane %v6945_v58, 7 }
 0x888   :  { %v1776_v27 = vsel %vm1353_vm10, %v1774_v15, %v1775_v36  ;;  %v1341_v5 = vpop.permute.xlu0 %1340  ;;  %v1445_v36 = vrot.slane %v7194_v39, 7 }
 0x889   :  { %v1777_v13 = vsel %vm1355_vm14, %v1774_v15, %v1776_v27  ;;  %v1788_v47 = vrot.slane %v1341_v5, 7  ;;  %v1390_v39 = vsel %vm1351_vm9, %v1389_v12, %v6786_v23 }
 0x88a   :  { %v1778_v49 = vsel %vm8764_vm15, %v1774_v15, %v1777_v13  ;;  %v1446_v57 = vsel %vm1351_vm9, %v1445_v36, %v6953_v62  ;;  %v1459_v13 = vrot.slane %v7208_v28, 7  ;;  %v1391_v23 = vsel %vm1353_vm10, %v1389_v12, %v1390_v39 }
 0x88b   :  { %v1789_v60 = vsel %vm1351_vm9, %v1788_v47, %v7151_v1  ;;  %v2035_v44 = vcombine.low %v1722_v52, %v1778_v49  ;;  %v1736_v1 = vsel %vm8764_vm15, %v1732_v43, %v1735_v41  ;;  %v1403_v62 = vrot.slane %v6957_v63, 7 }
 0x88c   :  { %v1790_v38 = vsel %vm1353_vm10, %v1788_v47, %v1789_v60  ;;  %v1285_v27 = vpop.permute.xlu0 %1284  ;;  %v1447_v28 = vsel %vm1353_vm10, %v1445_v36, %v1446_v57  ;;  %v1392_v63 = vsel %vm1355_vm14, %v1389_v12, %v1391_v23  ;;  %v7550_v39 = vrot.slane %v7009_v30, 7 }
 0x88d   :  { %v1791_v5 = vsel %vm1355_vm14, %v1788_v47, %v1790_v38  ;;  %v1690_v54 = vrot.slane %v1285_v27, 7  ;;  %v7505_v15 = vrot.slane %v2035_v44, %v7203_v48  ;;  %v1460_v44 = vsel %vm1351_vm9, %v1459_v13, %v6963_v2 }
 0x88e   :  { %v1792_v33 = vsel %vm8764_vm15, %v1788_v47, %v1791_v5  ;;  %v7520_v47 = vpop.permute.xlu1 %1256  ;;  %v1404_v2 = vsel %vm1351_vm9, %v1403_v62, %v6797_v24  ;;  %v1461_v57 = vsel %vm1353_vm10, %v1459_v13, %v1460_v44  ;;  %v1501_v23 = vrot.slane %v7220_v19, 7 }
 0x88f   :  { %8820 = vst [vmem:[#allocation74_spill] sm:$0xff] %v7505_v15  ;;  %2286 = vrot.lane.b32.xlu0 %v7505_v15, %s6468_s3  ;;  %v7513_v58 = vcombine.high %v7505_v15, %v8803_v0  ;;  %v2107_v49 = vcombine.low %v1736_v1, %v1792_v33  ;;  %v1691_v43 = vsel %vm1351_vm9, %v1690_v54, %v7159_v40 }
 0x890   :  { %v1293_v52 = vpop.permute.xlu0 %1292  ;;  %v1692_v38 = vsel %vm1353_vm10, %v1690_v54, %v1691_v43  ;;  %v1448_v1 = vsel %vm1355_vm14, %v1445_v36, %v1447_v28  ;;  %v1393_v30 = vsel %vm8764_vm15, %v1389_v12, %v1392_v63 }
 0x891   :  { %8821 = vst [vmem:[#allocation75_spill] sm:$0xff] %v7513_v58  ;;  %v1704_v41 = vrot.slane %v1293_v52, 7  ;;  %2294 = vrot.lane.b32.xlu1 %v7513_v58, %s6468_s3  ;;  %v7527_v60 = vrot.slane %v2107_v49, %v7203_v48  ;;  %v1557_v52 = vrot.slane %v7250_v51, 7  ;;  %v1449_v44 = vsel %vm8764_vm15, %v1445_v36, %v1448_v1 }
 0x892   :  { %v7554_v49 = vpop.permute.xlu1 %1264  ;;  %v1502_v1 = vsel %vm1351_vm9, %v1501_v23, %v6971_v4 }
 0x893   :  { %8822 = vst [vmem:[#allocation76_spill] sm:$0xff] %v7527_v60  ;;  %2318 = vrot.lane.b32.xlu0 %v7527_v60, %s6468_s3  ;;  %v7539_v27 = vcombine.high %v7527_v60, %v8803_v0  ;;  %v1705_v5 = vsel %vm1351_vm9, %v1704_v41, %v7167_v10  ;;  %v1693_v10 = vsel %vm1355_vm14, %v1690_v54, %v1692_v38 }
 0x894   :  { %v1317_v40 = vpop.permute.xlu0 %1316  ;;  %v1706_v28 = vsel %vm1353_vm10, %v1704_v41, %v1705_v5  ;;  %v1462_v38 = vsel %vm1355_vm14, %v1459_v13, %v1461_v57  ;;  %v1694_v19 = vsel %vm8764_vm15, %v1690_v54, %v1693_v10 }
 0x895   :  { %8823 = vst [vmem:[#allocation77_spill] sm:$0xff] %v7539_v27  ;;  %v1746_v33 = vrot.slane %v1317_v40, 7  ;;  %2326 = vrot.lane.b32.xlu1 %v7539_v27, %s6468_s3  ;;  %v1405_v27 = vsel %vm1353_vm10, %v1403_v62, %v1404_v2  ;;  %v1707_v12 = vsel %vm1355_vm14, %v1704_v41, %v1706_v28  ;;  %v1515_v2 = vrot.slane %v7233_v9, 7 }
 0x896   :  { %v1406_v54 = vsel %vm1355_vm14, %v1403_v62, %v1405_v27  ;;  %v7581_v57 = vpop.permute.xlu1 %1304  ;;  %v1708_v9 = vsel %vm8764_vm15, %v1704_v41, %v1707_v12  ;;  %v1503_v27 = vsel %vm1353_vm10, %v1501_v23, %v1502_v1  ;;  %v1431_v12 = vrot.slane %v7316_v56, 7 }
 0x897   :  { %v1747_v43 = vsel %vm1351_vm9, %v1746_v33, %v7175_v14  ;;  %v1571_v14 = vrot.slane %v7265_v46, 7 }
 0x898   :  { %v1748_v24 = vsel %vm1353_vm10, %v1746_v33, %v1747_v43  ;;  %v1325_v40 = vpop.permute.xlu0 %1324  ;;  %v1558_v43 = vsel %vm1351_vm9, %v1557_v52, %v6993_v18 }
 0x899   :  { %v1749_v51 = vsel %vm1355_vm14, %v1746_v33, %v1748_v24  ;;  %v1760_v60 = vrot.slane %v1325_v40, 7  ;;  %v1559_v28 = vsel %vm1353_vm10, %v1557_v52, %v1558_v43  ;;  %v1572_v4 = vsel %vm1351_vm9, %v1571_v14, %v7005_v29 }
 0x89a   :  { %v1750_v5 = vsel %vm8764_vm15, %v1746_v33, %v1749_v51  ;;  %v1463_v33 = vsel %vm8764_vm15, %v1459_v13, %v1462_v38  ;;  %v1417_v13 = vrot.slane %v7289_v11, 7  ;;  %v1407_v29 = vsel %vm8764_vm15, %v1403_v62, %v1406_v54 }
 0x89b   :  { %v1761_v36 = vsel %vm1351_vm9, %v1760_v60, %v7184_v31  ;;  %v1891_v63 = vcombine.low %v1694_v19, %v1750_v5  ;;  %v2044_v31 = vcombine.low %v1393_v30, %v1449_v44  ;;  %v1516_v44 = vsel %vm1351_vm9, %v1515_v2, %v6981_v8  ;;  %v8827_v5 = vld [vmem:[#allocation34_spill] sm:$0xff] }
 0x89c   :  { %v1762_v46 = vsel %vm1353_vm10, %v1760_v60, %v1761_v36  ;;  %v1560_v41 = vsel %vm1355_vm14, %v1557_v52, %v1559_v28  ;;  %v1504_v38 = vsel %vm1355_vm14, %v1501_v23, %v1503_v27  ;;  %v2116_v19 = vcombine.low %v1407_v29, %v1463_v33  ;;  %v7621_v36 = vpop.permute.xlu1 %1312 }
 0x89d   :  { %v1763_v18 = vsel %vm1355_vm14, %v1760_v60, %v1762_v46  ;;  %v7585_v10 = vrot.slane %v1891_v63, %v7203_v48  ;;  %v7611_v51 = vrot.slane %v2044_v31, %v7203_v48  ;;  %v1362_v8 = vsel %vm1351_vm9, %v7550_v39, %v6838_v45  ;;  %v8829_v46 = vld [vmem:[#allocation35_spill] sm:$0xff] }
 0x89e   :  { %v1764_v24 = vsel %vm8764_vm15, %v1760_v60, %v1763_v18  ;;  %v1573_v60 = vsel %vm1353_vm10, %v1571_v14, %v1572_v4  ;;  %v1517_v62 = vsel %vm1353_vm10, %v1515_v2, %v1516_v44  ;;  %v1418_v43 = vsel %vm1351_vm9, %v1417_v13, %v8827_v5  ;;  %v8831_v44 = vld [vmem:[#allocation33_spill] sm:$0xff] }
 0x89f   :  { %8824 = vst [vmem:[#allocation78_spill] sm:$0xff] %v7585_v10  ;;  %2222 = vrot.lane.b32.xlu0 %v7585_v10, %s6468_s3  ;;  %v7598_v40 = vcombine.high %v7585_v10, %v8803_v0  ;;  %v1963_v30 = vcombine.low %v1708_v9, %v1764_v24  ;;  %v1561_v1 = vsel %vm8764_vm15, %v1557_v52, %v1560_v41  ;;  %v1375_v54 = vrot.slane %v8829_v46, 7  ;;  %v8830_v9 = vld [vmem:[#allocation36_spill] sm:$0xff] }
 0x8a0   :  { %v1574_v45 = vsel %vm1355_vm14, %v1571_v14, %v1573_v60  ;;  %v7636_v56 = vcombine.high %v7611_v51, %v8803_v0  ;;  %v1363_v33 = vsel %vm1353_vm10, %v7550_v39, %v1362_v8  ;;  %v1505_v18 = vsel %vm8764_vm15, %v1501_v23, %v1504_v38 }
 0x8a1   :  { %8825 = vst [vmem:[#allocation79_spill] sm:$0xff] %v7598_v40  ;;  %2230 = vrot.lane.b32.xlu1 %v7598_v40, %s6468_s3  ;;  %v7608_v11 = vrot.slane %v1963_v30, %v7203_v48  ;;  %v1518_v31 = vsel %vm1355_vm14, %v1515_v2, %v1517_v62  ;;  %v1419_v52 = vsel %vm1353_vm10, %v1417_v13, %v1418_v43  ;;  %v1529_v28 = vrot.slane %v7371_v6, 7 }
 0x8a2   :  { %v1575_v4 = vsel %vm8764_vm15, %v1571_v14, %v1574_v45  ;;  %v1432_v24 = vsel %vm1351_vm9, %v1431_v12, %v8830_v9  ;;  %v7650_v27 = vrot.slane %v2116_v19, %v7203_v48  ;;  %v2053_v30 = vcombine.low %v1505_v18, %v1561_v1  ;;  %v7657_v14 = vpop.permute.xlu1 %1336  ;;  %v8832_v19 = vld [vmem:[#allocation39_spill] sm:$0xff]  ;;  %v8833_v45 = vld [vmem:[#allocation37_spill] sm:$0xff] }
 0x8a3   :  { %8826 = vst [vmem:[#allocation80_spill] sm:$0xff] %v7608_v11  ;;  %2254 = vrot.lane.b32.xlu0 %v7608_v11, %s6468_s3  ;;  %v7627_v63 = vcombine.high %v7608_v11, %v8803_v0  ;;  %v1473_v23 = vrot.slane %v7339_v34, 7  ;;  %v1376_v29 = vsel %vm1351_vm9, %v1375_v54, %v8831_v44  ;;  %v1519_v41 = vsel %vm8764_vm15, %v1515_v2, %v1518_v31 }
 0x8a4   :  { %v1420_v6 = vsel %vm1355_vm14, %v1417_v13, %v1419_v52  ;;  %v1364_v60 = vsel %vm1355_vm14, %v7550_v39, %v1363_v33  ;;  %v1433_v38 = vsel %vm1353_vm10, %v1431_v12, %v1432_v24  ;;  %v1530_v34 = vsel %vm1351_vm9, %v1529_v28, %v8832_v19  ;;  %v8834_v52 = vld [vmem:[#allocation40_spill] sm:$0xff] }
 0x8a5   :  { %8828 = vst [vmem:[#allocation34_spill] sm:$0xff] %v7627_v63  ;;  %2262 = vrot.lane.b32.xlu1 %v7627_v63, %s6468_s3  ;;  %v1543_v8 = vrot.slane %v7391_v35, 7  ;;  %v2125_v62 = vcombine.low %v1519_v41, %v1575_v4  ;;  %v7671_v2 = vcombine.high %v7650_v27, %v8803_v0  ;;  %v7674_v5 = vrot.slane %v2053_v30, %v7203_v48 }
 0x8a6   :  { %v1377_v43 = vsel %vm1353_vm10, %v1375_v54, %v1376_v29  ;;  %v1421_v1 = vsel %vm8764_vm15, %v1417_v13, %v1420_v6  ;;  %v1474_v46 = vsel %vm1351_vm9, %v1473_v23, %v8833_v45  ;;  %v1487_v35 = vrot.slane %v7353_v22, 7  ;;  %v7695_v30 = vpop.permute.xlu1 %1344 }
 0x8a7   :  { %2296 = vrot.lane.b32.xlu0 %v7611_v51, %s6468_s3  ;;  %v1434_v33 = vsel %vm1355_vm14, %v1431_v12, %v1433_v38  ;;  %v1531_v18 = vsel %vm1353_vm10, %v1529_v28, %v1530_v34  ;;  %v1365_v31 = vsel %vm8764_vm15, %v7550_v39, %v1364_v60  ;;  %v1544_v4 = vsel %vm1351_vm9, %v1543_v8, %v8834_v52 }
 0x8a8   :  { %v1669_v13 = vrot.slane %v7443_v42, 7  ;;  %v7691_v9 = vrot.slane %v2125_v62, %v7203_v48  ;;  %v1378_v22 = vsel %vm1355_vm14, %v1375_v54, %v1377_v43  ;;  %v1475_v24 = vsel %vm1353_vm10, %v1473_v23, %v1474_v46  ;;  %v8835_v42 = vld [vmem:[#allocation38_spill] sm:$0xff]  ;;  %v8836_v62 = vld [vmem:[#allocation43_spill] sm:$0xff] }
 0x8a9   :  { %2304 = vrot.lane.b32.xlu1 %v7636_v56, %s6468_s3  ;;  %v7701_v39 = vcombine.high %v7674_v5, %v8803_v0  ;;  %v1900_v44 = vcombine.low %v1365_v31, %v1421_v1  ;;  %v1435_v29 = vsel %vm8764_vm15, %v1431_v12, %v1434_v33  ;;  %v1488_v41 = vsel %vm1351_vm9, %v1487_v35, %v8835_v42 }
 0x8aa   :  { %v1532_v6 = vsel %vm1355_vm14, %v1529_v28, %v1531_v18  ;;  %v1613_v60 = vrot.slane %v7405_v61, 7  ;;  %v1545_v38 = vsel %vm1353_vm10, %v1543_v8, %v1544_v4  ;;  %v1379_v19 = vsel %vm8764_vm15, %v1375_v54, %v1378_v22  ;;  %v8837_v18 = vld [vmem:[#allocation41_spill] sm:$0xff]  ;;  %v7733_v22 = vpop.permute.xlu1 %1288 }
 0x8ab   :  { %2328 = vrot.lane.b32.xlu0 %v7650_v27, %s6468_s3  ;;  %v1476_v34 = vsel %vm1355_vm14, %v1473_v23, %v1475_v24  ;;  %v1670_v43 = vsel %vm1351_vm9, %v1669_v13, %v8836_v62  ;;  %v1683_v12 = vrot.slane %v7458_v32, 7  ;;  %v7718_v1 = vcombine.high %v7691_v9, %v8803_v0  ;;  %v8838_v24 = vld [vmem:[#allocation44_spill] sm:$0xff] }
 0x8ac   :  { %v1489_v61 = vsel %vm1353_vm10, %v1487_v35, %v1488_v41  ;;  %v1533_v45 = vsel %vm8764_vm15, %v1529_v28, %v1532_v6  ;;  %v7725_v54 = vrot.slane %v1900_v44, %v7203_v48  ;;  %v1972_v46 = vcombine.low %v1379_v19, %v1435_v29 }
 0x8ad   :  { %2336 = vrot.lane.b32.xlu1 %v7671_v2, %s6468_s3  ;;  %v1546_v33 = vsel %vm1355_vm14, %v1543_v8, %v1545_v38  ;;  %v1614_v32 = vsel %vm1351_vm9, %v1613_v60, %v8837_v18  ;;  %v1627_v31 = vrot.slane %v7426_v17, 7  ;;  %v1477_v52 = vsel %vm8764_vm15, %v1473_v23, %v1476_v34  ;;  %v8839_v38 = vld [vmem:[#allocation42_spill] sm:$0xff] }
 0x8ae   :  { %v1671_v4 = vsel %vm1353_vm10, %v1669_v13, %v1670_v43  ;;  %v1490_v28 = vsel %vm1355_vm14, %v1487_v35, %v1489_v61  ;;  %v1684_v44 = vsel %vm1351_vm9, %v1683_v12, %v8838_v24  ;;  %v1641_v29 = vrot.slane %v7520_v47, 7  ;;  %v8840_v61 = vld [vmem:[#allocation47_spill] sm:$0xff] }
 0x8af   :  { %2298 = vrot.lane.b32.xlu0 %v7674_v5, %s6468_s3  ;;  %v1909_v42 = vcombine.low %v1477_v52, %v1533_v45  ;;  %v1547_v41 = vsel %vm8764_vm15, %v1543_v8, %v1546_v33  ;;  %v1615_v17 = vsel %vm1353_vm10, %v1613_v60, %v1614_v32  ;;  %v7747_v23 = vcombine.high %v7725_v54, %v8803_v0  ;;  %v7769_v32 = vpop.permute.xlu1 %1296 }
 0x8b0   :  { %v7750_v6 = vrot.slane %v1972_v46, %v7203_v48  ;;  %v1628_v19 = vsel %vm1351_vm9, %v1627_v31, %v8839_v38  ;;  %v1672_v47 = vsel %vm1355_vm14, %v1669_v13, %v1671_v4  ;;  %v1585_v34 = vrot.slane %v7481_v21, 7 }
 0x8b1   :  { %2306 = vrot.lane.b32.xlu1 %v7701_v39, %s6468_s3  ;;  %v1491_v8 = vsel %vm8764_vm15, %v1487_v35, %v1490_v28  ;;  %v1685_v62 = vsel %vm1353_vm10, %v1683_v12, %v1684_v44  ;;  %v1616_v43 = vsel %vm1355_vm14, %v1613_v60, %v1615_v17  ;;  %v1642_v45 = vsel %vm1351_vm9, %v1641_v29, %v8840_v61  ;;  %v8841_v28 = vld [vmem:[#allocation45_spill] sm:$0xff]  ;;  %v8843_v61 = vld [vmem:[#allocation46_spill] sm:$0xff] }
 0x8b2   :  { %v7764_v46 = vrot.slane %v1909_v42, %v7203_v48  ;;  %v1981_v33 = vcombine.low %v1491_v8, %v1547_v41  ;;  %v1629_v18 = vsel %vm1353_vm10, %v1627_v31, %v1628_v19  ;;  %v1673_v21 = vsel %vm8764_vm15, %v1669_v13, %v1672_v47 }
 0x8b3   :  { %2330 = vrot.lane.b32.xlu0 %v7691_v9, %s6468_s3  ;;  %v1655_v35 = vrot.slane %v7554_v49, 7  ;;  %v7775_v52 = vcombine.high %v7750_v6, %v8803_v0  ;;  %v1686_v4 = vsel %vm1355_vm14, %v1683_v12, %v1685_v62  ;;  %v1586_v24 = vsel %vm1351_vm9, %v1585_v34, %v8841_v28  ;;  %v8844_v28 = vld [vmem:[#allocation51_spill] sm:$0xff] }
 0x8b4   :  { %v1617_v44 = vsel %vm8764_vm15, %v1613_v60, %v1616_v43  ;;  %v1599_v13 = vrot.slane %v7495_v59, 7  ;;  %v1643_v49 = vsel %vm1353_vm10, %v1641_v29, %v1642_v45  ;;  %v1630_v42 = vsel %vm1355_vm14, %v1627_v31, %v1629_v18  ;;  %v8842_v59 = vld [vmem:[#allocation48_spill] sm:$0xff] }
 0x8b5   :  { %2338 = vrot.lane.b32.xlu1 %v7718_v1, %s6468_s3  ;;  %v7788_v41 = vcombine.high %v7764_v46, %v8803_v0  ;;  %v7791_v17 = vrot.slane %v1981_v33, %v7203_v48  ;;  %v2062_v38 = vcombine.low %v1617_v44, %v1673_v21  ;;  %v1687_v19 = vsel %vm8764_vm15, %v1683_v12, %v1686_v4  ;;  %v1321_v12 = vpop.permute.xlu1 %1320 }
 0x8b6   :  { %v1587_v60 = vsel %vm1353_vm10, %v1585_v34, %v1586_v24  ;;  %v1656_v47 = vsel %vm1351_vm9, %v1655_v35, %v8842_v59  ;;  %v1781_v8 = vrot.slane %v7657_v14, 7  ;;  %v1644_v62 = vsel %vm1355_vm14, %v1641_v29, %v1643_v49 }
 0x8b7   :  { %2232 = vrot.lane.b32.xlu0 %v7725_v54, %s6468_s3  ;;  %v1631_v43 = vsel %vm8764_vm15, %v1627_v31, %v1630_v42  ;;  %v1600_v45 = vsel %vm1351_vm9, %v1599_v13, %v8843_v61  ;;  %v1725_v33 = vrot.slane %v7581_v57, 7  ;;  %v1588_v18 = vsel %vm1355_vm14, %v1585_v34, %v1587_v60 }
 0x8b8   :  { %v1657_v14 = vsel %vm1353_vm10, %v1655_v35, %v1656_v47  ;;  %v7811_v21 = vcombine.high %v7791_v17, %v8803_v0  ;;  %v2134_v4 = vcombine.low %v1631_v43, %v1687_v19  ;;  %v1645_v31 = vsel %vm8764_vm15, %v1641_v29, %v1644_v62  ;;  %v8845_v19 = vld [vmem:[#allocation49_spill] sm:$0xff]  ;;  %v8846_v43 = vld [vmem:[#allocation52_spill] sm:$0xff] }
 0x8b9   :  { %2240 = vrot.lane.b32.xlu1 %v7747_v23, %s6468_s3  ;;  %v1782_v24 = vsel %vm1351_vm9, %v1781_v8, %v8844_v28  ;;  %v1795_v57 = vrot.slane %v7695_v30, 7  ;;  %v7820_v44 = vrot.slane %v2062_v38, %v7203_v48  ;;  %v1601_v49 = vsel %vm1353_vm10, %v1599_v13, %v1600_v45  ;;  %v1329_v45 = vpop.permute.xlu1 %1328 }
 0x8ba   :  { %v1589_v42 = vsel %vm8764_vm15, %v1585_v34, %v1588_v18  ;;  %v1658_v60 = vsel %vm1355_vm14, %v1655_v35, %v1657_v14  ;;  %v1726_v29 = vsel %vm1351_vm9, %v1725_v33, %v8845_v19  ;;  %v1739_v59 = vrot.slane %v7621_v36, 7 }
 0x8bb   :  { %2264 = vrot.lane.b32.xlu0 %v7750_v6, %s6468_s3  ;;  %v1783_v30 = vsel %vm1353_vm10, %v1781_v8, %v1782_v24  ;;  %v7832_v47 = vrot.slane %v2134_v4, %v7203_v48  ;;  %v1918_v38 = vcombine.low %v1589_v42, %v1645_v31  ;;  %v1602_v62 = vsel %vm1355_vm14, %v1599_v13, %v1601_v49  ;;  %v8847_v4 = vld [vmem:[#allocation50_spill] sm:$0xff] }
 0x8bc   :  { %v1796_v34 = vsel %vm1351_vm9, %v1795_v57, %v8846_v43  ;;  %v1753_v61 = vrot.slane %v1321_v12, 7  ;;  %v7841_v36 = vcombine.high %v7820_v44, %v8803_v0  ;;  %v1659_v18 = vsel %vm8764_vm15, %v1655_v35, %v1658_v60  ;;  %v7849_v12 = vpop.permute.xlu0 %2280 }
 0x8bd   :  { %2272 = vrot.lane.b32.xlu1 %v7775_v52, %s6468_s3  ;;  %v1727_v14 = vsel %vm1353_vm10, %v1725_v33, %v1726_v29  ;;  %v1740_v31 = vsel %vm1351_vm9, %v1739_v59, %v8847_v4  ;;  %v1784_v28 = vsel %vm1355_vm14, %v1781_v8, %v1783_v30  ;;  %v1697_v24 = vrot.slane %v7733_v22, 7  ;;  %v8849_v29 = vld [vmem:[#allocation55_spill] sm:$0xff]  ;;  %v7865_v43 = vpop.permute.xlu1 %2288 }
 0x8be   :  { %v1603_v49 = vsel %vm8764_vm15, %v1599_v13, %v1602_v62  ;;  %v1797_v42 = vsel %vm1353_vm10, %v1795_v57, %v1796_v34  ;;  %v7857_v35 = vcombine.high %v7832_v47, %v8803_v0  ;;  %v7860_v60 = vrot.slane %v1918_v38, %v7203_v48  ;;  %v8850_v38 = vld [vmem:[#allocation53_spill] sm:$0xff] }
 0x8bf   :  { %2234 = vrot.lane.b32.xlu0 %v7764_v46, %s6468_s3  ;;  %v1728_v19 = vsel %vm1355_vm14, %v1725_v33, %v1727_v14  ;;  %v1754_v22 = vsel %vm1351_vm9, %v1753_v61, %v8849_v29  ;;  %v1767_v30 = vrot.slane %v1329_v45, 7  ;;  %v1990_v13 = vcombine.low %v1603_v49, %v1659_v18 }
 0x8c0   :  { %8848 = vst [vmem:[#allocation35_spill] sm:$0xff] %v7860_v60  ;;  %v1741_v62 = vsel %vm1353_vm10, %v1739_v59, %v1740_v31  ;;  %v1785_v34 = vsel %vm8764_vm15, %v1781_v8, %v1784_v28  ;;  %v1798_v4 = vsel %vm1355_vm14, %v1795_v57, %v1797_v42  ;;  %v1698_v11 = vsel %vm1351_vm9, %v1697_v24, %v8850_v38  ;;  %v8852_v31 = vld [vmem:[#allocation56_spill] sm:$0xff]  ;;  %v7886_v49 = vpop.permute.xlu0 %2312 }
 0x8c1   :  { %2242 = vrot.lane.b32.xlu1 %v7788_v41, %s6468_s3  ;;  %v1711_v14 = vrot.slane %v7769_v32, 7  ;;  %v1729_v45 = vsel %vm8764_vm15, %v1725_v33, %v1728_v19  ;;  %v1755_v29 = vsel %vm1353_vm10, %v1753_v61, %v1754_v22  ;;  %v7881_v18 = vcombine.high %v7860_v60, %v8803_v0  ;;  %v8854_v22 = vld [vmem:[#allocation54_spill] sm:$0xff]  ;;  %v7898_v63 = vpop.permute.xlu1 %2320 }
 0x8c2   :  { %v1742_v8 = vsel %vm1355_vm14, %v1739_v59, %v1741_v62  ;;  %v1768_v28 = vsel %vm1351_vm9, %v1767_v30, %v8852_v31  ;;  %v7891_v32 = vrot.slane %v1990_v13, %v7203_v48  ;;  %v2071_v33 = vcombine.low %v1729_v45, %v1785_v34 }
 0x8c3   :  { %2266 = vrot.lane.b32.xlu0 %v7791_v17, %s6468_s3  ;;  %8851 = vst [vmem:[#allocation36_spill] sm:$0xff] %v7881_v18  ;;  %v1799_v42 = vsel %vm8764_vm15, %v1795_v57, %v1798_v4  ;;  %v1699_v19 = vsel %vm1353_vm10, %v1697_v24, %v1698_v11  ;;  %v1712_v38 = vsel %vm1351_vm9, %v1711_v14, %v8854_v22 }
 0x8c4   :  { %8853 = vst [vmem:[#allocation33_spill] sm:$0xff] %v7891_v32  ;;  %v1756_v62 = vsel %vm1355_vm14, %v1753_v61, %v1755_v29  ;;  %v1743_v31 = vsel %vm8764_vm15, %v1739_v59, %v1742_v8  ;;  %v1769_v13 = vsel %vm1353_vm10, %v1767_v30, %v1768_v28  ;;  %v1700_v34 = vsel %vm1355_vm14, %v1697_v24, %v1699_v19  ;;  %v7905_v45 = vpop.permute.xlu0 %2282 }
 0x8c5   :  { %2274 = vrot.lane.b32.xlu1 %v7811_v21, %s6468_s3  ;;  %v7911_v11 = vcombine.high %v7891_v32, %v8803_v0  ;;  %v7914_v57 = vrot.slane %v2071_v33, %v7203_v48  ;;  %v2143_v4 = vcombine.low %v1743_v31, %v1799_v42  ;;  %v1713_v29 = vsel %vm1353_vm10, %v1711_v14, %v1712_v38  ;;  %v7919_v28 = vpop.permute.xlu1 %2290 }
 0x8c6   :  { %v1757_v59 = vsel %vm8764_vm15, %v1753_v61, %v1756_v62  ;;  %v1770_v8 = vsel %vm1355_vm14, %v1767_v30, %v1769_v13  ;;  %v1701_v19 = vsel %vm8764_vm15, %v1697_v24, %v1700_v34  ;;  %v1714_v22 = vsel %vm1355_vm14, %v1711_v14, %v1713_v29 }
 0x8c7   :  { %2300 = vrot.lane.b32.xlu0 %v7820_v44, %s6468_s3  ;;  %8855 = vst [vmem:[#allocation39_spill] sm:$0xff] %v7911_v11  ;;  %8856 = vst [vmem:[#allocation37_spill] sm:$0xff] %v7914_v57  ;;  %v7929_v33 = vcombine.high %v7914_v57, %v8803_v0  ;;  %v7932_v61 = vrot.slane %v2143_v4, %v7203_v48  ;;  %v1927_v42 = vcombine.low %v1701_v19, %v1757_v59 }
 0x8c8   :  { %v1771_v38 = vsel %vm8764_vm15, %v1767_v30, %v1770_v8  ;;  %v7935_v62 = vpop.permute.xlu0 %2314  ;;  %v1715_v24 = vsel %vm8764_vm15, %v1711_v14, %v1714_v22 }
 0x8c9   :  { %2308 = vrot.lane.b32.xlu1 %v7841_v36, %s6468_s3  ;;  %8857 = vst [vmem:[#allocation40_spill] sm:$0xff] %v7929_v33  ;;  %8858 = vst [vmem:[#allocation38_spill] sm:$0xff] %v7932_v61  ;;  %v7940_v31 = vpop.permute.xlu1 %2322  ;;  %v7946_v13 = vcombine.high %v7932_v61, %v8803_v0  ;;  %v7949_v34 = vrot.slane %v1927_v42, %v7203_v48  ;;  %v1999_v30 = vcombine.low %v1715_v24, %v1771_v38 }
 0x8cb   :  { %2332 = vrot.lane.b32.xlu0 %v7832_v47, %s6468_s3  ;;  %8859 = vst [vmem:[#allocation43_spill] sm:$0xff] %v7946_v13  ;;  %8860 = vst [vmem:[#allocation41_spill] sm:$0xff] %v7949_v34  ;;  %v7959_v14 = vcombine.high %v7949_v34, %v8803_v0  ;;  %v7962_v29 = vrot.slane %v1999_v30, %v7203_v48 }
 0x8cc   :  { %v7953_v4 = vpop.permute.xlu0 %2216 }
 0x8cd   :  { %2340 = vrot.lane.b32.xlu1 %v7857_v35, %s6468_s3  ;;  %8861 = vst [vmem:[#allocation44_spill] sm:$0xff] %v7959_v14  ;;  %8862 = vst [vmem:[#allocation42_spill] sm:$0xff] %v7962_v29  ;;  %v7964_v59 = vpop.permute.xlu1 %2224  ;;  %v7972_v8 = vcombine.high %v7962_v29, %v8803_v0 }
 0x8cf   :  { %2236 = vrot.lane.b32.xlu0 %v7860_v60, %s6468_s3  ;;  %8863 = vst [vmem:[#allocation47_spill] sm:$0xff] %v7972_v8 }
 0x8d0   :  { %v7974_v19 = vpop.permute.xlu0 %2248 }
 0x8d1   :  { %2244 = vrot.lane.b32.xlu1 %v7881_v18, %s6468_s3  ;;  %v7978_v22 = vpop.permute.xlu1 %2256 }
 0x8d3   :  { %2268 = vrot.lane.b32.xlu0 %v7891_v32, %s6468_s3 }
 0x8d4   :  { %v7980_v42 = vpop.permute.xlu0 %2218 }
 0x8d5   :  { %2276 = vrot.lane.b32.xlu1 %v7911_v11, %s6468_s3  ;;  %v7982_v38 = vpop.permute.xlu1 %2226 }
 0x8d7   :  { %2302 = vrot.lane.b32.xlu0 %v7914_v57, %s6468_s3 }
 0x8d8   :  { %v7984_v24 = vpop.permute.xlu0 %2250 }
 0x8d9   :  { %2310 = vrot.lane.b32.xlu1 %v7929_v33, %s6468_s3  ;;  %v7986_v30 = vpop.permute.xlu1 %2258 }
 0x8db   :  { %2334 = vrot.lane.b32.xlu0 %v7932_v61, %s6468_s3 }
 0x8dd   :  { %2342 = vrot.lane.b32.xlu1 %v7946_v13, %s6468_s3 }
 0x8df   :  { %2238 = vrot.lane.b32.xlu0 %v7949_v34, %s6468_s3 }
 0x8e1   :  { %2246 = vrot.lane.b32.xlu1 %v7959_v14, %s6468_s3  ;;  %v7988_v14 = vpop.permute.xlu0 %2284 }
 0x8e3   :  { %2270 = vrot.lane.b32.xlu0 %v7962_v29, %s6468_s3  ;;  %v7990_v34 = vpop.permute.xlu1 %2292 }
 0x8e5   :  { %2278 = vrot.lane.b32.xlu1 %v7972_v8, %s6468_s3  ;;  %v7992_v0 = vpop.permute.xlu0 %2316 }
 0x8e7   :  { %v7994_v29 = vpop.permute.xlu1 %2324 }
 0x8f1   :  { %v7996_v10 = vpop.permute.xlu0 %2220 }
 0x8f2   :  { %8864 = vst [vmem:[#allocation45_spill] sm:$0xff] %v7996_v10 }
 0x8f3   :  { %v7998_v8 = vpop.permute.xlu1 %2228 }
 0x8f4   :  { %8865 = vst [vmem:[#allocation48_spill] sm:$0xff] %v7998_v8 }
 0x8f5   :  { %v8000_v40 = vpop.permute.xlu0 %2252 }
 0x8f6   :  { %8866 = vst [vmem:[#allocation46_spill] sm:$0xff] %v8000_v40  ;;  %v8876_v40 = vld [vmem:[#allocation58_spill] sm:$0xff] }
 0x8f7   :  { %v8002_v13 = vpop.permute.xlu1 %2260  ;;  %v2444_v60 = vmax.f32 %v8876_v40, %v7865_v43 }
 0x8f8   :  { %8867 = vst [vmem:[#allocation51_spill] sm:$0xff] %v8002_v13 }
 0x901   :  { %v8004_v61 = vpop.permute.xlu0 %2286 }
 0x902   :  { %8868 = vst [vmem:[#allocation49_spill] sm:$0xff] %v8004_v61  ;;  %v8877_v61 = vld [vmem:[#allocation57_spill] sm:$0xff] }
 0x903   :  { %v8006_v33 = vpop.permute.xlu1 %2294  ;;  %v2440_v10 = vmax.f32 %v8877_v61, %v7849_v12 }
 0x904   :  { %8869 = vst [vmem:[#allocation52_spill] sm:$0xff] %v8006_v33  ;;  %v8878_v33 = vld [vmem:[#allocation60_spill] sm:$0xff] }
 0x905   :  { %v8008_v57 = vpop.permute.xlu0 %2318 }
 0x906   :  { %8870 = vst [vmem:[#allocation50_spill] sm:$0xff] %v8008_v57  ;;  %v2460_v57 = vmax.f32 %v8878_v33, %v7898_v63  ;;  %v2412_v33 = vmax.f32 %v7320_v26, %v7964_v59 }
 0x907   :  { %v8010_v11 = vpop.permute.xlu1 %2326 }
 0x908   :  { %8871 = vst [vmem:[#allocation55_spill] sm:$0xff] %v8010_v11  ;;  %v2508_v11 = vcombine.low %v2440_v10, %v2444_v60  ;;  %v2441_v60 = vmax.f32 %v7272_v3, %v7905_v45 }
 0x90a   :  { %v2515_v43 = vrot.slane %v2508_v11, %v7203_v48 }
 0x911   :  { %v8012_v32 = vpop.permute.xlu0 %2222 }
 0x912   :  { %8872 = vst [vmem:[#allocation53_spill] sm:$0xff] %v8012_v32 }
 0x913   :  { %v8014_v15 = vpop.permute.xlu1 %2230 }
 0x914   :  { %8873 = vst [vmem:[#allocation56_spill] sm:$0xff] %v8014_v15 }
 0x915   :  { %v8016_v58 = vpop.permute.xlu0 %2254 }
 0x916   :  { %8874 = vst [vmem:[#allocation54_spill] sm:$0xff] %v8016_v58  ;;  %v8879_v58 = vld [vmem:[#allocation59_spill] sm:$0xff] }
 0x917   :  { %v8018_v18 = vpop.permute.xlu1 %2262  ;;  %v2456_v13 = vmax.f32 %v8879_v58, %v7886_v49 }
 0x918   :  { %8875 = vst [vmem:[#allocation81_spill] sm:$0xff] %v8018_v18 }
 0x919   :  { %v2297_v20 = vpop.permute.xlu0 %2296  ;;  %v2526_v8 = vcombine.low %v2456_v13, %v2460_v57 }
 0x91a   :  { %v2448_v32 = vmax.f32 %v7611_v51, %v2297_v20  ;;  %v2445_v20 = vmax.f32 %v7284_v37, %v7919_v28  ;;  %v2457_v37 = vmax.f32 %v7296_v53, %v7935_v62  ;;  %v8881_v53 = vld [vmem:[#allocation61_spill] sm:$0xff] }
 0x91b   :  { %v2305_v55 = vpop.permute.xlu1 %2304  ;;  %v2533_v58 = vrot.slane %v2526_v8, %v7203_v48  ;;  %v2408_v62 = vmax.f32 %v8881_v53, %v7953_v4 }
 0x91c   :  { %v2452_v15 = vmax.f32 %v7636_v56, %v2305_v55 }
 0x91d   :  { %v2329_v18 = vpop.permute.xlu0 %2328 }
 0x91e   :  { %v2517_v16 = vcombine.low %v2448_v32, %v2452_v15  ;;  %v2464_v61 = vmax.f32 %v7650_v27, %v2329_v18  ;;  %v2461_v15 = vmax.f32 %v7306_v25, %v7940_v31  ;;  %v2580_v32 = vcombine.low %v2441_v60, %v2445_v20  ;;  %v8880_v31 = vld [vmem:[#allocation32_spill] sm:$0xff] }
 0x91f   :  { %v2337_v40 = vpop.permute.xlu1 %2336 }
 0x920   :  { %v2524_v12 = vrot.slane %v2517_v16, %v7203_v48  ;;  %v2468_v63 = vmax.f32 %v7671_v2, %v2337_v40  ;;  %v2598_v25 = vcombine.low %v2457_v37, %v2461_v15  ;;  %v8883_v15 = vld [vmem:[#allocation62_spill] sm:$0xff] }
 0x921   :  { %v2299_v10 = vpop.permute.xlu0 %2298 }
 0x922   :  { %v2785_v55 = vcombine.low %v2515_v43, %v2524_v12  ;;  %v2535_v51 = vcombine.low %v2464_v61, %v2468_v63  ;;  %v2449_v27 = vmax.f32 %v7674_v5, %v2299_v10  ;;  %v5643_v18 = vcombine.high %v2515_v43, %v2524_v12  ;;  %v8882_v12 = vld [vmem:[#allocation63_spill] sm:$0xff] }
 0x923   :  { %v2307_v56 = vpop.permute.xlu1 %2306  ;;  %v2428_v61 = vmax.f32 %v8882_v12, %v7978_v22  ;;  %v2605_v20 = vrot.slane %v2598_v25, %v7203_v48  ;;  %v2413_v25 = vmax.f32 %v7369_v50, %v7982_v38  ;;  %v8886_v38 = vld [vmem:[#allocation65_spill] sm:$0xff] }
 0x924   :  { %v2542_v16 = vrot.slane %v2535_v51, %v7203_v48  ;;  %v2453_v2 = vmax.f32 %v7701_v39, %v2307_v56  ;;  %v2837_v43 = vrot.slane %v5643_v18, %v8880_v31  ;;  %v8059_v26 = vrot.slane %v2785_v55, %v8880_v31 }
 0x925   :  { %v2331_v49 = vpop.permute.xlu0 %2330  ;;  %v2424_v56 = vmax.f32 %v8883_v15, %v7974_v19 }
 0x926   :  { %v2786_v11 = vcombine.low %v2533_v58, %v2542_v16  ;;  %v5644_v57 = vcombine.high %v2533_v58, %v2542_v16  ;;  %v2589_v28 = vcombine.low %v2449_v27, %v2453_v2  ;;  %v2465_v45 = vmax.f32 %v7691_v9, %v2331_v49 }
 0x927   :  { %v2339_v3 = vpop.permute.xlu1 %2338  ;;  %v2587_v9 = vrot.slane %v2580_v32, %v7203_v48  ;;  %v2490_v37 = vcombine.low %v2424_v56, %v2428_v61 }
 0x928   :  { %v2469_v5 = vmax.f32 %v7718_v1, %v2339_v3  ;;  %v2844_v39 = vrot.slane %v5644_v57, %v8880_v31  ;;  %v8052_v13 = vrot.slane %v2786_v11, %v8880_v31  ;;  %v2596_v8 = vrot.slane %v2589_v28, %v7203_v48 }
 0x929   :  { %v2233_v40 = vpop.permute.xlu0 %2232  ;;  %v2472_v1 = vcombine.low %v2408_v62, %v2412_v33  ;;  %v8885_v62 = vld [vmem:[#allocation64_spill] sm:$0xff] }
 0x92a   :  { %v2607_v59 = vcombine.low %v2465_v45, %v2469_v5  ;;  %v2845_v10 = vcombine.low %v2837_v43, %v2844_v39  ;;  %v2801_v4 = vcombine.low %v8059_v26, %v8052_v13  ;;  %v2416_v58 = vmax.f32 %v7725_v54, %v2233_v40  ;;  %v8884_v5 = vld [vmem:[#allocation66_spill] sm:$0xff] }
 0x92b   :  { %v2241_v63 = vpop.permute.xlu1 %2240  ;;  %v2877_v60 = vcombine.low %v2587_v9, %v2596_v8  ;;  %v2479_v2 = vrot.slane %v2472_v1, %v7203_v48  ;;  %v5647_v19 = vcombine.high %v2587_v9, %v2596_v8  ;;  %v2497_v45 = vrot.slane %v2490_v37, %v7203_v48 }
 0x92c   :  { %v2614_v51 = vrot.slane %v2607_v59, %v7203_v48  ;;  %v2420_v55 = vmax.f32 %v7747_v23, %v2241_v63  ;;  %2848 = vrot.lane.b32.xlu0 %v2845_v10, %s6450_s0  ;;  %v2429_v39 = vmax.f32 %v8884_v5, %v7986_v30  ;;  %v2409_v8 = vmax.f32 %v8885_v62, %v7980_v42  ;;  %v8890_v62 = vld [vmem:[#allocation48_spill] sm:$0xff] }
 0x92d   :  { %v2265_v22 = vpop.permute.xlu0 %2264  ;;  %v2885_v28 = vrot.slane %v2877_v60, %v8880_v31  ;;  %v2425_v9 = vmax.f32 %v8886_v38, %v7984_v24  ;;  %v2933_v1 = vrot.slane %v5647_v19, %v8880_v31  ;;  %v8892_v38 = vld [vmem:[#allocation51_spill] sm:$0xff] }
 0x92e   :  { %v2878_v16 = vcombine.low %v2605_v20, %v2614_v51  ;;  %v2481_v27 = vcombine.low %v2416_v58, %v2420_v55  ;;  %v5648_v18 = vcombine.high %v2605_v20, %v2614_v51  ;;  %v2432_v54 = vmax.f32 %v7750_v6, %v2265_v22 }
 0x92f   :  { %v2273_v49 = vpop.permute.xlu1 %2272  ;;  %v2544_v12 = vcombine.low %v2409_v8, %v2413_v25  ;;  %v2562_v42 = vcombine.low %v2425_v9, %v2429_v39  ;;  %v8891_v8 = vld [vmem:[#allocation71_spill] sm:$0xff]  ;;  %v8893_v9 = vld [vmem:[#allocation73_spill] sm:$0xff] }
 0x930   :  { %v2488_v32 = vrot.slane %v2481_v27, %v7203_v48  ;;  %v2436_v23 = vmax.f32 %v7775_v52, %v2273_v49  ;;  %v2892_v11 = vrot.slane %v2878_v16, %v8880_v31  ;;  %v2940_v52 = vrot.slane %v5648_v18, %v8880_v31  ;;  %v8887_v27 = vld [vmem:[#allocation69_spill] sm:$0xff] }
 0x931   :  { %v2235_v57 = vpop.permute.xlu0 %2234  ;;  %v2569_v16 = vrot.slane %v2562_v42, %v7203_v48 }
 0x932   :  { %v2768_v33 = vcombine.low %v2479_v2, %v2488_v32  ;;  %v2499_v3 = vcombine.low %v2432_v54, %v2436_v23  ;;  %v2893_v6 = vcombine.low %v2885_v28, %v2892_v11  ;;  %v2417_v43 = vmax.f32 %v7764_v46, %v2235_v57 }
 0x933   :  { %v2243_v53 = vpop.permute.xlu1 %2242  ;;  %v5641_v59 = vcombine.high %v2479_v2, %v2488_v32  ;;  %v2941_v51 = vcombine.low %v2933_v1, %v2940_v52  ;;  %v2462_v2 = vmax.f32 %v8887_v27, %v7994_v29  ;;  %v8888_v32 = vld [vmem:[#allocation67_spill] sm:$0xff]  ;;  %v8894_v1 = vld [vmem:[#allocation45_spill] sm:$0xff]  ;;  %v8900_v27 = vld [vmem:[#allocation52_spill] sm:$0xff] }
 0x934   :  { %v2506_v40 = vrot.slane %v2499_v3, %v7203_v48  ;;  %v2421_v50 = vmax.f32 %v7788_v41, %v2243_v53  ;;  %2896 = vrot.lane.b32.xlu1 %v2893_v6, %s6458_s10  ;;  %v8104_v60 = vrot.slane %v2768_v33, %v8880_v31  ;;  %v2442_v54 = vmax.f32 %v8888_v32, %v7988_v14 }
 0x935   :  { %v2267_v30 = vpop.permute.xlu0 %2266  ;;  %v2820_v56 = vrot.slane %v5641_v59, %v8880_v31  ;;  %v2430_v59 = vmax.f32 %v8893_v9, %v8892_v38  ;;  %v8909_v38 = vld [vmem:[#allocation40_spill] sm:$0xff] }
 0x936   :  { %v2769_v61 = vcombine.low %v2497_v45, %v2506_v40  ;;  %v5642_v63 = vcombine.high %v2497_v45, %v2506_v40  ;;  %v2553_v10 = vcombine.low %v2417_v43, %v2421_v50  ;;  %v2433_v46 = vmax.f32 %v7791_v17, %v2267_v30 }
 0x937   :  { %v2275_v20 = vpop.permute.xlu1 %2274  ;;  %v2551_v17 = vrot.slane %v2544_v12, %v7203_v48  ;;  %v2414_v40 = vmax.f32 %v8891_v8, %v8890_v62  ;;  %v8895_v12 = vld [vmem:[#allocation70_spill] sm:$0xff] }
 0x938   :  { %v2437_v41 = vmax.f32 %v7811_v21, %v2275_v20  ;;  %v2827_v58 = vrot.slane %v5642_v63, %v8880_v31  ;;  %v8098_v24 = vrot.slane %v2769_v61, %v8880_v31  ;;  %v2560_v55 = vrot.slane %v2553_v10, %v7203_v48  ;;  %2944 = vrot.lane.b32.xlu1 %v2941_v51, %s6469_s27  ;;  %v8896_v10 = vld [vmem:[#allocation35_spill] sm:$0xff]  ;;  %v8897_v20 = vld [vmem:[#allocation36_spill] sm:$0xff] }
 0x939   :  { %v2301_v15 = vpop.permute.xlu0 %2300  ;;  %v2446_v21 = vmax.f32 %v7417_v7, %v7990_v34  ;;  %v8889_v34 = vld [vmem:[#allocation68_spill] sm:$0xff]  ;;  %v2410_v61 = vmax.f32 %v8895_v12, %v8894_v1 }
 0x93a   :  { %v2571_v22 = vcombine.low %v2433_v46, %v2437_v41  ;;  %v2828_v18 = vcombine.low %v2820_v56, %v2827_v58  ;;  %v2784_v49 = vcombine.low %v8104_v60, %v8098_v24  ;;  %v2450_v11 = vmax.f32 %v7820_v44, %v2301_v15  ;;  %v8898_v46 = vld [vmem:[#allocation46_spill] sm:$0xff]  ;;  %v8899_v41 = vld [vmem:[#allocation72_spill] sm:$0xff] }
 0x93b   :  { %v2309_v37 = vpop.permute.xlu1 %2308  ;;  %v2458_v19 = vmax.f32 %v8889_v34, %v7992_v0  ;;  %v2860_v57 = vcombine.low %v2551_v17, %v2560_v55  ;;  %v2652_v28 = vcombine.low %v2442_v54, %v2446_v21  ;;  %v2426_v58 = vmax.f32 %v8899_v41, %v8898_v46 }
 0x93c   :  { %v2578_v23 = vrot.slane %v2571_v22, %v7203_v48  ;;  %v2454_v7 = vmax.f32 %v7841_v36, %v2309_v37  ;;  %2846 = vrot.lane.b32.xlu0 %v2828_v18, %s6450_s0  ;;  %v5645_v36 = vcombine.high %v2551_v17, %v2560_v55  ;;  %v2616_v17 = vcombine.low %v2410_v61, %v2414_v40  ;;  %s6470_s0 = smov 40  }
 0x93d   :  { %v2333_v29 = vpop.permute.xlu0 %2332  ;;  %v2670_v3 = vcombine.low %v2458_v19, %v2462_v2  ;;  %v2868_v6 = vrot.slane %v2860_v57, %v8880_v31  ;;  %v2659_v52 = vrot.slane %v2652_v28, %v7203_v48  ;;  %v8901_v2 = vld [vmem:[#allocation75_spill] sm:$0xff]  ;;  %v8904_v19 = vld [vmem:[#allocation33_spill] sm:$0xff] }
 0x93e   :  { %v2861_v25 = vcombine.low %v2569_v16, %v2578_v23  ;;  %v2661_v33 = vcombine.low %v2450_v11, %v2454_v7  ;;  %v5646_v45 = vcombine.high %v2569_v16, %v2578_v23  ;;  %v2466_v39 = vmax.f32 %v7832_v47, %v2333_v29  ;;  %v8902_v23 = vld [vmem:[#allocation49_spill] sm:$0xff]  ;;  %v8903_v11 = vld [vmem:[#allocation74_spill] sm:$0xff]  ;;  %v8905_v29 = vld [vmem:[#allocation39_spill] sm:$0xff] }
 0x93f   :  { %v2341_v5 = vpop.permute.xlu1 %2340  ;;  %v2677_v50 = vrot.slane %v2670_v3, %v7203_v48  ;;  %v2916_v56 = vrot.slane %v5645_v36, %v8880_v31  ;;  %v2634_v16 = vcombine.low %v2426_v58, %v2430_v59  ;;  %v2447_v37 = vmax.f32 %v8901_v2, %v8900_v27  ;;  %v8906_v36 = vld [vmem:[#allocation55_spill] sm:$0xff]  ;;  %v3201_v59 = vld [vmem:[#allocation10 + $0x70] sm:$0xff]  ;;  %v8914_v2 = vld [vmem:[#allocation56_spill] sm:$0xff] }
 0x940   :  { %v2875_v14 = vrot.slane %v2861_v25, %v8880_v31  ;;  %v2470_v44 = vmax.f32 %v7857_v35, %v2341_v5  ;;  %v2668_v53 = vrot.slane %v2661_v33, %v7203_v48  ;;  %v2923_v47 = vrot.slane %v5646_v45, %v8880_v31  ;;  %v3202_v25 = vld [vmem:[#allocation10 + $0x78] sm:$0xff] }
 0x941   :  { %v2237_v0 = vpop.permute.xlu0 %2236  ;;  %v2443_v7 = vmax.f32 %v8903_v11, %v8902_v23  ;;  %5991 = vmatprep.subr.mxu0 %v3202_v25  ;;  %v3198_v27 = vld [vmem:[#allocation10 + $0x58] sm:$0xff]  ;;  %v8916_v11 = vld [vmem:[#allocation53_spill] sm:$0xff] }
 0x942   :  { %v2679_v43 = vcombine.low %v2466_v39, %v2470_v44  ;;  %v2876_v30 = vcombine.low %v2868_v6, %v2875_v14  ;;  %v2418_v42 = vmax.f32 %v8896_v10, %v2237_v0  ;;  %v2973_v55 = vcombine.low %v2659_v52, %v2668_v53  ;;  %5992 = vmatpush3.msra.mxu0 %v3202_v25  ;;  %v8907_v0 = vld [vmem:[#allocation77_spill] sm:$0xff] }
 0x943   :  { %v2245_v35 = vpop.permute.xlu1 %2244  ;;  %v2924_v54 = vcombine.low %v2916_v56, %v2923_v47  ;;  %v5651_v3 = vcombine.high %v2659_v52, %v2668_v53  ;;  %v2623_v14 = vrot.slane %v2616_v17, %v7203_v48  ;;  %v2724_v44 = vcombine.low %v2443_v7, %v2447_v37  ;;  %v3200_v47 = vld [vmem:[#allocation10 + $0x68] sm:$0xff]  ;;  %5993 = vmatprep.subr.mxu0 %v3201_v59  ;;  %v8912_v17 = vld [vmem:[#allocation38_spill] sm:$0xff]  ;;  %v8915_v37 = vld [vmem:[#allocation79_spill] sm:$0xff] }
 0x944   :  { %v2686_v63 = vrot.slane %v2679_v43, %v7203_v48  ;;  %v2422_v51 = vmax.f32 %v8897_v20, %v2245_v35  ;;  %2894 = vrot.lane.b32.xlu0 %v2876_v30, %s6458_s10  ;;  %v2981_v33 = vrot.slane %v2973_v55, %v8880_v31  ;;  %v2463_v6 = vmax.f32 %v8907_v0, %v8906_v36  ;;  %v8908_v43 = vld [vmem:[#allocation37_spill] sm:$0xff]  ;;  %v8910_v35 = vld [vmem:[#allocation50_spill] sm:$0xff]  ;;  %v8911_v30 = vld [vmem:[#allocation76_spill] sm:$0xff] }
 0x945   :  { %v2269_v15 = vpop.permute.xlu0 %2268  ;;  %v2641_v53 = vrot.slane %v2634_v16, %v7203_v48  ;;  %v2459_v1 = vmax.f32 %v8911_v30, %v8910_v35  ;;  %v3029_v12 = vrot.slane %v5651_v3, %v8880_v31  ;;  %5994 = vmatpush3.msra.mxu0 %v3201_v59  ;;  %v8169_v20 = vrot.slane %v2724_v44, %v7203_v48  ;;  %v3199_v55 = vld [vmem:[#allocation10 + $0x60] sm:$0xff]  ;;  %v8917_v7 = vld [vmem:[#allocation78_spill] sm:$0xff] }
 0x946   :  { %v2974_v21 = vcombine.low %v2677_v50, %v2686_v63  ;;  %v2625_v22 = vcombine.low %v2418_v42, %v2422_v51  ;;  %v5652_v18 = vcombine.high %v2677_v50, %v2686_v63  ;;  %v2434_v57 = vmax.f32 %v8904_v19, %v2269_v15  ;;  %5995 = vmatprep.subr.mxu0 %v3200_v47  ;;  %v8921_v36 = vld [vmem:[#allocation44_spill] sm:$0xff] }
 0x947   :  { %v2277_v32 = vpop.permute.xlu1 %2276  ;;  %v2742_v51 = vcombine.low %v2459_v1, %v2463_v6  ;;  %5996 = vmatpush3.msra.mxu0 %v3200_v47  ;;  %v3197_v6 = vld [vmem:[#allocation10 + $0x50] sm:$0xff] }
 0x948   :  { %v2988_v34 = vrot.slane %v2974_v21, %v8880_v31  ;;  %v2438_v28 = vmax.f32 %v8905_v29, %v2277_v32  ;;  %v8152_v45 = vrot.slane %v2625_v22, %v7203_v48  ;;  %2942 = vrot.lane.b32.xlu0 %v2924_v54, %s6469_s27  ;;  %v3036_v62 = vrot.slane %v5652_v18, %v8880_v31  ;;  %v8913_v22 = vld [vmem:[#allocation43_spill] sm:$0xff]  ;;  %v8919_v29 = vld [vmem:[#allocation34_spill] sm:$0xff] }
 0x949   :  { %v2303_v5 = vpop.permute.xlu0 %2302  ;;  %v2415_v18 = vmax.f32 %v8915_v37, %v8914_v2  ;;  %5997 = vmatprep.subr.mxu0 %v3199_v55 }
 0x94a   :  { %v2643_v39 = vcombine.low %v2434_v57, %v2438_v28  ;;  %v2989_v40 = vcombine.low %v2981_v33, %v2988_v34  ;;  %v2451_v50 = vmax.f32 %v8908_v43, %v2303_v5  ;;  %v2956_v61 = vcombine.low %v2623_v14, %v8152_v45  ;;  %5998 = vmatpush3.msra.mxu0 %v3199_v55  ;;  %v8918_v57 = vld [vmem:[#allocation81_spill] sm:$0xff] }
 0x94b   :  { %v2311_v8 = vpop.permute.xlu1 %2310  ;;  %v3037_v58 = vcombine.low %v3029_v12, %v3036_v62  ;;  %v5649_v54 = vcombine.high %v2623_v14, %v8152_v45  ;;  %v2411_v34 = vmax.f32 %v8917_v7, %v8916_v11  ;;  %v2431_v28 = vmax.f32 %v8919_v29, %v8918_v57  ;;  %5999 = vmatprep.subr.mxu0 %v3198_v27  ;;  %v8929_v11 = vld [vmem:[#allocation26_spill] sm:$0xff] }
 0x94c   :  { %v2650_v52 = vrot.slane %v2643_v39, %v7203_v48  ;;  %v2455_v9 = vmax.f32 %v8909_v38, %v2311_v8  ;;  %2992 = vrot.lane.b32.xlu1 %v2989_v40, %s6459_s15  ;;  %v2964_v32 = vrot.slane %v2956_v61, %v8880_v31  ;;  %v2749_v45 = vrot.slane %v2742_v51, %v7203_v48  ;;  %v8920_v39 = vld [vmem:[#allocation41_spill] sm:$0xff]  ;;  %v8922_v8 = vld [vmem:[#allocation54_spill] sm:$0xff]  ;;  %v8923_v40 = vld [vmem:[#allocation80_spill] sm:$0xff] }
 0x94d   :  { %v2335_v63 = vpop.permute.xlu0 %2334  ;;  %6000 = vmatpush3.msra.mxu0 %v3198_v27  ;;  %v2688_v62 = vcombine.low %v2411_v34, %v2415_v18  ;;  %v8925_v51 = vld [vmem:[#allocation47_spill] sm:$0xff] }
 0x94e   :  { %v2957_v10 = vcombine.low %v2641_v53, %v2650_v52  ;;  %v2733_v42 = vcombine.low %v2451_v50, %v2455_v9  ;;  %v5650_v46 = vcombine.high %v2641_v53, %v2650_v52  ;;  %v2467_v21 = vmax.f32 %v8912_v17, %v2335_v63  ;;  %6001 = vmatprep.subr.mxu0 %v3197_v6  ;;  %v3196_v50 = vld [vmem:[#allocation10 + $0x48] sm:$0xff] }
 0x94f   :  { %v2343_v41 = vpop.permute.xlu1 %2342  ;;  %v2427_v53 = vmax.f32 %v8923_v40, %v8922_v8  ;;  %v3012_v52 = vrot.slane %v5649_v54, %v8880_v31  ;;  %6002 = vmatpush3.msra.mxu0 %v3197_v6  ;;  %v8926_v17 = vld [vmem:[#allocation24_spill] sm:$0xff] }
 0x950   :  { %v2971_v15 = vrot.slane %v2957_v10, %v8880_v31  ;;  %v2740_v56 = vrot.slane %v2733_v42, %v7203_v48  ;;  %v2471_v16 = vmax.f32 %v8913_v22, %v2343_v41  ;;  %3040 = vrot.lane.b32.xlu1 %v3037_v58, %s6470_s0  ;;  %v3019_v25 = vrot.slane %v5650_v46, %v8880_v31  ;;  %v8924_v10 = vld [vmem:[#allocation42_spill] sm:$0xff]  ;;  %v3195_v41 = vld [vmem:[#allocation10 + $0x40] sm:$0xff] }
 0x951   :  { %v2239_v23 = vpop.permute.xlu0 %2238  ;;  %v2706_v47 = vcombine.low %v2427_v53, %v2431_v28  ;;  %6003 = vmatprep.subr.mxu0 %v3196_v50  ;;  %v2695_v58 = vrot.slane %v2688_v62, %v7203_v48  ;;  %v8927_v22 = vmov 0.0   ;;  %v8930_v62 = vld [vmem:[#allocation27_spill] sm:$0xff] }
 0x952   :  { %v2751_v19 = vcombine.low %v2467_v21, %v2471_v16  ;;  %v3069_v33 = vcombine.low %v8169_v20, %v2740_v56  ;;  %v2972_v5 = vcombine.low %v2964_v32, %v2971_v15  ;;  %v2419_v44 = vmax.f32 %v8920_v39, %v2239_v23  ;;  %6004 = vmatpush3.msra.mxu0 %v3196_v50  ;;  %v8928_v23 = vld [vmem:[#allocation25_spill] sm:$0xff] }
 0x953   :  { %v2247_v3 = vpop.permute.xlu1 %2246  ;;  %v5655_v30 = vcombine.high %v8169_v20, %v2740_v56  ;;  %v3020_v12 = vcombine.low %v3012_v52, %v3019_v25  ;;  %6005 = vmatprep.subr.mxu0 %v3195_v41  ;;  %v3162_v21 = vand.u32 7, %v8926_v17  ;;  %v2713_v16 = vrot.slane %v2706_v47, %v7203_v48 }
 0x954   :  { %v2758_v14 = vrot.slane %v2751_v19, %v7203_v48  ;;  %v2423_v0 = vmax.f32 %v8921_v36, %v2247_v3  ;;  %2990 = vrot.lane.b32.xlu0 %v2972_v5, %s6459_s15  ;;  %v3077_v35 = vrot.slane %v3069_v33, %v8880_v31  ;;  %6006 = vmatpush3.msra.mxu0 %v3195_v41  ;;  %v3169_v8 = vand.u32 7, %v8930_v62  ;;  %v3286_v41 = vld [vmem:[#allocation10 + $0x10] sm:$0xff] }
 0x955   :  { %v2271_v43 = vpop.permute.xlu0 %2270  ;;  %6036 = vmatprep.subr.mxu0 %v8927_v22  ;;  %v3125_v27 = vrot.slane %v5655_v30, %v8880_v31  ;;  %vm3182_vm1 = vcmp.ne.s32.totalorder %v3162_v21, 0 }
 0x956   :  { %v3070_v38 = vcombine.low %v2749_v45, %v2758_v14  ;;  %v5656_v9 = vcombine.high %v2749_v45, %v2758_v14  ;;  %v2697_v59 = vcombine.low %v2419_v44, %v2423_v0  ;;  %v2435_v42 = vmax.f32 %v8924_v10, %v2271_v43  ;;  %vm3184_vm2 = vmand %vm8763_vm0, %vm3182_vm1  ;;  %v3290_v10 = vld [vmem:[#allocation10 + $0x30] sm:$0xff] }
 0x957   :  { %v2279_v1 = vpop.permute.xlu1 %2278  ;;  %v3186_v34 = vsel %vm3184_vm2, 1.0, %v8927_v22  ;;  %vm3150_vm1 = vcmask 326656   ;;  %vm3155_vm2 = vcmask 457728   ;;  %vm3183_vm0 = vcmp.ne.s32.totalorder %v3169_v8, 0 }
 0x958   :  { %v3084_v61 = vrot.slane %v3070_v38, %v8880_v31  ;;  %v2704_v63 = vrot.slane %v2697_v59, %v7203_v48  ;;  %v2439_v46 = vmax.f32 %v8925_v51, %v2279_v1  ;;  %3038 = vrot.lane.b32.xlu0 %v3020_v12, %s6470_s0  ;;  %v3132_v20 = vrot.slane %v5656_v9, %v8880_v31  ;;  %vm3185_vm15 = vmand %vm314_vm8, %vm3183_vm0  ;;  %v3288_v51 = vld [vmem:[#allocation10 + $0x20] sm:$0xff] }
 0x959   :  { %5969 = vmatprep.mubr.msk.f32.mxu1 %vm239_vm4, %v3186_v34  ;;  %v3187_v12 = vsel %vm3185_vm15, 1.0, %v8927_v22  ;;  %vm3188_vm0 = vcmp.ne.s32.totalorder %v3162_v21, 7  ;;  %vm3189_vm15 = vcmp.ne.s32.totalorder %v3169_v8, 7  ;;  %v3537_v34 = vld [vmem:[#allocation10 + $0x88] sm:$0xff] }
 0x95a   :  { %v2715_v55 = vcombine.low %v2435_v42, %v2439_v46  ;;  %v3085_v15 = vcombine.low %v3077_v35, %v3084_v61  ;;  %v3052_v56 = vcombine.low %v2695_v58, %v2704_v63  ;;  %v5653_v2 = vcombine.high %v2695_v58, %v2704_v63  ;;  %v3291_v63 = vld [vmem:[#allocation10 + $0x38] sm:$0xff]  ;;  %v3289_v42 = vld [vmem:[#allocation10 + $0x28] sm:$0xff]  ;;  %vm3190_vm8 = vmand %vm333_vm12, %vm3188_vm0 }
 0x95b   :  { %v3133_v54 = vcombine.low %v3125_v27, %v3132_v20  ;;  %v3287_v46 = vld [vmem:[#allocation10 + $0x18] sm:$0xff]  ;;  %v3285_v58 = vld [vmem:[#allocation10 + $0x8] sm:$0xff]  ;;  %v3284_v20 = vld [vmem:[#allocation10] sm:$0xff] }
 0x95c   :  { %v2722_v37 = vrot.slane %v2715_v55, %v7203_v48  ;;  %3088 = vrot.lane.b32.xlu1 %v3085_v15, %s6460_s29  ;;  %v3060_v7 = vrot.slane %v3052_v56, %v8880_v31  ;;  %v3108_v19 = vrot.slane %v5653_v2, %v8880_v31  ;;  %v3543_v2 = vld [vmem:[#allocation10 + $0xb8] sm:$0xff]  ;;  %v5237_v55 = vld [vmem:[#allocation13 + $0xa0] sm:$0xff] }
 0x95d   :  { %v3669_v27 = vld [vmem:[%s8693_s5] sm:$0x1] }
 0x95e   :  { %v3053_v18 = vcombine.low %v2713_v16, %v2722_v37  ;;  %v5654_v32 = vcombine.high %v2713_v16, %v2722_v37  ;;  %v3192_v16 = vsel %vm3190_vm8, 1.0, %v8927_v22  ;;  %v3542_v37 = vld [vmem:[#allocation10 + $0xb0] sm:$0xff] }
 0x960   :  { %v3067_v57 = vrot.slane %v3053_v18, %v8880_v31  ;;  %v3115_v29 = vrot.slane %v5654_v32, %v8880_v31  ;;  %3136 = vrot.lane.b32.xlu1 %v3133_v54, %s6471_s19  ;;  %v3541_v18 = vld [vmem:[#allocation10 + $0xa8] sm:$0xff]  ;;  %v3540_v32 = vld [vmem:[#allocation10 + $0xa0] sm:$0xff]  ;;  %v3539_v54 = vld [vmem:[#allocation10 + $0x98] sm:$0xff] }
 0x962   :  { %v3116_v28 = vcombine.low %v3108_v19, %v3115_v29  ;;  %v3068_v25 = vcombine.low %v3060_v7, %v3067_v57  ;;  %v3538_v7 = vld [vmem:[#allocation10 + $0x90] sm:$0xff]  ;;  %v3536_v19 = vld [vmem:[#allocation10 + $0x80] sm:$0xff] }
 0x964   :  { %3134 = vrot.lane.b32.xlu1 %v3116_v28, %s6471_s19  ;;  %3086 = vrot.lane.b32.xlu0 %v3068_v25, %s6460_s29 }
 0x99e   :  { %v2849_v33 = vpop.permute.xlu0 %2848 }
 0x99f   :  { %v3142_v6 = vsel %vm3140_vm6, %v2801_v4, %v2849_v33 }
 0x9a6   :  { %v2897_v3 = vpop.permute.xlu1 %2896 }
 0x9a7   :  { %v3144_v40 = vsel %vm239_vm4, %v3142_v6, %v2897_v3 }
 0x9aa   :  { %v2945_v45 = vpop.permute.xlu1 %2944 }
 0x9ab   :  { %v3147_v52 = vsel %vm3145_vm7, %v3144_v40, %v2945_v45 }
 0x9ae   :  { %v2847_v5 = vpop.permute.xlu0 %2846 }
 0x9af   :  { %v3141_v13 = vsel %vm3140_vm6, %v2784_v49, %v2847_v5 }
 0x9b6   :  { %v2895_v14 = vpop.permute.xlu0 %2894 }
 0x9b7   :  { %v3143_v9 = vsel %vm239_vm4, %v3141_v13, %v2895_v14 }
 0x9ba   :  { %v2943_v44 = vpop.permute.xlu0 %2942 }
 0x9bb   :  { %v3146_v47 = vsel %vm3145_vm7, %v3143_v9, %v2943_v44  ;;  %vm3191_vm7 = vmand %vm334_vm13, %vm3189_vm15  ;;  %vm8935_vm13 = vcmask 1047559  }
 0x9bc   :  { %v3193_v21 = vsel %vm3191_vm7, 1.0, %v8927_v22 }
 0x9be   :  { %v2993_v39 = vpop.permute.xlu1 %2992 }
 0x9bf   :  { %v3149_v43 = vsel %vm244_vm3, %v3147_v52, %v2993_v39 }
 0x9c2   :  { %v3041_v36 = vpop.permute.xlu1 %3040 }
 0x9c3   :  { %v3152_v50 = vsel %vm3150_vm1, %v3149_v43, %v3041_v36 }
 0x9c6   :  { %v2991_v0 = vpop.permute.xlu0 %2990 }
 0x9c7   :  { %v3148_v30 = vsel %vm244_vm3, %v3146_v47, %v2991_v0 }
 0x9ca   :  { %v3039_v26 = vpop.permute.xlu0 %3038 }
 0x9cb   :  { %v3151_v24 = vsel %vm3150_vm1, %v3148_v30, %v3039_v26  ;;  %vm8936_vm1 = vmmov %vm8935_vm13 }
 0x9cc   :  { %vm8938_vm0 = vmmov %vm8936_vm1 }
 0x9cd   :  { %vm8939_vm8 = vmmov %vm8938_vm0 }
 0x9ce   :  { %v3089_v53 = vpop.permute.xlu1 %3088  ;;  %vm8940_vm15 = vmmov %vm8938_vm0 }
 0x9cf   :  { %v3154_v4 = vsel %vm249_vm5, %v3152_v50, %v3089_v53  ;;  %vm8941_vm7 = vmmov %vm8938_vm0 }
 0x9d2   :  { %v3137_v38 = vpop.permute.xlu1 %3136 }
 0x9d3   :  { %v3157_v59 = vsel %vm3155_vm2, %v3154_v4, %v3137_v38 }
 0x9d4   :  { %5965 = vmatprep.subr.mxu1 %v3157_v59 }
 0x9d5   :  { %5966 = vmatpush3.msra.mxu1 %v3157_v59 }
 0x9d6   :  { %v3087_v60 = vpop.permute.xlu0 %3086  ;;  %v3135_v49 = vpop.permute.xlu1 %3134 }
 0x9d7   :  { %v3153_v1 = vsel %vm249_vm5, %v3151_v24, %v3087_v60 }
 0x9d8   :  { %v3156_v61 = vsel %vm3155_vm2, %v3153_v1, %v3135_v49  ;;  %vm8937_vm2 = vmmov %vm8936_vm1 }
 0x9d9   :  { %5967 = vmatprep.subr.mxu1 %v3156_v61  ;;  %6007 = vmatprep.mubr.msk.f32.mxu0 %vm463_vm11, %v3156_v61 }
 0x9da   :  { %5968 = vmatpush3.msra.mxu1 %v3156_v61  ;;  %6008 = vmatmul.mubr.msk.f32.vlgmr.msra.gmra.mxu0 %vm463_vm11, %v3157_v59 }
 0x9db   :  { %5970 = vmatmul.mubr.msk.f32.vlgmr.msra.gmra.mxu1 %vm239_vm4, %v3187_v12  ;;  %5972 = vmatprep.subr.mxu1 %v3291_v63 }
 0x9dc   :  { %5973 = vmatpush3.msra.mxu1 %v3291_v63 }
 0x9dd   :  { %5974 = vmatprep.subr.mxu1 %v3290_v10 }
 0x9de   :  { %5975 = vmatpush3.msra.mxu1 %v3290_v10 }
 0x9df   :  { %5976 = vmatprep.subr.mxu1 %v3289_v42 }
 0x9e0   :  { %5977 = vmatpush3.msra.mxu1 %v3289_v42 }
 0x9e1   :  { %5978 = vmatprep.subr.mxu1 %v3288_v51 }
 0x9e2   :  { %5979 = vmatpush3.msra.mxu1 %v3288_v51 }
 0x9e3   :  { %5980 = vmatprep.subr.mxu1 %v3287_v46 }
 0x9e4   :  { %5981 = vmatpush3.msra.mxu1 %v3287_v46 }
 0x9e5   :  { %5982 = vmatprep.subr.mxu1 %v3286_v41 }
 0x9e6   :  { %5983 = vmatpush3.msra.mxu1 %v3286_v41 }
 0x9e7   :  { %5984 = vmatprep.subr.mxu1 %v3285_v58 }
 0x9e8   :  { %5985 = vmatpush3.msra.mxu1 %v3285_v58 }
 0x9e9   :  { %5986 = vmatprep.subr.mxu1 %v3284_v20 }
 0x9ea   :  { %5987 = vmatpush3.msra.mxu1 %v3284_v20 }
 0x9eb   :  { %6010 = vmatprep.subr.mxu1 %v3157_v59 }
 0xa9a   :  { %v6009_v33 = vpop.f32.mrf.mxu0 }
 0xa9b   :  { %v5971_v15 = vpop.f32.mrf.mxu1 }
 0xa9c   :  { %v3445_v3 = vpop.f32.mrf.mxu0 }
 0xa9d   :  { %v3275_v56 = vpop.f32.mrf.mxu1 }
 0xa9e   :  { %5988 = vmatprep.mubr.msk.f32.mxu1 %vm463_vm11, %v3275_v56 }
 0xa9f   :  { %5989 = vmatmul.mubr.msk.f32.vlgmr.msra.gmra.mxu1 %vm463_vm11, %v5971_v15 }
 0xaa0   :  { %6011 = vmatpush3.msra.mxu1 %v3157_v59  ;;  %6014 = vmatprep.mubr.msk.f32.mxu1 %vm239_vm4, %v3192_v16  ;;  %v8934_v59 = vld [vmem:[#allocation31_spill] sm:$0xff] }
 0xaa1   :  { %6012 = vmatprep.subr.mxu1 %v3156_v61 }
 0xaa2   :  { %6013 = vmatpush3.msra.mxu1 %v3156_v61 }
 0xaa3   :  { %6015 = vmatmul.mubr.msk.f32.vlgmr.msra.gmra.mxu1 %vm239_vm4, %v3193_v21  ;;  %6017 = vmatprep.subr.mxu1 %v3543_v2 }
 0xaa4   :  { %6018 = vmatpush3.msra.mxu1 %v3543_v2 }
 0xaa5   :  { %6019 = vmatprep.subr.mxu1 %v3542_v37 }
 0xaa6   :  { %6020 = vmatpush3.msra.mxu1 %v3542_v37 }
 0xaa7   :  { %6021 = vmatprep.subr.mxu1 %v3541_v18 }
 0xaa8   :  { %6022 = vmatpush3.msra.mxu1 %v3541_v18  ;;  %v5667_v18 = vld [vmem:[%s8694_s6] ss:$0 sm:$0xff] }
 0xaa9   :  { %6023 = vmatprep.subr.mxu1 %v3540_v32 }
 0xaaa   :  { %6024 = vmatpush3.msra.mxu1 %v3540_v32 }
 0xaab   :  { %6025 = vmatprep.subr.mxu1 %v3539_v54 }
 0xaac   :  { %6026 = vmatpush3.msra.mxu1 %v3539_v54 }
 0xaad   :  { %6027 = vmatprep.subr.mxu1 %v3538_v7 }
 0xaae   :  { %6028 = vmatpush3.msra.mxu1 %v3538_v7 }
 0xaaf   :  { %6029 = vmatprep.subr.mxu1 %v3537_v34 }
 0xab0   :  { %6030 = vmatpush3.msra.mxu1 %v3537_v34 }
 0xab1   :  { %6031 = vmatprep.subr.mxu1 %v3536_v19 }
 0xab2   :  { %6032 = vmatpush3.msra.mxu1 %v3536_v19 }
 0xab3   :  { %6060 = vmatprep.subr.mxu1 %v8927_v22 }
 0xb5f   :  { %v5990_v57 = vpop.f32.mrf.mxu1 }
 0xb60   :  { %v3451_v45 = vadd.f32 %v6009_v33, %v5990_v57 }
 0xb61   :  { %v3364_v29 = vpop.f32.mrf.mxu1 }
 0xb62   :  { %v3446_v14 = vadd.f32 %v3445_v3, %v3364_v29 }
 0xb63   :  { %v6016_v28 = vpop.f32.mrf.mxu1 }
 0xb65   :  { %v3526_v25 = vpop.f32.mrf.mxu1 }
 0xb66   :  { %6033 = vmatprep.mubr.msk.f32.mxu1 %vm463_vm11, %v3526_v25 }
 0xb67   :  { %6034 = vmatmul.mubr.msk.f32.vlgmr.msra.gmra.mxu1 %vm463_vm11, %v6016_v28 }
 0xc27   :  { %v6035_v5 = vpop.f32.mrf.mxu1 }
 0xc28   :  { %v3626_v44 = vadd.f32 %v6035_v5, %v3451_v45 }
 0xc29   :  { %v3616_v39 = vpop.f32.mrf.mxu1 }
 0xc2a   :  { %v3625_v36 = vadd.f32 %v3616_v39, %v3446_v14 }
 0xc2c   :  { %v3627_v0 = vadd.f32 %v3626_v44, %v3625_v36 }
 0xc2e   :  { %v3628_v6 = vrot.slane %v3627_v0, 4 }
 0xc30   :  { %v3629_v62 = vadd.f32 %v3628_v6, %v3627_v0 }
 0xc32   :  { %v3630_v8 = vrot.slane %v3629_v62, 2 }
 0xc34   :  { %v3631_v40 = vadd.f32 %v3630_v8, %v3629_v62 }
 0xc36   :  { %v3632_v53 = vrot.slane %v3631_v40, 1 }
 0xc38   :  { %v3633_v52 = vadd.f32 %v3632_v53, %v3631_v40 }
 0xc3a   :  { %3634 = vrot.lane.b32.xlu0 %v3633_v52, %s6458_s10 }
 0xcac   :  { %v3635_v43 = vpop.permute.xlu0 %3634 }
 0xcad   :  { %v3636_v50 = vadd.f32 %v3635_v43, %v3633_v52 }
 0xcaf   :  { %3637 = vrot.lane.b32.xlu1 %v3636_v50, %s6459_s15 }
 0xd21   :  { %v3638_v13 = vpop.permute.xlu1 %3637 }
 0xd22   :  { %v3639_v26 = vadd.f32 %v3638_v13, %v3636_v50 }
 0xd24   :  { %3640 = vrot.lane.b32.xlu0 %v3639_v26, %s6462_s28 }
 0xd96   :  { %v3641_v4 = vpop.permute.xlu0 %3640 }
 0xd97   :  { %v3642_v38 = vadd.f32 %v3641_v4, %v3639_v26 }
 0xd99   :  { %v3643_v9 = vmul.f32 0.0078125, %v3642_v38 }
 0xd9b   :  { %v3647_v47 = vrot.slane %v3643_v9, %v8934_v59 }
 0xd9d   :  { %v3648_v35 = vsub.f32 %v3625_v36, %v3647_v47  ;;  %v3649_v30 = vsub.f32 %v3626_v44, %v3647_v47 }
 0xd9f   :  { %v3650_v24 = vmul.f32 %v3648_v35, %v3648_v35  ;;  %v3651_v60 = vmul.f32 %v3649_v30, %v3649_v30 }
 0xda1   :  { %v3652_v49 = vadd.f32 %v3651_v60, %v3650_v24 }
 0xda3   :  { %v3653_v1 = vrot.slane %v3652_v49, 4 }
 0xda5   :  { %v3654_v12 = vadd.f32 %v3653_v1, %v3652_v49 }
 0xda7   :  { %v3655_v61 = vrot.slane %v3654_v12, 2 }
 0xda9   :  { %v3656_v63 = vadd.f32 %v3655_v61, %v3654_v12 }
 0xdab   :  { %v3657_v10 = vrot.slane %v3656_v63, 1 }
 0xdad   :  { %v3658_v42 = vadd.f32 %v3657_v10, %v3656_v63 }
 0xdaf   :  { %3659 = vrot.lane.b32.xlu1 %v3658_v42, %s6458_s10 }
 0xe21   :  { %v3660_v51 = vpop.permute.xlu1 %3659 }
 0xe22   :  { %v3661_v46 = vadd.f32 %v3660_v51, %v3658_v42 }
 0xe24   :  { %3662 = vrot.lane.b32.xlu0 %v3661_v46, %s6459_s15 }
 0xe96   :  { %v3663_v41 = vpop.permute.xlu0 %3662 }
 0xe97   :  { %v3664_v58 = vadd.f32 %v3663_v41, %v3661_v46 }
 0xe99   :  { %3665 = vrot.lane.b32.xlu1 %v3664_v58, %s6462_s28 }
 0xf0b   :  { %v3666_v20 = vpop.permute.xlu1 %3665 }
 0xf0c   :  { %v3667_v15 = vadd.f32 %v3666_v20, %v3664_v58 }
 0xf0e   :  { %v3668_v56 = vmul.f32 0.0078125, %v3667_v15 }
 0xf10   :  { %v3670_v16 = vadd.f32 1e-05, %v3668_v56 }
 0xf12   :  { %6229 = vrsqrt.f32 %v3670_v16 }
 0xf1f   :  { %v6230_v21 = vpop.eup %6229 }
 0xf20   :  { %v3672_v2 = vmul.f32 %v6230_v21, %v3669_v27 }
 0xf22   :  { %v3677_v37 = vrot.slane %v3672_v2, %v8934_v59 }
 0xf24   :  { %v3679_v32 = vmul.f32 %v3677_v37, %v3648_v35  ;;  %v3680_v54 = vmul.f32 %v3677_v37, %v3649_v30 }
 0xf26   :  { %v3688_v7 = vadd.f32 %v5667_v18, %v3679_v32  ;;  %v3689_v34 = vadd.f32 %v5667_v18, %v3680_v54 }
 0xf28   :  { %v3690_v19 = vmul.f32 0.01, %v3688_v7  ;;  %v3691_v57 = vmul.f32 0.01, %v3689_v34 }
 0xf2a   :  { %v3692_v29 = vmax.f32 %v3688_v7, %v3690_v19  ;;  %v3693_v28 = vmax.f32 %v3689_v34, %v3691_v57 }
 0xf2c   :  { %v3703_v25 = vrot.slane %v3692_v29, %v8880_v31  ;;  %v3696_v33 = vcombine.high %v3692_v29, %v3692_v29  ;;  %v3720_v3 = vrot.slane %v3693_v28, %v8880_v31  ;;  %v3713_v5 = vcombine.high %v3693_v28, %v3693_v28 }
 0xf2e   :  { %v5668_v45 = vrot.slane %v3703_v25, 9  ;;  %v3710_v14 = vrot.slane %v3696_v33, %v8880_v31  ;;  %v3727_v39 = vrot.slane %v3713_v5, %v8880_v31  ;;  %v3711_v44 = vcombine.high %v3703_v25, %v3703_v25 }
 0xf2f   :  { %v3728_v36 = vcombine.high %v3720_v3, %v3720_v3  ;;  %v5672_v62 = vrot.slane %v3720_v3, 9 }
 0xf30   :  { %v3762_v0 = vmax.f32 %v3703_v25, %v5668_v45  ;;  %v5670_v6 = vrot.slane %v3710_v14, 9  ;;  %v5669_v8 = vrot.slane %v3711_v44, 9  ;;  %v3712_v40 = vcombine.high %v3710_v14, %v3710_v14 }
 0xf31   :  { %v5673_v53 = vrot.slane %v3728_v36, 9  ;;  %v3729_v52 = vcombine.high %v3727_v39, %v3727_v39  ;;  %v5674_v50 = vrot.slane %v3727_v39, 9  ;;  %v3766_v9 = vmax.f32 %v3720_v3, %v5672_v62 }
 0xf32   :  { %3778 = vrot.lane.b32.xlu0 %v3762_v0, %s6465_s25  ;;  %v3764_v43 = vmax.f32 %v3710_v14, %v5670_v6  ;;  %v3763_v13 = vmax.f32 %v3711_v44, %v5669_v8  ;;  %v5671_v26 = vrot.slane %v3712_v40, 9 }
 0xf33   :  { %v3767_v4 = vmax.f32 %v3728_v36, %v5673_v53  ;;  %v5675_v38 = vrot.slane %v3729_v52, 9  ;;  %v3768_v60 = vmax.f32 %v3727_v39, %v5674_v50 }
 0xf34   :  { %3782 = vrot.lane.b32.xlu1 %v3764_v43, %s6465_s25  ;;  %v3828_v47 = vrot.slane %v3763_v13, 7  ;;  %v3765_v35 = vmax.f32 %v3712_v40, %v5671_v26 }
 0xf35   :  { %v3842_v30 = vrot.slane %v3767_v4, 7  ;;  %v3769_v24 = vmax.f32 %v3729_v52, %v5675_v38 }
 0xf36   :  { %3786 = vrot.lane.b32.xlu0 %v3766_v9, %s6465_s25  ;;  %v3835_v49 = vrot.slane %v3765_v35, 7  ;;  %v3829_v12 = vsel %vm1351_vm9, %v3828_v47, %v3762_v0 }
 0xf37   :  { %v3849_v1 = vrot.slane %v3769_v24, 7  ;;  %v3843_v61 = vsel %vm1351_vm9, %v3842_v30, %v3766_v9  ;;  %v3830_v63 = vsel %vm1353_vm10, %v3828_v47, %v3829_v12 }
 0xf38   :  { %3790 = vrot.lane.b32.xlu1 %v3768_v60, %s6465_s25  ;;  %v3844_v10 = vsel %vm1353_vm10, %v3842_v30, %v3843_v61  ;;  %v3831_v42 = vsel %vm1355_vm14, %v3828_v47, %v3830_v63  ;;  %v3836_v46 = vsel %vm1351_vm9, %v3835_v49, %v3764_v43 }
 0xf39   :  { %v3845_v51 = vsel %vm1355_vm14, %v3842_v30, %v3844_v10  ;;  %v3850_v41 = vsel %vm1351_vm9, %v3849_v1, %v3768_v60  ;;  %v3832_v58 = vsel %vm8935_vm13, %v3828_v47, %v3831_v42  ;;  %v3837_v15 = vsel %vm1353_vm10, %v3835_v49, %v3836_v46  ;;  %vm8942_vm13 = vmmov %vm8938_vm0 }
 0xf3a   :  { %3794 = vrot.lane.b32.xlu0 %v3762_v0, %s6462_s28  ;;  %v8299_v20 = vsel %vm8936_vm1, %v3842_v30, %v3845_v51  ;;  %v3851_v56 = vsel %vm1353_vm10, %v3849_v1, %v3850_v41  ;;  %v3838_v16 = vsel %vm1355_vm14, %v3835_v49, %v3837_v15  ;;  %vm8943_vm1 = vmmov %vm8938_vm0 }
 0xf3b   :  { %v3852_v27 = vsel %vm1355_vm14, %v3849_v1, %v3851_v56  ;;  %v8307_v21 = vsel %vm8937_vm2, %v3835_v49, %v3838_v16  ;;  %vm8944_vm2 = vmmov %vm8938_vm0 }
 0xf3c   :  { %3798 = vrot.lane.b32.xlu1 %v3764_v43, %s6462_s28  ;;  %v8310_v2 = vsel %vm8938_vm0, %v3849_v1, %v3852_v27 }
 0xf3e   :  { %3802 = vrot.lane.b32.xlu0 %v3766_v9, %s6462_s28 }
 0xf40   :  { %3806 = vrot.lane.b32.xlu1 %v3768_v60, %s6462_s28 }
 0xf42   :  { %3810 = vrot.lane.b32.xlu0 %v3762_v0, %s6459_s15 }
 0xf44   :  { %3814 = vrot.lane.b32.xlu1 %v3764_v43, %s6459_s15 }
 0xf46   :  { %3780 = vrot.lane.b32.xlu0 %v3763_v13, %s6465_s25 }
 0xf48   :  { %3784 = vrot.lane.b32.xlu1 %v3765_v35, %s6465_s25 }
 0xf4a   :  { %3788 = vrot.lane.b32.xlu0 %v3767_v4, %s6465_s25 }
 0xf4c   :  { %3792 = vrot.lane.b32.xlu1 %v3769_v24, %s6465_s25 }
 0xf4e   :  { %3796 = vrot.lane.b32.xlu0 %v3763_v13, %s6462_s28 }
 0xf50   :  { %3800 = vrot.lane.b32.xlu1 %v3765_v35, %s6462_s28 }
 0xf52   :  { %3804 = vrot.lane.b32.xlu0 %v3767_v4, %s6462_s28 }
 0xf54   :  { %3808 = vrot.lane.b32.xlu1 %v3769_v24, %s6462_s28 }
 0xf56   :  { %3812 = vrot.lane.b32.xlu0 %v3763_v13, %s6459_s15 }
 0xf58   :  { %3816 = vrot.lane.b32.xlu1 %v3765_v35, %s6459_s15 }
 0xf5a   :  { %3820 = vrot.lane.b32.xlu0 %v3767_v4, %s6459_s15 }
 0xf5c   :  { %3824 = vrot.lane.b32.xlu1 %v3769_v24, %s6459_s15 }
 0xf5e   :  { %3818 = vrot.lane.b32.xlu0 %v3766_v9, %s6459_s15 }
 0xf60   :  { %3822 = vrot.lane.b32.xlu1 %v3768_v60, %s6459_s15 }
 0xfa4   :  { %v3779_v37 = vpop.permute.xlu0 %3778 }
 0xfa6   :  { %v3783_v18 = vpop.permute.xlu1 %3782 }
 0xfa8   :  { %v3787_v32 = vpop.permute.xlu0 %3786 }
 0xfaa   :  { %v3791_v54 = vpop.permute.xlu1 %3790 }
 0xfac   :  { %v3795_v7 = vpop.permute.xlu0 %3794 }
 0xfae   :  { %v8330_v34 = vpop.permute.xlu1 %3798 }
 0xfb0   :  { %v3803_v19 = vpop.permute.xlu0 %3802 }
 0xfb2   :  { %v8332_v57 = vpop.permute.xlu1 %3806 }
 0xfb4   :  { %v3811_v29 = vpop.permute.xlu0 %3810 }
 0xfb6   :  { %v3815_v28 = vpop.permute.xlu1 %3814 }
 0xfb8   :  { %v3781_v25 = vpop.permute.xlu0 %3780 }
 0xfb9   :  { %v3856_v33 = vrot.slane %v3781_v25, 7 }
 0xfba   :  { %v3785_v3 = vpop.permute.xlu1 %3784 }
 0xfbb   :  { %v3857_v5 = vsel %vm1351_vm9, %v3856_v33, %v3779_v37  ;;  %v3863_v9 = vrot.slane %v3785_v3, 7 }
 0xfbc   :  { %v3858_v45 = vsel %vm1353_vm10, %v3856_v33, %v3857_v5  ;;  %v3789_v14 = vpop.permute.xlu0 %3788 }
 0xfbd   :  { %v3859_v39 = vsel %vm1355_vm14, %v3856_v33, %v3858_v45  ;;  %v3870_v44 = vrot.slane %v3789_v14, 7  ;;  %v3864_v61 = vsel %vm1351_vm9, %v3863_v9, %v3783_v18 }
 0xfbe   :  { %v3860_v36 = vsel %vm8939_vm8, %v3856_v33, %v3859_v39  ;;  %v3793_v0 = vpop.permute.xlu1 %3792  ;;  %v3865_v41 = vsel %vm1353_vm10, %v3863_v9, %v3864_v61  ;;  %vm8945_vm8 = vmmov %vm8938_vm0 }
 0xfbf   :  { %v3871_v6 = vsel %vm1351_vm9, %v3870_v44, %v3787_v32  ;;  %v3954_v62 = vcombine.low %v3832_v58, %v3860_v36  ;;  %v3877_v60 = vrot.slane %v3793_v0, 7 }
 0xfc0   :  { %v3872_v8 = vsel %vm1353_vm10, %v3870_v44, %v3871_v6  ;;  %v3797_v40 = vpop.permute.xlu0 %3796 }
 0xfc1   :  { %v3873_v53 = vsel %vm1355_vm14, %v3870_v44, %v3872_v8  ;;  %v3884_v52 = vrot.slane %v3797_v40, 7  ;;  %v8342_v43 = vrot.slane %v3954_v62, %v7203_v48  ;;  %v3878_v58 = vsel %vm1351_vm9, %v3877_v60, %v3791_v54 }
 0xfc2   :  { %v3874_v50 = vsel %vm8940_vm15, %v3870_v44, %v3873_v53  ;;  %v3801_v13 = vpop.permute.xlu1 %3800  ;;  %vm8946_vm15 = vmmov %vm8938_vm0 }
 0xfc3   :  { %4042 = vrot.lane.b32.xlu0 %v8342_v43, %s6464_s30  ;;  %v8349_v26 = vcombine.high %v8342_v43, %v8927_v22  ;;  %v3990_v38 = vcombine.low %v8299_v20, %v3874_v50  ;;  %v3885_v47 = vsel %vm1351_vm9, %v3884_v52, %v3795_v7  ;;  %v3891_v37 = vrot.slane %v3801_v13, 7 }
 0xfc4   :  { %v3805_v4 = vpop.permute.xlu0 %3804  ;;  %v3886_v49 = vsel %vm1353_vm10, %v3884_v52, %v3885_v47 }
 0xfc5   :  { %4046 = vrot.lane.b32.xlu1 %v8349_v26, %s6464_s30  ;;  %v8356_v30 = vrot.slane %v3990_v38, %v7203_v48  ;;  %v3898_v24 = vrot.slane %v3805_v4, 7  ;;  %v3887_v42 = vsel %vm1355_vm14, %v3884_v52, %v3886_v49  ;;  %v3892_v36 = vsel %vm1351_vm9, %v3891_v37, %v8330_v34 }
 0xfc6   :  { %v3809_v35 = vpop.permute.xlu1 %3808  ;;  %v3888_v27 = vsel %vm8941_vm7, %v3884_v52, %v3887_v42  ;;  %vm8947_vm7 = vmmov %vm8938_vm0 }
 0xfc7   :  { %4058 = vrot.lane.b32.xlu0 %v8356_v30, %s6464_s30  ;;  %v8363_v12 = vcombine.high %v8356_v30, %v8927_v22  ;;  %v3899_v51 = vsel %vm1351_vm9, %v3898_v24, %v3803_v19  ;;  %v3866_v19 = vsel %vm1355_vm14, %v3863_v9, %v3865_v41  ;;  %v3905_v62 = vrot.slane %v3809_v35, 7 }
 0xfc8   :  { %v3813_v1 = vpop.permute.xlu0 %3812  ;;  %v3900_v18 = vsel %vm1353_vm10, %v3898_v24, %v3899_v51  ;;  %v3867_v39 = vsel %vm8943_vm1, %v3863_v9, %v3866_v19  ;;  %v3893_v9 = vsel %vm1353_vm10, %v3891_v37, %v3892_v36  ;;  %vm8949_vm1 = vmmov %vm8938_vm0  ;;  %v4299_v19 = vld [vmem:[#allocation11 + $0x68] sm:$0xff] }
 0xfc9   :  { %v3912_v63 = vrot.slane %v3813_v1, 7  ;;  %4062 = vrot.lane.b32.xlu1 %v8363_v12, %s6464_s30  ;;  %v3901_v3 = vsel %vm1355_vm14, %v3898_v24, %v3900_v18  ;;  %v3972_v4 = vcombine.low %v8307_v21, %v3867_v39  ;;  %v3906_v47 = vsel %vm1351_vm9, %v3905_v62, %v8332_v57 }
 0xfca   :  { %v3817_v10 = vpop.permute.xlu1 %3816  ;;  %v3902_v53 = vsel %vm8944_vm2, %v3898_v24, %v3901_v3  ;;  %v3894_v1 = vsel %vm1355_vm14, %v3891_v37, %v3893_v9  ;;  %v3907_v61 = vsel %vm1353_vm10, %v3905_v62, %v3906_v47  ;;  %v4297_v9 = vld [vmem:[#allocation11 + $0x58] sm:$0xff]  ;;  %vm6472_vm2 = vmmov 0  }
 0xfcb   :  { %v3913_v46 = vsel %vm1351_vm9, %v3912_v63, %v3811_v29  ;;  %v3919_v16 = vrot.slane %v3817_v10, 7  ;;  %v3879_v29 = vsel %vm1353_vm10, %v3877_v60, %v3878_v58  ;;  %v3895_v42 = vsel %vm8947_vm7, %v3891_v37, %v3894_v1  ;;  %6076 = vmatprep.mubr.msk.f32.mxu1 %vm6472_vm2, %v8927_v22  ;;  %6038 = vmatprep.mubr.msk.f32.mxu0 %vm6472_vm2, %v8927_v22  ;;  %vm8952_vm7 = vmmov %vm8949_vm1 }
 0xfcc   :  { %v3914_v20 = vsel %vm1353_vm10, %v3912_v63, %v3913_v46  ;;  %v3821_v15 = vpop.permute.xlu0 %3820  ;;  %v3880_v44 = vsel %vm1355_vm14, %v3877_v60, %v3879_v29  ;;  %v3908_v51 = vsel %vm1355_vm14, %v3905_v62, %v3907_v61 }
 0xfcd   :  { %v3915_v56 = vsel %vm1355_vm14, %v3912_v63, %v3914_v20  ;;  %v3926_v25 = vrot.slane %v3821_v15, 7  ;;  %v3920_v5 = vsel %vm1351_vm9, %v3919_v16, %v3815_v28  ;;  %v3881_v38 = vsel %vm8945_vm8, %v3877_v60, %v3880_v44 }
 0xfce   :  { %v3916_v32 = vsel %vm8942_vm13, %v3912_v63, %v3915_v56  ;;  %v3825_v7 = vpop.permute.xlu1 %3824  ;;  %v3921_v52 = vsel %vm1353_vm10, %v3919_v16, %v3920_v5  ;;  %v3979_v60 = vrot.slane %v3972_v4, %v7203_v48  ;;  %v4008_v57 = vcombine.low %v8310_v2, %v3881_v38  ;;  %vm8948_vm13 = vmmov %vm8938_vm0  ;;  %v4298_v38 = vld [vmem:[#allocation11 + $0x60] sm:$0xff] }
 0xfcf   :  { %v3963_v54 = vcombine.low %v3888_v27, %v3916_v32  ;;  %v3933_v8 = vrot.slane %v3825_v7, 7  ;;  %v3922_v35 = vsel %vm1355_vm14, %v3919_v16, %v3921_v52  ;;  %v3909_v20 = vsel %vm8949_vm1, %v3905_v62, %v3908_v51  ;;  %v4301_v32 = vld [vmem:[#allocation11 + $0x78] sm:$0xff]  ;;  %v4300_v7 = vld [vmem:[#allocation11 + $0x70] sm:$0xff] }
 0xfd0   :  { %v3819_v33 = vpop.permute.xlu0 %3818  ;;  %v3923_v63 = vsel %vm8946_vm15, %v3919_v16, %v3922_v35  ;;  %v3980_v46 = vcombine.high %v3979_v60, %v8927_v22  ;;  %v4015_v41 = vrot.slane %v4008_v57, %v7203_v48  ;;  %6061 = vmatpush3.msra.mxu1 %v4301_v32  ;;  %vm8950_vm8 = vcmp.eq.s32.totalorder %v8928_v23, %v8929_v11  ;;  %v5011_v11 = vld [vmem:[#allocation13 + $0x28] sm:$0xff] }
 0xfd1   :  { %v3927_v45 = vsel %vm1351_vm9, %v3926_v25, %v3819_v33  ;;  %v8384_v14 = vrot.slane %v3963_v54, %v7203_v48  ;;  %v3981_v2 = vcombine.low %v3895_v42, %v3923_v63  ;;  %6062 = vmatprep.subr.mxu1 %v8927_v22  ;;  %v4295_v42 = vld [vmem:[#allocation11 + $0x48] sm:$0xff] }
 0xfd2   :  { %v3928_v0 = vsel %vm1353_vm10, %v3926_v25, %v3927_v45  ;;  %v3823_v6 = vpop.permute.xlu1 %3822  ;;  %v4016_v15 = vcombine.high %v4015_v41, %v8927_v22  ;;  %6063 = vmatpush3.msra.mxu1 %v4300_v7  ;;  %v5238_v23 = vld [vmem:[#allocation13 + $0xa8] sm:$0xff] }
 0xfd3   :  { %v3929_v40 = vsel %vm1355_vm14, %v3926_v25, %v3928_v0  ;;  %4044 = vrot.lane.b32.xlu0 %v8384_v14, %s6464_s30  ;;  %v8396_v28 = vcombine.high %v8384_v14, %v8927_v22  ;;  %v3934_v50 = vsel %vm1351_vm9, %v3933_v8, %v3823_v6  ;;  %v8439_v56 = vrot.slane %v3981_v2, %v7203_v48 }
 0xfd4   :  { %v3930_v34 = vsel %vm8938_vm0, %v3926_v25, %v3929_v40  ;;  %v3935_v49 = vsel %vm1353_vm10, %v3933_v8, %v3934_v50  ;;  %6064 = vmatprep.subr.mxu1 %v8927_v22 }
 0xfd5   :  { %4048 = vrot.lane.b32.xlu1 %v8396_v28, %s6464_s30  ;;  %v3999_v13 = vcombine.low %v3902_v53, %v3930_v34  ;;  %v3936_v10 = vsel %vm1355_vm14, %v3933_v8, %v3935_v49  ;;  %v8446_v27 = vcombine.high %v8439_v56, %v8927_v22  ;;  %6065 = vmatpush3.msra.mxu1 %v4299_v19  ;;  %v4296_v49 = vld [vmem:[#allocation11 + $0x50] sm:$0xff] }
 0xfd6   :  { %v3937_v58 = vsel %vm8948_vm13, %v3933_v8, %v3936_v10  ;;  %6066 = vmatprep.subr.mxu1 %v8927_v22  ;;  %vm8953_vm13 = vmmov %vm8949_vm1 }
 0xfd7   :  { %v8411_v24 = vrot.slane %v3999_v13, %v7203_v48  ;;  %v4017_v16 = vcombine.low %v3909_v20, %v3937_v58  ;;  %6067 = vmatpush3.msra.mxu1 %v4298_v38 }
 0xfd8   :  { %6068 = vmatprep.subr.mxu1 %v8927_v22 }
 0xfd9   :  { %4060 = vrot.lane.b32.xlu0 %v8411_v24, %s6464_s30  ;;  %v8419_v21 = vcombine.high %v8411_v24, %v8927_v22  ;;  %v8449_v37 = vrot.slane %v4017_v16, %v7203_v48  ;;  %6069 = vmatpush3.msra.mxu1 %v4297_v9 }
 0xfda   :  { %6070 = vmatprep.subr.mxu1 %v8927_v22 }
 0xfdb   :  { %4064 = vrot.lane.b32.xlu1 %v8419_v21, %s6464_s30  ;;  %v8457_v18 = vcombine.high %v8449_v37, %v8927_v22  ;;  %6071 = vmatpush3.msra.mxu1 %v4296_v49  ;;  %v4379_v49 = vld [vmem:[#allocation11 + $0x20] sm:$0xff] }
 0xfdc   :  { %6072 = vmatprep.subr.mxu1 %v8927_v22 }
 0xfdd   :  { %4050 = vrot.lane.b32.xlu0 %v3979_v60, %s6464_s30  ;;  %6073 = vmatpush3.msra.mxu1 %v4295_v42 }
 0xfde   :  { %6074 = vmatprep.subr.mxu1 %v8927_v22 }
 0xfdf   :  { %4054 = vrot.lane.b32.xlu1 %v3980_v46, %s6464_s30 }
 0xfe1   :  { %4066 = vrot.lane.b32.xlu0 %v4015_v41, %s6464_s30 }
 0xfe3   :  { %4070 = vrot.lane.b32.xlu1 %v4016_v15, %s6464_s30 }
 0xfe5   :  { %4052 = vrot.lane.b32.xlu0 %v8439_v56, %s6464_s30 }
 0xfe7   :  { %4056 = vrot.lane.b32.xlu1 %v8446_v27, %s6464_s30 }
 0xfe9   :  { %4068 = vrot.lane.b32.xlu0 %v8449_v37, %s6464_s30 }
 0xfeb   :  { %4072 = vrot.lane.b32.xlu1 %v8457_v18, %s6464_s30 }
0x1035   :  { %v4043_v29 = vpop.permute.xlu0 %4042 }
0x1036   :  { %v4090_v0 = vmax.f32 %v8342_v43, %v4043_v29 }
0x1037   :  { %v4047_v25 = vpop.permute.xlu1 %4046 }
0x1038   :  { %v4092_v44 = vmax.f32 %v8349_v26, %v4047_v25 }
0x1039   :  { %v4059_v54 = vpop.permute.xlu0 %4058 }
0x103a   :  { %v4106_v8 = vcombine.low %v4090_v0, %v4092_v44  ;;  %v4098_v52 = vmax.f32 %v8356_v30, %v4059_v54 }
0x103b   :  { %v4063_v33 = vpop.permute.xlu1 %4062 }
0x103c   :  { %v4100_v6 = vmax.f32 %v8363_v12, %v4063_v33  ;;  %v4113_v47 = vrot.slane %v4106_v8, %v7203_v48 }
0x103e   :  { %v4124_v13 = vcombine.low %v4098_v52, %v4100_v6 }
0x1040   :  { %v4131_v57 = vrot.slane %v4124_v13, %v7203_v48 }
0x1045   :  { %v4045_v3 = vpop.permute.xlu0 %4044 }
0x1046   :  { %v4091_v51 = vmax.f32 %v8384_v14, %v4045_v3 }
0x1047   :  { %v4049_v5 = vpop.permute.xlu1 %4048 }
0x1048   :  { %v4093_v1 = vmax.f32 %v8396_v28, %v4049_v5 }
0x104b   :  { %v4061_v45 = vpop.permute.xlu0 %4060 }
0x104c   :  { %v4099_v2 = vmax.f32 %v8411_v24, %v4061_v45 }
0x104d   :  { %v4065_v39 = vpop.permute.xlu1 %4064 }
0x104e   :  { %v4101_v61 = vmax.f32 %v8419_v21, %v4065_v39  ;;  %v4142_v21 = vcombine.low %v4091_v51, %v4093_v1  ;;  %v4378_v1 = vld [vmem:[#allocation11 + $0x18] sm:$0xff] }
0x104f   :  { %v4051_v36 = vpop.permute.xlu0 %4050 }
0x1050   :  { %v4094_v40 = vmax.f32 %v3979_v60, %v4051_v36  ;;  %v4160_v32 = vcombine.low %v4099_v2, %v4101_v61  ;;  %v4607_v2 = vld [vmem:[#allocation11 + $0xa0] sm:$0xff] }
0x1051   :  { %v4055_v62 = vpop.permute.xlu1 %4054 }
0x1052   :  { %v4096_v53 = vmax.f32 %v3980_v46, %v4055_v62 }
0x1053   :  { %v4067_v34 = vpop.permute.xlu0 %4066 }
0x1054   :  { %v4115_v50 = vcombine.low %v4094_v40, %v4096_v53  ;;  %v4102_v35 = vmax.f32 %v4015_v41, %v4067_v34  ;;  %v4279_v34 = vand.u32 3, %v8926_v17 }
0x1055   :  { %v4071_v4 = vpop.permute.xlu1 %4070 }
0x1056   :  { %v4122_v26 = vrot.slane %v4115_v50, %v7203_v48  ;;  %v4104_v43 = vmax.f32 %v4016_v15, %v4071_v4  ;;  %vm4287_vm0 = vcmp.ne.s32.totalorder %v4279_v34, 0 }
0x1057   :  { %v4053_v12 = vpop.permute.xlu0 %4052  ;;  %vm4288_vm15 = vmand %vm8950_vm8, %vm4287_vm0 }
0x1058   :  { %v4182_v30 = vcombine.low %v4113_v47, %v4122_v26  ;;  %v4133_v60 = vcombine.low %v4102_v35, %v4104_v43  ;;  %v5676_v63 = vcombine.high %v4113_v47, %v4122_v26  ;;  %v4095_v41 = vmax.f32 %v8439_v56, %v4053_v12  ;;  %v4294_v56 = vld [vmem:[#allocation11 + $0x40] sm:$0xff]  ;;  %v4382_v35 = vld [vmem:[#allocation11 + $0x38] sm:$0xff]  ;;  %v4381_v43 = vld [vmem:[#allocation11 + $0x30] sm:$0xff] }
0x1059   :  { %v4057_v10 = vpop.permute.xlu1 %4056  ;;  %6075 = vmatpush3.msra.mxu1 %v4294_v56  ;;  %v4289_v47 = vsel %vm4288_vm15, 1.0, %v8927_v22  ;;  %v4380_v12 = vld [vmem:[#allocation11 + $0x28] sm:$0xff]  ;;  %vm4928_vm15 = vcmask 31744  }
0x105a   :  { %v4140_v46 = vrot.slane %v4133_v60, %v7203_v48  ;;  %v4097_v28 = vmax.f32 %v8446_v27, %v4057_v10  ;;  %v4212_v14 = vrot.slane %v5676_v63, %v8880_v31  ;;  %v4190_v54 = vrot.slane %v4182_v30, %v8880_v31  ;;  %6103 = vmatprep.subr.mxu1 %v8927_v22  ;;  %v4377_v30 = vld [vmem:[#allocation11 + $0x10] sm:$0xff]  ;;  %v4376_v60 = vld [vmem:[#allocation11 + $0x8] sm:$0xff] }
0x105b   :  { %v4069_v58 = vpop.permute.xlu0 %4068 }
0x105c   :  { %v4183_v20 = vcombine.low %v4131_v57, %v4140_v46  ;;  %v5677_v15 = vcombine.high %v4131_v57, %v4140_v46  ;;  %v4151_v16 = vcombine.low %v4095_v41, %v4097_v28  ;;  %v4103_v7 = vmax.f32 %v8449_v37, %v4069_v58  ;;  %v4375_v57 = vld [vmem:[#allocation11] sm:$0xff]  ;;  %v4610_v46 = vld [vmem:[#allocation11 + $0xb8] sm:$0xff]  ;;  %v4609_v41 = vld [vmem:[#allocation11 + $0xb0] sm:$0xff] }
0x105d   :  { %v4073_v19 = vpop.permute.xlu1 %4072  ;;  %v4149_v37 = vrot.slane %v4142_v21, %v7203_v48  ;;  %v4608_v28 = vld [vmem:[#allocation11 + $0xa8] sm:$0xff]  ;;  %v4606_v58 = vld [vmem:[#allocation11 + $0x98] sm:$0xff]  ;;  %v4605_v21 = vld [vmem:[#allocation11 + $0x90] sm:$0xff] }
0x105e   :  { %v4219_v27 = vrot.slane %v5677_v15, %v8880_v31  ;;  %v4158_v24 = vrot.slane %v4151_v16, %v7203_v48  ;;  %v4105_v29 = vmax.f32 %v8457_v18, %v4073_v19  ;;  %v4197_v25 = vrot.slane %v4183_v20, %v8880_v31  ;;  %v4604_v20 = vld [vmem:[#allocation11 + $0x88] sm:$0xff]  ;;  %v4603_v15 = vld [vmem:[#allocation11 + $0x80] sm:$0xff] }
0x105f   :  { %v4167_v18 = vrot.slane %v4160_v32, %v7203_v48 }
0x1060   :  { %v4169_v33 = vcombine.low %v4103_v7, %v4105_v29  ;;  %v4220_v3 = vcombine.low %v4212_v14, %v4219_v27  ;;  %v4198_v5 = vcombine.low %v4190_v54, %v4197_v25  ;;  %v4228_v45 = vcombine.low %v4149_v37, %v4158_v24 }
0x1061   :  { %v5678_v39 = vcombine.high %v4149_v37, %v4158_v24 }
0x1062   :  { %v4176_v44 = vrot.slane %v4169_v33, %v7203_v48  ;;  %4221 = vrot.lane.b32.xlu0 %v4220_v3, %s6458_s10  ;;  %v4236_v6 = vrot.slane %v4228_v45, %v8880_v31  ;;  %s5587_s10 = sshll.u32 %s6473_s13, 4  ;;  %s5588_s10 = int_to_ptr.vmem [resolvable:$true] %s5587_s10 }
0x1063   :  { %v4260_v62 = vrot.slane %v5678_v39, %v8880_v31  ;;  %p6420_p4 = scmp.lt.s32.totalorder %s5588_s10, %s5588_s10 }
0x1064   :  { %v4229_v36 = vcombine.low %v4167_v18, %v4176_v44  ;;  %v5679_v0 = vcombine.high %v4167_v18, %v4176_v44 }
0x1066   :  { %v4243_v8 = vrot.slane %v4229_v36, %v8880_v31  ;;  %v4267_v40 = vrot.slane %v5679_v0, %v8880_v31 }
0x1068   :  { %v4268_v53 = vcombine.low %v4260_v62, %v4267_v40  ;;  %v4244_v52 = vcombine.low %v4236_v6, %v4243_v8 }
0x106a   :  { %4269 = vrot.lane.b32.xlu0 %v4268_v53, %s6460_s29  ;;  %4245 = vrot.lane.b32.xlu1 %v4244_v52, %s6459_s15 }
0x10d4   :  { %v4222_v50 = vpop.permute.xlu0 %4221 }
0x10d5   :  { %v4272_v13 = vsel %vm239_vm4, %v4198_v5, %v4222_v50  ;;  %vm4290_vm4 = vcmp.ne.s32.totalorder %v4279_v34, 3 }
0x10dc   :  { %v4270_v4 = vpop.permute.xlu0 %4269  ;;  %v4246_v38 = vpop.permute.xlu1 %4245 }
0x10dd   :  { %v4273_v9 = vsel %vm244_vm3, %v4272_v13, %v4246_v38 }
0x10de   :  { %v4274_v26 = vsel %vm249_vm5, %v4273_v9, %v4270_v4  ;;  %vm4291_vm5 = vmand %vm333_vm12, %vm4290_vm4 }
0x10df   :  { %6037 = vmatpush3.msra.mxu0 %v4274_v26  ;;  %6077 = vmatmul.mubr.msk.f32.vlgmr.msra.gmra.mxu1 %vm463_vm11, %v4274_v26  ;;  %v4292_v51 = vsel %vm4291_vm5, 1.0, %v8927_v22 }
0x10e0   :  { %6039 = vmatmul.mubr.msk.f32.vlgmr.msra.gmra.mxu0 %vm3140_vm6, %v4289_v47  ;;  %6041 = vmatprep.subr.mxu0 %v8927_v22 }
0x10e1   :  { %6042 = vmatpush3.msra.mxu0 %v4382_v35  ;;  %6057 = vmatprep.mubr.msk.f32.mxu0 %vm6472_vm2, %v8927_v22 }
0x10e2   :  { %6043 = vmatprep.subr.mxu0 %v8927_v22  ;;  %6105 = vmatprep.mubr.msk.f32.mxu1 %vm6472_vm2, %v8927_v22 }
0x10e3   :  { %6044 = vmatpush3.msra.mxu0 %v4381_v43 }
0x10e4   :  { %6045 = vmatprep.subr.mxu0 %v8927_v22 }
0x10e5   :  { %6046 = vmatpush3.msra.mxu0 %v4380_v12 }
0x10e6   :  { %6047 = vmatprep.subr.mxu0 %v8927_v22 }
0x10e7   :  { %6048 = vmatpush3.msra.mxu0 %v4379_v49  ;;  %v5685_v49 = vld [vmem:[%s8697_s9] ss:$0 sm:$0xff] }
0x10e8   :  { %6049 = vmatprep.subr.mxu0 %v8927_v22 }
0x10e9   :  { %6050 = vmatpush3.msra.mxu0 %v4378_v1 }
0x10ea   :  { %6051 = vmatprep.subr.mxu0 %v8927_v22 }
0x10eb   :  { %6052 = vmatpush3.msra.mxu0 %v4377_v30 }
0x10ec   :  { %6053 = vmatprep.subr.mxu0 %v8927_v22 }
0x10ed   :  { %6054 = vmatpush3.msra.mxu0 %v4376_v60 }
0x10ee   :  { %6055 = vmatprep.subr.mxu0 %v8927_v22 }
0x10ef   :  { %6056 = vmatpush3.msra.mxu0 %v4375_v57 }
0x10f0   :  { %6079 = vmatprep.subr.mxu0 %v8927_v22 }
0x119f   :  { %v4525_v61 = vpop.f32.mrf.mxu1 }
0x11a0   :  { %v4371_v63 = vpop.f32.mrf.mxu0 }
0x11a1   :  { %6058 = vmatmul.mubr.msk.f32.vlgmr.msra.gmra.mxu0 %vm463_vm11, %v4371_v63  ;;  %v6078_v10 = vpop.f32.mrf.mxu1 }
0x11a2   :  { %6080 = vmatpush3.msra.mxu0 %v4274_v26  ;;  %v6040_v42 = vpop.f32.mrf.mxu0  ;;  %6081 = vmatprep.mubr.msk.f32.mxu0 %vm6472_vm2, %v8927_v22  ;;  %v4717_v26 = vld [vmem:[%s8696_s8] sm:$0x1] }
0x11a3   :  { %6084 = vmatprep.subr.mxu0 %v8927_v22 }
0x11a5   :  { %6082 = vmatmul.mubr.msk.f32.vlgmr.msra.gmra.mxu0 %vm3140_vm6, %v4292_v51  ;;  %vm8951_vm6 = vmmov %vm8949_vm1 }
0x11a6   :  { %6085 = vmatpush3.msra.mxu0 %v4610_v46  ;;  %6100 = vmatprep.mubr.msk.f32.mxu0 %vm6472_vm2, %v8927_v22 }
0x11a7   :  { %6086 = vmatprep.subr.mxu0 %v8927_v22 }
0x11a8   :  { %6087 = vmatpush3.msra.mxu0 %v4609_v41 }
0x11a9   :  { %6088 = vmatprep.subr.mxu0 %v8927_v22 }
0x11aa   :  { %6089 = vmatpush3.msra.mxu0 %v4608_v28 }
0x11ab   :  { %6090 = vmatprep.subr.mxu0 %v8927_v22 }
0x11ac   :  { %6091 = vmatpush3.msra.mxu0 %v4607_v2 }
0x11ad   :  { %6092 = vmatprep.subr.mxu0 %v8927_v22 }
0x11ae   :  { %6093 = vmatpush3.msra.mxu0 %v4606_v58 }
0x11af   :  { %6094 = vmatprep.subr.mxu0 %v8927_v22 }
0x11b0   :  { %6095 = vmatpush3.msra.mxu0 %v4605_v21 }
0x11b1   :  { %6096 = vmatprep.subr.mxu0 %v8927_v22 }
0x11b2   :  { %6097 = vmatpush3.msra.mxu0 %v4604_v20 }
0x11b3   :  { %6098 = vmatprep.subr.mxu0 %v8927_v22 }
0x11b4   :  { %6099 = vmatpush3.msra.mxu0 %v4603_v15 }
0x11b5   :  { %6127 = vmatprep.subr.mxu0 %v8927_v22 }
0x1261   :  { %v4452_v16 = vpop.f32.mrf.mxu0 }
0x1262   :  { %v4526_v19 = vadd.f32 %v4525_v61, %v4452_v16 }
0x1263   :  { %v6059_v32 = vpop.f32.mrf.mxu0 }
0x1265   :  { %v4598_v14 = vpop.f32.mrf.mxu0 }
0x1266   :  { %6101 = vmatmul.mubr.msk.f32.vlgmr.msra.gmra.mxu0 %vm463_vm11, %v4598_v14 }
0x1267   :  { %v6083_v7 = vpop.f32.mrf.mxu0  ;;  %6143 = vmatprep.mubr.msk.f32.mxu0 %vm6472_vm2, %v8927_v22 }
0x1326   :  { %v4680_v56 = vpop.f32.mrf.mxu0 }
0x1327   :  { %v4684_v27 = vadd.f32 %v4680_v56, %v4526_v19 }
0x1328   :  { %v6102_v24 = vpop.f32.mrf.mxu0 }
0x1329   :  { %v4685_v29 = vrot.slane %v4684_v27, 4 }
0x132b   :  { %v4686_v25 = vadd.f32 %v4685_v29, %v4684_v27 }
0x132d   :  { %v4687_v54 = vrot.slane %v4686_v25, 2 }
0x132f   :  { %v4688_v37 = vadd.f32 %v4687_v54, %v4686_v25 }
0x1331   :  { %v4689_v33 = vrot.slane %v4688_v37, 1 }
0x1333   :  { %v4690_v3 = vadd.f32 %v4689_v33, %v4688_v37 }
0x1335   :  { %4691 = vrot.lane.b32.xlu1 %v4690_v3, %s6459_s15 }
0x13a7   :  { %v4692_v5 = vpop.permute.xlu1 %4691 }
0x13a8   :  { %v4693_v18 = vadd.f32 %v4692_v5, %v4690_v3 }
0x13aa   :  { %4694 = vrot.lane.b32.xlu0 %v4693_v18, %s6462_s28 }
0x141c   :  { %v4695_v45 = vpop.permute.xlu0 %4694 }
0x141d   :  { %v4696_v39 = vadd.f32 %v4695_v45, %v4693_v18 }
0x141f   :  { %v4697_v44 = vmul.f32 0.03125, %v4696_v39 }
0x1421   :  { %v4701_v36 = vrot.slane %v4697_v44, %v8934_v59 }
0x1423   :  { %v4702_v0 = vsub.f32 %v4684_v27, %v4701_v36 }
0x1425   :  { %v4703_v6 = vmul.f32 %v4702_v0, %v4702_v0 }
0x1427   :  { %v4704_v62 = vrot.slane %v4703_v6, 4 }
0x1429   :  { %v4705_v8 = vadd.f32 %v4704_v62, %v4703_v6 }
0x142b   :  { %v4706_v40 = vrot.slane %v4705_v8, 2 }
0x142d   :  { %v4707_v53 = vadd.f32 %v4706_v40, %v4705_v8 }
0x142f   :  { %v4708_v52 = vrot.slane %v4707_v53, 1 }
0x1431   :  { %v4709_v34 = vadd.f32 %v4708_v52, %v4707_v53 }
0x1433   :  { %4710 = vrot.lane.b32.xlu1 %v4709_v34, %s6459_s15 }
0x14a5   :  { %v4711_v50 = vpop.permute.xlu1 %4710 }
0x14a6   :  { %v4712_v13 = vadd.f32 %v4711_v50, %v4709_v34 }
0x14a8   :  { %4713 = vrot.lane.b32.xlu0 %v4712_v13, %s6462_s28 }
0x151a   :  { %v4714_v4 = vpop.permute.xlu0 %4713 }
0x151b   :  { %v4715_v38 = vadd.f32 %v4714_v4, %v4712_v13  ;;  %v4927_v13 = vld [vmem:[#allocation13 + $0x78] sm:$0xff]  ;;  %v4926_v4 = vld [vmem:[#allocation13 + $0x70] sm:$0xff] }
0x151c   :  { %6128 = vmatpush3.msra.mxu0 %v4927_v13 }
0x151d   :  { %v4716_v9 = vmul.f32 0.03125, %v4715_v38  ;;  %6129 = vmatprep.subr.mxu0 %v8927_v22 }
0x151e   :  { %6130 = vmatpush3.msra.mxu0 %v4926_v4 }
0x151f   :  { %v4718_v47 = vadd.f32 1e-05, %v4716_v9  ;;  %v4925_v9 = vld [vmem:[#allocation13 + $0x68] sm:$0xff]  ;;  %6131 = vmatprep.subr.mxu0 %v8927_v22 }
0x1520   :  { %6132 = vmatpush3.msra.mxu0 %v4925_v9 }
0x1521   :  { %6231 = vrsqrt.f32 %v4718_v47  ;;  %v4924_v47 = vld [vmem:[#allocation13 + $0x60] sm:$0xff]  ;;  %6133 = vmatprep.subr.mxu0 %v8927_v22 }
0x1522   :  { %6134 = vmatpush3.msra.mxu0 %v4924_v47 }
0x1523   :  { %6135 = vmatprep.subr.mxu0 %v8927_v22 }
0x152e   :  { %v6232_v35 = vpop.eup %6231 }
0x152f   :  { %v4720_v43 = vmul.f32 %v6232_v35, %v4717_v26  ;;  %v4923_v26 = vld [vmem:[#allocation13 + $0x58] sm:$0xff]  ;;  %v4922_v35 = vld [vmem:[#allocation13 + $0x50] sm:$0xff] }
0x1530   :  { %6136 = vmatpush3.msra.mxu0 %v4923_v26 }
0x1531   :  { %v4725_v12 = vrot.slane %v4720_v43, %v8934_v59  ;;  %6137 = vmatprep.subr.mxu0 %v8927_v22  ;;  %v4921_v43 = vld [vmem:[#allocation13 + $0x48] sm:$0xff] }
0x1532   :  { %6138 = vmatpush3.msra.mxu0 %v4922_v35 }
0x1533   :  { %v4727_v1 = vmul.f32 %v4725_v12, %v4702_v0  ;;  %6139 = vmatprep.subr.mxu0 %v8927_v22 }
0x1534   :  { %6140 = vmatpush3.msra.mxu0 %v4921_v43 }
0x1535   :  { %v4735_v30 = vadd.f32 %v5685_v49, %v4727_v1  ;;  %6141 = vmatprep.subr.mxu0 %v8927_v22 }
0x1537   :  { %v4736_v60 = vmul.f32 0.01, %v4735_v30 }
0x1539   :  { %v4737_v57 = vmax.f32 %v4735_v30, %v4736_v60  ;;  %v4920_v60 = vld [vmem:[#allocation13 + $0x40] sm:$0xff] }
0x153a   :  { %6142 = vmatpush3.msra.mxu0 %v4920_v60 }
0x153b   :  { %v4746_v61 = vrot.slane %v4737_v57, %v8880_v31  ;;  %v4739_v63 = vcombine.high %v4737_v57, %v4737_v57  ;;  %6170 = vmatprep.subr.mxu0 %v8927_v22 }
0x153d   :  { %v4754_v10 = vcombine.high %v4746_v61, %v4746_v61  ;;  %v4753_v42 = vrot.slane %v4739_v63, %v8880_v31  ;;  %v5686_v41 = vrot.slane %v4746_v61, 9 }
0x153f   :  { %v5687_v51 = vrot.slane %v4754_v10, 9  ;;  %v4755_v46 = vcombine.high %v4753_v42, %v4753_v42  ;;  %v5688_v58 = vrot.slane %v4753_v42, 9  ;;  %v4772_v15 = vmax.f32 %v4746_v61, %v5686_v41 }
0x1541   :  { %v4773_v28 = vmax.f32 %v4754_v10, %v5687_v51  ;;  %v5689_v2 = vrot.slane %v4755_v46, 9  ;;  %v4774_v14 = vmax.f32 %v4753_v42, %v5688_v58 }
0x1543   :  { %4782 = vrot.lane.b32.xlu1 %v4773_v28, %s6462_s28  ;;  %v4790_v21 = vrot.slane %v4773_v28, 7  ;;  %v4775_v20 = vmax.f32 %v4755_v46, %v5689_v2 }
0x1545   :  { %4786 = vrot.lane.b32.xlu0 %v4775_v20, %s6462_s28  ;;  %v4797_v16 = vrot.slane %v4775_v20, 7  ;;  %v4791_v32 = vsel %vm1351_vm9, %v4790_v21, %v4772_v15 }
0x1546   :  { %v4792_v7 = vsel %vm1353_vm10, %v4790_v21, %v4791_v32  ;;  %v5013_v32 = vld [vmem:[#allocation13 + $0x38] sm:$0xff] }
0x1547   :  { %4780 = vrot.lane.b32.xlu1 %v4772_v15, %s6462_s28  ;;  %v4798_v19 = vsel %vm1351_vm9, %v4797_v16, %v4774_v14  ;;  %v4793_v56 = vsel %vm1355_vm14, %v4790_v21, %v4792_v7  ;;  %v5009_v7 = vld [vmem:[#allocation13 + $0x18] sm:$0xff] }
0x1548   :  { %v4799_v27 = vsel %vm1353_vm10, %v4797_v16, %v4798_v19  ;;  %v4794_v24 = vsel %vm8951_vm6, %v4790_v21, %v4793_v56  ;;  %v4905_v21 = vand.u32 1, %v8926_v17  ;;  %v5012_v17 = vld [vmem:[#allocation13 + $0x30] sm:$0xff]  ;;  %v5007_v56 = vld [vmem:[#allocation13 + $0x8] sm:$0xff] }
0x1549   :  { %4784 = vrot.lane.b32.xlu0 %v4774_v14, %s6462_s28  ;;  %v4800_v29 = vsel %vm1355_vm14, %v4797_v16, %v4799_v27  ;;  %v5010_v14 = vld [vmem:[#allocation13 + $0x20] sm:$0xff]  ;;  %v5008_v19 = vld [vmem:[#allocation13 + $0x10] sm:$0xff] }
0x154a   :  { %v4801_v25 = vsel %vm8952_vm7, %v4797_v16, %v4800_v29  ;;  %v5006_v27 = vld [vmem:[#allocation13] sm:$0xff]  ;;  %vm4916_vm4 = vcmp.ne.s32.totalorder %v4905_v21, 1 }
0x154b   :  { %vm4917_vm5 = vmand %vm333_vm12, %vm4916_vm4 }
0x15b5   :  { %v4783_v54 = vpop.permute.xlu1 %4782 }
0x15b6   :  { %v4804_v33 = vrot.slane %v4783_v54, 7 }
0x15b7   :  { %v4787_v37 = vpop.permute.xlu0 %4786 }
0x15b8   :  { %v4811_v5 = vrot.slane %v4787_v37, 7  ;;  %v4918_v37 = vsel %vm4917_vm5, 1.0, %v8927_v22 }
0x15b9   :  { %v4781_v3 = vpop.permute.xlu1 %4780 }
0x15ba   :  { %v4805_v18 = vsel %vm1351_vm9, %v4804_v33, %v4781_v3  ;;  %v5239_v3 = vld [vmem:[#allocation13 + $0xb0] sm:$0xff] }
0x15bb   :  { %v4806_v45 = vsel %vm1353_vm10, %v4804_v33, %v4805_v18  ;;  %v4785_v39 = vpop.permute.xlu0 %4784  ;;  %v5235_v18 = vld [vmem:[#allocation13 + $0x90] sm:$0xff] }
0x15bc   :  { %v4807_v44 = vsel %vm1355_vm14, %v4804_v33, %v4806_v45  ;;  %v4812_v36 = vsel %vm1351_vm9, %v4811_v5, %v4785_v39  ;;  %v5234_v45 = vld [vmem:[#allocation13 + $0x88] sm:$0xff]  ;;  %v5233_v39 = vld [vmem:[#allocation13 + $0x80] sm:$0xff] }
0x15bd   :  { %v4808_v0 = vsel %vm8953_vm13, %v4804_v33, %v4807_v44  ;;  %v4813_v6 = vsel %vm1353_vm10, %v4811_v5, %v4812_v36  ;;  %vm4913_vm10 = vcmp.ne.s32.totalorder %v4905_v21, 0  ;;  %v5240_v33 = vld [vmem:[#allocation13 + $0xb8] sm:$0xff] }
0x15be   :  { %v4814_v62 = vsel %vm1355_vm14, %v4811_v5, %v4813_v6  ;;  %v4820_v8 = vcombine.low %v4794_v24, %v4808_v0  ;;  %vm8954_vm14 = vmmov %vm8950_vm8  ;;  %vm4932_vm8 = vcmask 1043456  }
0x15bf   :  { %v4815_v40 = vsel %vm8949_vm1, %v4811_v5, %v4814_v62  ;;  %vm4914_vm0 = vmand %vm8954_vm14, %vm4913_vm10  ;;  %v5236_v5 = vld [vmem:[#allocation13 + $0x98] sm:$0xff] }
0x15c0   :  { %v4827_v53 = vrot.slane %v4820_v8, %v7203_v48  ;;  %v4829_v52 = vcombine.low %v4801_v25, %v4815_v40  ;;  %v4915_v16 = vsel %vm4914_vm0, 1.0, %v8927_v22 }
0x15c2   :  { %4842 = vrot.lane.b32.xlu1 %v4827_v53, %s6465_s25  ;;  %v4828_v34 = vcombine.high %v4827_v53, %v8927_v22  ;;  %v4836_v50 = vrot.slane %v4829_v52, %v7203_v48 }
0x15c4   :  { %4844 = vrot.lane.b32.xlu0 %v4828_v34, %s6465_s25  ;;  %v4837_v38 = vcombine.high %v4836_v50, %v8927_v22 }
0x15c6   :  { %4846 = vrot.lane.b32.xlu1 %v4836_v50, %s6465_s25 }
0x15c8   :  { %4848 = vrot.lane.b32.xlu0 %v4837_v38, %s6465_s25 }
0x1634   :  { %v4843_v12 = vpop.permute.xlu1 %4842 }
0x1635   :  { %v4854_v57 = vmax.f32 %v4827_v53, %v4843_v12 }
0x1636   :  { %v4845_v49 = vpop.permute.xlu0 %4844 }
0x1637   :  { %v4855_v1 = vmax.f32 %v4828_v34, %v4845_v49 }
0x1638   :  { %v4847_v30 = vpop.permute.xlu1 %4846 }
0x1639   :  { %v4858_v63 = vcombine.low %v4854_v57, %v4855_v1  ;;  %v4856_v10 = vmax.f32 %v4836_v50, %v4847_v30 }
0x163a   :  { %v4849_v61 = vpop.permute.xlu0 %4848 }
0x163b   :  { %v4857_v42 = vmax.f32 %v4837_v38, %v4849_v61  ;;  %v4865_v46 = vrot.slane %v4858_v63, %v7203_v48 }
0x163d   :  { %v4867_v51 = vcombine.low %v4856_v10, %v4857_v42  ;;  %v5400_v42 = vld [vmem:[#allocation14 + $0x38] sm:$0xff] }
0x163f   :  { %v4874_v41 = vrot.slane %v4867_v51, %v7203_v48  ;;  %v5399_v51 = vld [vmem:[#allocation14 + $0x30] sm:$0xff] }
0x1641   :  { %v4878_v28 = vcombine.low %v4865_v46, %v4874_v41  ;;  %v5690_v2 = vcombine.high %v4865_v46, %v4874_v41  ;;  %v5398_v46 = vld [vmem:[#allocation14 + $0x28] sm:$0xff]  ;;  %v5397_v41 = vld [vmem:[#allocation14 + $0x20] sm:$0xff] }
0x1643   :  { %v4896_v58 = vrot.slane %v5690_v2, %v8880_v31  ;;  %v4885_v20 = vrot.slane %v4878_v28, %v8880_v31 }
0x1645   :  { %4897 = vrot.lane.b32.xlu1 %v4896_v58, %s6459_s15 }
0x16b7   :  { %v4898_v15 = vpop.permute.xlu1 %4897 }
0x16b8   :  { %v4900_v48 = vsel %vm244_vm3, %v4885_v20, %v4898_v15  ;;  %v5343_v20 = vld [vmem:[%s8699_s11] sm:$0x1] }
0x16b9   :  { %6104 = vmatpush3.msk.msra.mxu1 %vm4932_vm8, %v4900_v48  ;;  %6144 = vmatmul.mubr.msk.f32.vlgmr.msra.gmra.mxu0 %vm463_vm11, %v4900_v48 }
0x16ba   :  { %6106 = vmatmul.mubr.msk.f32.vlgmr.msra.gmra.mxu1 %vm4928_vm15, %v4915_v16  ;;  %6108 = vmatprep.subr.mxu1 %v8927_v22 }
0x16bb   :  { %6109 = vmatpush3.msra.mxu1 %v5013_v32  ;;  %6124 = vmatprep.mubr.msk.f32.mxu1 %vm6472_vm2, %v8927_v22  ;;  %v5698_v32 = vld [vmem:[%s8700_s12] ss:$0 sm:$0xff] }
0x16bc   :  { %6110 = vmatprep.subr.mxu1 %v8927_v22  ;;  %6186 = vmatprep.mubr.msk.f32.mxu0 %vm6472_vm2, %v8927_v22 }
0x16bd   :  { %6111 = vmatpush3.msra.mxu1 %v5012_v17  ;;  %6171 = vmatpush3.msra.mxu0 %v5400_v42 }
0x16be   :  { %6112 = vmatprep.subr.mxu1 %v8927_v22  ;;  %6172 = vmatprep.subr.mxu0 %v8927_v22 }
0x16bf   :  { %6113 = vmatpush3.msra.mxu1 %v5011_v11  ;;  %6173 = vmatpush3.msra.mxu0 %v5399_v51 }
0x16c0   :  { %6114 = vmatprep.subr.mxu1 %v8927_v22  ;;  %6174 = vmatprep.subr.mxu0 %v8927_v22 }
0x16c1   :  { %6115 = vmatpush3.msra.mxu1 %v5010_v14  ;;  %6175 = vmatpush3.msra.mxu0 %v5398_v46  ;;  %v5396_v14 = vld [vmem:[#allocation14 + $0x18] sm:$0xff] }
0x16c2   :  { %6116 = vmatprep.subr.mxu1 %v8927_v22  ;;  %6176 = vmatprep.subr.mxu0 %v8927_v22 }
0x16c3   :  { %6117 = vmatpush3.msra.mxu1 %v5009_v7  ;;  %6177 = vmatpush3.msra.mxu0 %v5397_v41 }
0x16c4   :  { %6118 = vmatprep.subr.mxu1 %v8927_v22  ;;  %6178 = vmatprep.subr.mxu0 %v8927_v22 }
0x16c5   :  { %6119 = vmatpush3.msra.mxu1 %v5008_v19  ;;  %6179 = vmatpush3.msra.mxu0 %v5396_v14  ;;  %v5395_v19 = vld [vmem:[#allocation14 + $0x10] sm:$0xff] }
0x16c6   :  { %6120 = vmatprep.subr.mxu1 %v8927_v22  ;;  %6180 = vmatprep.subr.mxu0 %v8927_v22 }
0x16c7   :  { %6121 = vmatpush3.msra.mxu1 %v5007_v56  ;;  %v5394_v56 = vld [vmem:[#allocation14 + $0x8] sm:$0xff]  ;;  %6181 = vmatpush3.msra.mxu0 %v5395_v19 }
0x16c8   :  { %6122 = vmatprep.subr.mxu1 %v8927_v22  ;;  %6182 = vmatprep.subr.mxu0 %v8927_v22 }
0x16c9   :  { %6123 = vmatpush3.msra.mxu1 %v5006_v27  ;;  %6183 = vmatpush3.msra.mxu0 %v5394_v56 }
0x16ca   :  { %6146 = vmatprep.subr.mxu1 %v8927_v22  ;;  %6184 = vmatprep.subr.mxu0 %v8927_v22 }
0x1779   :  { %v5155_v24 = vpop.f32.mrf.mxu0 }
0x177a   :  { %v5002_v29 = vpop.f32.mrf.mxu1 }
0x177b   :  { %6125 = vmatmul.mubr.msk.f32.vlgmr.msra.gmra.mxu1 %vm463_vm11, %v5002_v29  ;;  %v6145_v25 = vpop.f32.mrf.mxu0 }
0x177c   :  { %6147 = vmatpush3.msk.msra.mxu1 %vm4932_vm8, %v4900_v48  ;;  %v6107_v54 = vpop.f32.mrf.mxu1  ;;  %6148 = vmatprep.mubr.msk.f32.mxu1 %vm6472_vm2, %v8927_v22 }
0x177d   :  { %6151 = vmatprep.subr.mxu1 %v8927_v22 }
0x177f   :  { %6149 = vmatmul.mubr.msk.f32.vlgmr.msra.gmra.mxu1 %vm4928_vm15, %v4918_v37 }
0x1780   :  { %6152 = vmatpush3.msra.mxu1 %v5240_v33  ;;  %6167 = vmatprep.mubr.msk.f32.mxu1 %vm6472_vm2, %v8927_v22 }
0x1781   :  { %6153 = vmatprep.subr.mxu1 %v8927_v22 }
0x1782   :  { %6154 = vmatpush3.msra.mxu1 %v5239_v3 }
0x1783   :  { %6155 = vmatprep.subr.mxu1 %v8927_v22 }
0x1784   :  { %6156 = vmatpush3.msra.mxu1 %v5238_v23 }
0x1785   :  { %6157 = vmatprep.subr.mxu1 %v8927_v22 }
0x1786   :  { %6158 = vmatpush3.msra.mxu1 %v5237_v55 }
0x1787   :  { %6159 = vmatprep.subr.mxu1 %v8927_v22 }
0x1788   :  { %6160 = vmatpush3.msra.mxu1 %v5236_v5 }
0x1789   :  { %6161 = vmatprep.subr.mxu1 %v8927_v22 }
0x178a   :  { %6162 = vmatpush3.msra.mxu1 %v5235_v18 }
0x178b   :  { %6163 = vmatprep.subr.mxu1 %v8927_v22 }
0x178c   :  { %6164 = vmatpush3.msra.mxu1 %v5234_v45 }
0x178d   :  { %6165 = vmatprep.subr.mxu1 %v8927_v22 }
0x178e   :  { %6166 = vmatpush3.msra.mxu1 %v5233_v39 }
0x178f   :  { %6189 = vmatprep.subr.mxu1 %v8927_v22 }
0x183b   :  { %v5083_v44 = vpop.f32.mrf.mxu1 }
0x183c   :  { %v5156_v62 = vadd.f32 %v5155_v24, %v5083_v44  ;;  %v5393_v24 = vld [vmem:[#allocation14] sm:$0xff]  ;;  %v5496_v44 = vld [vmem:[#allocation16 + $0x18] sm:$0xff] }
0x183d   :  { %v6126_v36 = vpop.f32.mrf.mxu1  ;;  %6185 = vmatpush3.msra.mxu0 %v5393_v24 }
0x183e   :  { %v5495_v36 = vld [vmem:[#allocation16 + $0x10] sm:$0xff] }
0x183f   :  { %v5228_v0 = vpop.f32.mrf.mxu1 }
0x1840   :  { %6168 = vmatmul.mubr.msk.f32.vlgmr.msra.gmra.mxu1 %vm463_vm11, %v5228_v0  ;;  %v5494_v0 = vld [vmem:[#allocation16 + $0x8] sm:$0xff] }
0x1841   :  { %v6150_v6 = vpop.f32.mrf.mxu1  ;;  %6197 = vmatprep.mubr.msk.f32.mxu1 %vm6472_vm2, %v8927_v22  ;;  %6190 = vmatpush3.msra.mxu1 %v5496_v44 }
0x1842   :  { %6191 = vmatprep.subr.mxu1 %v8927_v22  ;;  %v5493_v6 = vld [vmem:[#allocation16] sm:$0xff] }
0x1843   :  { %6192 = vmatpush3.msra.mxu1 %v5495_v36 }
0x1844   :  { %6193 = vmatprep.subr.mxu1 %v8927_v22 }
0x1845   :  { %6194 = vmatpush3.msra.mxu1 %v5494_v0 }
0x1846   :  { %6195 = vmatprep.subr.mxu1 %v8927_v22 }
0x1847   :  { %6196 = vmatpush3.msra.mxu1 %v5493_v6 }
0x1900   :  { %v5310_v8 = vpop.f32.mrf.mxu1 }
0x1901   :  { %v5314_v40 = vadd.f32 %v5310_v8, %v5156_v62 }
0x1902   :  { %v6169_v53 = vpop.f32.mrf.mxu1 }
0x1903   :  { %v5315_v52 = vsel %vm4932_vm8, %v5314_v40, 0.0 }
0x1904   :  { %v5316_v34 = vrot.slane %v5315_v52, 4 }
0x1906   :  { %v5317_v50 = vadd.f32 %v5316_v34, %v5315_v52  ;;  %v5703_v34 = vld [vmem:[%s8704_s16] ss:$0 sm:$0xff] }
0x1908   :  { %v5318_v13 = vrot.slane %v5317_v50, 2 }
0x190a   :  { %v5319_v4 = vadd.f32 %v5318_v13, %v5317_v50 }
0x190c   :  { %v5320_v38 = vrot.slane %v5319_v4, 1 }
0x190e   :  { %v5321_v9 = vadd.f32 %v5320_v38, %v5319_v4 }
0x1910   :  { %5322 = vrot.lane.b32.xlu0 %v5321_v9, %s6462_s28 }
0x1982   :  { %v5323_v47 = vpop.permute.xlu0 %5322 }
0x1983   :  { %v5324_v26 = vadd.f32 %v5323_v47, %v5321_v9 }
0x1985   :  { %v5325_v35 = vmul.f32 0.125, %v5324_v26 }
0x1987   :  { %v5329_v43 = vrot.slane %v5325_v35, %v8934_v59 }
0x1989   :  { %v5330_v12 = vsub.f32 %v5314_v40, %v5329_v43 }
0x198b   :  { %v5331_v49 = vmul.f32 %v5330_v12, %v5330_v12 }
0x198d   :  { %v5332_v1 = vsel %vm4932_vm8, %v5331_v49, 0.0 }
0x198e   :  { %v5333_v30 = vrot.slane %v5332_v1, 4 }
0x1990   :  { %v5334_v60 = vadd.f32 %v5333_v30, %v5332_v1 }
0x1992   :  { %v5335_v57 = vrot.slane %v5334_v60, 2 }
0x1994   :  { %v5336_v61 = vadd.f32 %v5335_v57, %v5334_v60 }
0x1996   :  { %v5337_v63 = vrot.slane %v5336_v61, 1 }
0x1998   :  { %v5338_v10 = vadd.f32 %v5337_v63, %v5336_v61 }
0x199a   :  { %5339 = vrot.lane.b32.xlu1 %v5338_v10, %s6462_s28 }
0x1a0c   :  { %v5340_v28 = vpop.permute.xlu1 %5339 }
0x1a0d   :  { %v5341_v2 = vadd.f32 %v5340_v28, %v5338_v10 }
0x1a0f   :  { %v5342_v58 = vmul.f32 0.125, %v5341_v2 }
0x1a11   :  { %v5344_v21 = vadd.f32 1e-05, %v5342_v58 }
0x1a13   :  { %6233 = vrsqrt.f32 %v5344_v21 }
0x1a20   :  { %v6234_v15 = vpop.eup %6233 }
0x1a21   :  { %v5346_v16 = vmul.f32 %v6234_v15, %v5343_v20 }
0x1a23   :  { %v5351_v48 = vrot.slane %v5346_v16, %v8934_v59 }
0x1a25   :  { %v5353_v17 = vmul.f32 %v5351_v48, %v5330_v12 }
0x1a27   :  { %v5361_v11 = vadd.f32 %v5698_v32, %v5353_v17 }
0x1a29   :  { %v5362_v7 = vmul.f32 0.01, %v5361_v11 }
0x1a2b   :  { %v5363_v27 = vmax.f32 %v5361_v11, %v5362_v7 }
0x1a2d   :  { %v5371_v29 = vrot.slane %v5363_v27, %v8880_v31 }
0x1a2f   :  { %v5699_v25 = vrot.slane %v5371_v29, 9  ;;  %v5372_v54 = vcombine.high %v5371_v29, %v5371_v29 }
0x1a31   :  { %v5381_v37 = vmax.f32 %v5371_v29, %v5699_v25  ;;  %v5700_v33 = vrot.slane %v5372_v54, 9 }
0x1a33   :  { %5385 = vrot.lane.b32.xlu0 %v5381_v37, %s6462_s28  ;;  %v5382_v3 = vmax.f32 %v5372_v54, %v5700_v33 }
0x1a35   :  { %5387 = vrot.lane.b32.xlu1 %v5382_v3, %s6462_s28 }
0x1aa5   :  { %v5386_v23 = vpop.permute.xlu0 %5385 }
0x1aa6   :  { %v5391_v55 = vmax.f32 %v5381_v37, %v5386_v23 }
0x1aa7   :  { %v5388_v5 = vpop.permute.xlu1 %5387 }
0x1aa8   :  { %v5392_v18 = vmax.f32 %v5382_v3, %v5388_v5  ;;  %v5413_v45 = vrot.slane %v5391_v55, %v8934_v59 }
0x1aaa   :  { %v5417_v31 = vrot.slane %v5392_v18, %v8934_v59  ;;  %v5701_v59 = vld [vmem:[%s8702_s14] ss:$0 sm:$0xff]  ;;  %s6415_s14 = scalar_lea.vmem %s5588_s10, 32 }
0x1aab   :  { %p6416_p3 = scmp.ne.s32.totalorder %s5588_s10, %s6415_s14  ;;  %p6421_p5 = scmp.lt.s32.totalorder %s6415_s14, %s6415_s14 }
0x1aac   :  { %v5418_v39 = vsel %vm1351_vm9, %v5417_v31, %v5413_v45 }
0x1aad   :  { %6187 = vmatmul.mubr.msk.f32.vlgmr.msra.gmra.mxu0 %vm463_vm11, %v5418_v39  ;;  %vm5579_vm11 = vcmask 123904   ;;  %p6422_p6 = por %p6421_p5, %p6420_p4 }
0x1aaf   :  { %p6423_p7 = pnand %p6422_p6, %p6416_p3 }
0x1b6d   :  { %v5487_v62 = vpop.f32.mrf.mxu0 }
0x1b6e   :  { %v5488_v8 = vadd.f32 %v5701_v59, %v5487_v62 }
0x1b6f   :  { %v6188_v40 = vpop.f32.mrf.mxu0 }
0x1b70   :  { %v5491_v53 = vmul.f32 0.01, %v5488_v8 }
0x1b72   :  { %v5492_v52 = vmax.f32 %v5488_v8, %v5491_v53 }
0x1b74   :  { %6198 = vmatmul.mubr.msk.f32.vlgmr.msra.gmra.mxu1 %vm244_vm3, %v5492_v52 }
0x1c34   :  { %v5573_v50 = vpop.f32.mrf.mxu1 }
0x1c35   :  { %v5574_v13 = vadd.f32 %v5703_v34, %v5573_v50 }
0x1c36   :  { %v6199_v4 = vpop.f32.mrf.mxu1 }
0x1c37   :  { %v5577_v22 = vmul.f32 0.01, %v5574_v13 }
0x1c39   :  { %v5578_v38 = vmax.f32 %v5574_v13, %v5577_v22 }
0x1c3b   :  { %5580 = vst.msk [vmem:[#allocation17] sm:$0x3] %vm5579_vm11, %v5578_v38 }
0x1c3c   :  { %6426 = shalt.err (!%p6423_p7)
}
0x1c3d   :  { %5590 = dma.vmem_to_hbm [thread:$0]  %s5588_s10, 32, %s8705_s17, [#allocation4]  }
0x1c3e   :  { %6445 = dma.done.wait [#allocation4], 32  }
0x1c3f   :  { %6446 = vsyncadd [#allocation4], 4294967264 }
0x1c40   :  { %5594 = vsyncpa [#allocation3], 1 }
0x1c41   :  { %5595 = vsyncpa [#allocation6], 1 }
0x1c42   :  { %5596 = vsyncpa [#allocation9], 1 }
0x1c43   :  { %5597 = vsyncpa [#allocation12], 1 }
0x1c44   :  { %5598 = vsyncpa [#allocation15], 1 }
0x1c45   :  { %5599 = vsyncpa [#allocation4], 1 }

</bundles_post_ra>
